<compile_context>
chip_gen: v7x
topology: tpu7x:2x2x1
jax: 0.10.0
libtpu: 0.0.40
codegen_flags: <defaults>
</compile_context>

<pallas_src>
import functools

import jax
import jax.numpy as jnp
from jax.experimental import pallas as pl
from jax.experimental.pallas import tpu as pltpu

LANE = 128


def _round_up(x, m):
    return ((x + m - 1) // m) * m


@functools.lru_cache(maxsize=None)
def _vmem_limit_bytes():
    """Generation-aware scoped-VMEM limit (large on v5e/v6e, capped on v7x)."""
    try:
        cap = pltpu.get_tpu_info().vmem_capacity_bytes
    except Exception:  # older jax or no TPU info available
        cap = 64 * 1024 * 1024
    return max(32 * 1024 * 1024, min((cap * 3) // 4, 96 * 1024 * 1024))


def _pick_row_tile(H, W, Cin_p, Cout_p):
    """Largest divisor of H whose per-step working set fits the VMEM budget."""
    budget = _vmem_limit_bytes() // 2  # headroom for weights + pipelining

    def step_bytes(th):
        xb = th * W * Cin_p * 4          # input tile
        yb = th * W * Cout_p * 4         # output tile
        halo = 2 * W * Cin_p * 4         # two 1-row halo tiles
        pad = (th + 2) * (W + 2) * Cin_p * 4
        acc = th * W * Cout_p * 4
        return 2 * (xb + yb + halo) + pad + acc   # 2x = double buffering

    for th in range(H, 0, -1):
        if H % th == 0 and step_bytes(th) <= budget:
            return th
    return 1


# -----------------------------------------------------------------------------
# Kernel 1: [optional fused per-channel affine+ReLU on the input]
#           -> 3x3 conv (padding=1, bias=False) as 9 accumulated MXU dots
#           -> per-(image, row-tile) channel sum / sum-of-squares partials.
# Grid: (N, H // TH), both axes "parallel".
# -----------------------------------------------------------------------------
def _conv3x3_kernel(x_ref, xt_ref, xb_ref, w_ref, scale_ref, bias_ref,   # inputs
                    y_ref, sum_ref, ssq_ref,                             # outputs
                    pad_ref,                                             # scratch
                    *, TH, W, Cin_p, Cout_p, apply_input_act):
    r = pl.program_id(1)
    last = pl.num_programs(1) - 1

    if apply_input_act:
        s = scale_ref[...].reshape(1, 1, Cin_p)
        b = bias_ref[...].reshape(1, 1, Cin_p)

        def act(v):
            return jnp.maximum(v * s + b, jnp.float32(0.0))
    else:
        def act(v):
            return v

    x = act(x_ref[0])        # (TH, W, Cin_p)
    top = act(xt_ref[0])     # (1,  W, Cin_p)  row above this tile (garbage if r==0)
    bot = act(xb_ref[0])     # (1,  W, Cin_p)  row below this tile (garbage if r==last)

    # conv padding applies AFTER the fused activation -> halo rows are zero at the
    # image boundary regardless of the affine bias.
    top = jnp.where(r == 0, jnp.zeros_like(top), top)
    bot = jnp.where(r == last, jnp.zeros_like(bot), bot)

    # Build the padded row tile.  Only the thin halo is extra work (2 columns +
    # 2 rows); the interior is the tile itself.  Every element read below is
    # written here each step, so no cross-step scratch persistence is needed
    # (safe under megacore grid sharding).
    zcol = jnp.zeros((TH + 2, 1, Cin_p), jnp.float32)
    pad_ref[:, pl.ds(0, 1), :] = zcol
    pad_ref[:, pl.ds(W + 1, 1), :] = zcol
    pad_ref[pl.ds(0, 1), pl.ds(1, W), :] = top
    pad_ref[pl.ds(TH + 1, 1), pl.ds(1, W), :] = bot
    pad_ref[pl.ds(1, TH), pl.ds(1, W), :] = x

    # 9 accumulated taps: (TH*W, Cin_p) x (Cin_p, Cout_p), f32 accumulation.
    cdtype = w_ref.dtype
    acc = jnp.zeros((TH * W, Cout_p), jnp.float32)
    for idx in range(9):
        dh, dw = idx // 3, idx % 3
        tap = pad_ref[pl.ds(dh, TH), pl.ds(dw, W), :].reshape(TH * W, Cin_p)
        wk = w_ref[pl.ds(idx * Cin_p, Cin_p), :]
        acc = acc + jnp.dot(tap.astype(cdtype), wk,
                            preferred_element_type=jnp.float32)

    y_ref[...] = acc.reshape(1, TH, W, Cout_p)
    sum_ref[...] = acc.sum(axis=0).reshape(1, 1, 1, Cout_p)
    ssq_ref[...] = (acc * acc).sum(axis=0).reshape(1, 1, 1, Cout_p)


def conv3x3_pallas(x, w_im2col, in_scale, in_bias, *, apply_input_act,
                   row_tile=None, use_bf16=False):
    """x: (N, H, W, Cin_p) f32 lane-dense; w_im2col: (9*Cin_p, Cout_p).
    Returns (y (N,H,W,Cout_p), partial sums (N,RT,1,Cout_p), partial sumsqs)."""
    N, H, W, Cin_p = x.shape
    K, Cout_p = w_im2col.shape
    assert K == 9 * Cin_p

    TH = _pick_row_tile(H, W, Cin_p, Cout_p) if row_tile is None else row_tile
    assert H % TH == 0, "row_tile must divide H"
    RT = H // TH

    w_pass = w_im2col.astype(jnp.bfloat16) if use_bf16 else w_im2col

    kernel = functools.partial(_conv3x3_kernel, TH=TH, W=W, Cin_p=Cin_p,
                               Cout_p=Cout_p, apply_input_act=apply_input_act)

    return pl.pallas_call(
        kernel,
        out_shape=(
            jax.ShapeDtypeStruct((N, H, W, Cout_p), jnp.float32),
            jax.ShapeDtypeStruct((N, RT, 1, Cout_p), jnp.float32),
            jax.ShapeDtypeStruct((N, RT, 1, Cout_p), jnp.float32),
        ),
        grid_spec=pltpu.PrefetchScalarGridSpec(
            num_scalar_prefetch=0,
            grid=(N, RT),
            in_specs=[
                # current row tile
                pl.BlockSpec((1, TH, W, Cin_p), lambda n, r: (n, r, 0, 0)),
                # single row above the tile (clamped; zeroed in-kernel at r==0)
                pl.BlockSpec((1, 1, W, Cin_p),
                             lambda n, r: (n, jnp.maximum(r * TH - 1, 0), 0, 0)),
                # single row below the tile (clamped; zeroed in-kernel at r==last)
                pl.BlockSpec((1, 1, W, Cin_p),
                             lambda n, r: (n, jnp.minimum((r + 1) * TH, H - 1), 0, 0)),
                # grid-invariant operands
                pl.BlockSpec((9 * Cin_p, Cout_p), lambda n, r: (0, 0)),
                pl.BlockSpec((1, Cin_p), lambda n, r: (0, 0)),
                pl.BlockSpec((1, Cin_p), lambda n, r: (0, 0)),
            ],
            out_specs=[
                pl.BlockSpec((1, TH, W, Cout_p), lambda n, r: (n, r, 0, 0)),
                pl.BlockSpec((1, 1, 1, Cout_p), lambda n, r: (n, r, 0, 0)),
                pl.BlockSpec((1, 1, 1, Cout_p), lambda n, r: (n, r, 0, 0)),
            ],
            scratch_shapes=[
                pltpu.VMEM((TH + 2, W + 2, Cin_p), jnp.float32),   # padded row tile
            ],
        ),
        compiler_params=pltpu.CompilerParams(
            dimension_semantics=("parallel", "parallel"),
            vmem_limit_bytes=_vmem_limit_bytes()),
    )(x, xi_top := x, x, w_pass, in_scale, in_bias) if False else pl.pallas_call(
        kernel,
        out_shape=(
            jax.ShapeDtypeStruct((N, H, W, Cout_p), jnp.float32),
            jax.ShapeDtypeStruct((N, RT, 1, Cout_p), jnp.float32),
            jax.ShapeDtypeStruct((N, RT, 1, Cout_p), jnp.float32),
        ),
        grid_spec=pltpu.PrefetchScalarGridSpec(
            num_scalar_prefetch=0,
            grid=(N, RT),
            in_specs=[
                pl.BlockSpec((1, TH, W, Cin_p), lambda n, r: (n, r, 0, 0)),
                pl.BlockSpec((1, 1, W, Cin_p),
                             lambda n, r: (n, jnp.maximum(r * TH - 1, 0), 0, 0)),
                pl.BlockSpec((1, 1, W, Cin_p),
                             lambda n, r: (n, jnp.minimum((r + 1) * TH, H - 1), 0, 0)),
                pl.BlockSpec((9 * Cin_p, Cout_p), lambda n, r: (0, 0)),
                pl.BlockSpec((1, Cin_p), lambda n, r: (0, 0)),
                pl.BlockSpec((1, Cin_p), lambda n, r: (0, 0)),
            ],
            out_specs=[
                pl.BlockSpec((1, TH, W, Cout_p), lambda n, r: (n, r, 0, 0)),
                pl.BlockSpec((1, 1, 1, Cout_p), lambda n, r: (n, r, 0, 0)),
                pl.BlockSpec((1, 1, 1, Cout_p), lambda n, r: (n, r, 0, 0)),
            ],
            scratch_shapes=[
                pltpu.VMEM((TH + 2, W + 2, Cin_p), jnp.float32),
            ],
        ),
        compiler_params=pltpu.CompilerParams(
            dimension_semantics=("parallel", "parallel"),
            vmem_limit_bytes=_vmem_limit_bytes()),
    )(x, x, x, w_pass, in_scale, in_bias)


# -----------------------------------------------------------------------------
# Kernel 2: final BN2 + ReLU on a lane-dense (rows, Cout_p) slab, with the
# channel un-padding folded into the output block (writes (rows, Cout)).
# -----------------------------------------------------------------------------
def _bn_relu_kernel(y_ref, scale_ref, bias_ref, o_ref, *, Cout):
    y = y_ref[...]
    s = scale_ref[...][:, :Cout]
    b = bias_ref[...][:, :Cout]
    o_ref[...] = jnp.maximum(y[:, :Cout] * s + b, jnp.float32(0.0))


def _pick_block_rows(R, max_rows):
    if R <= max_rows:
        return R
    start = max_rows - (max_rows % 8)
    for d in range(start, 7, -8):
        if R % d == 0:
            return d
    return start if start >= 8 else R   # cdiv grid fallback (masked tail)


def bn_relu_pallas(y2d, scale, bias, Cout, *, max_block_rows=4096):
    R, Cp = y2d.shape
    br = _pick_block_rows(R, max_block_rows)
    kernel = functools.partial(_bn_relu_kernel, Cout=Cout)
    return pl.pallas_call(
        kernel,
        out_shape=jax.ShapeDtypeStruct((R, Cout), jnp.float32),
        grid_spec=pltpu.PrefetchScalarGridSpec(
            num_scalar_prefetch=0,
            grid=(pl.cdiv(R, br),),
            in_specs=[
                pl.BlockSpec((br, Cp), lambda i: (i, 0)),
                pl.BlockSpec((1, Cp), lambda i: (0, 0)),
                pl.BlockSpec((1, Cp), lambda i: (0, 0)),
            ],
            out_specs=pl.BlockSpec((br, Cout), lambda i: (i, 0)),
        ),
        compiler_params=pltpu.CompilerParams(
            dimension_semantics=("parallel",),
            vmem_limit_bytes=_vmem_limit_bytes()),
    )(y2d, scale, bias)


# -----------------------------------------------------------------------------
# Conv2dBlock forward
# -----------------------------------------------------------------------------
def _bn_scale_bias(part_sum, part_ssq, count, gamma, beta, eps=1e-5):
    ch_sum = part_sum.sum(axis=(0, 1, 2))       # (Cout_p,)
    ch_ssq = part_ssq.sum(axis=(0, 1, 2))
    mean = ch_sum / count
    # one-pass biased variance (training-mode BN); clamped at 0 for safety.
    var = jnp.maximum(ch_ssq / count - mean * mean, 0.0)
    scale = gamma[0] / jnp.sqrt(var + eps)
    bias = beta[0] - mean * scale
    return scale.reshape(1, -1), bias.reshape(1, -1)


def conv2d_block_forward(x_nchw, params, do_batch_norm=True, *,
                         row_tile=None, use_bf16_matmul=False,
                         output_layout="NCHW"):
    """x_nchw: (N, Cin, H, W) f32 -> (N, Cout, H, W) f32 (or NHWC if requested)."""
    N, Cin, H, W = x_nchw.shape
    Cout = params["out_channels"]
    Cin_p = _round_up(Cin, LANE)
    Cout_p = _round_up(Cout, LANE)

    # Boundary layout glue: NCHW -> channel-padded lane-dense NHWC (done once on
    # the small input); intermediate activations never leave this layout.
    x = jnp.transpose(x_nchw, (0, 2, 3, 1)).astype(jnp.float32)
    x = jnp.pad(x, ((0, 0), (0, 0), (0, 0), (0, Cin_p - Cin)))

    count = jnp.float32(N * H * W)
    ones_in = jnp.ones((1, Cin_p), jnp.float32)
    zeros_in = jnp.zeros((1, Cin_p), jnp.float32)

    # --- conv1 (+ partial batch stats) ---
    y1, s1, q1 = conv3x3_pallas(x, params["w1"], ones_in, zeros_in,
                                apply_input_act=False, row_tile=row_tile,
                                use_bf16=use_bf16_matmul)
    if do_batch_norm:
        scale1, bias1 = _bn_scale_bias(s1, q1, count,
                                       params["gamma1"], params["beta1"])
    else:
        scale1 = jnp.ones((1, Cout_p), jnp.float32)
        bias1 = jnp.zeros((1, Cout_p), jnp.float32)

    # --- conv2 with BN1 + ReLU fused into its input path (+ partial stats) ---
    y2, s2, q2 = conv3x3_pallas(y1, params["w2"], scale1, bias1,
                                apply_input_act=True, row_tile=row_tile,
                                use_bf16=use_bf16_matmul)
    if do_batch_norm:
        scale2, bias2 = _bn_scale_bias(s2, q2, count,
                                       params["gamma2"], params["beta2"])
    else:
        scale2 = jnp.ones((1, Cout_p), jnp.float32)
        bias2 = jnp.zeros((1, Cout_p), jnp.float32)

    # --- final BN2 + ReLU; channel un-padding folded into the kernel output ---
    a2 = bn_relu_pallas(y2.reshape(N * H * W, Cout_p), scale2, bias2, Cout)
    a2 = a2.reshape(N, H, W, Cout)

    if output_layout == "NHWC":
        return a2                                  # no extra HBM pass
    return jnp.transpose(a2, (0, 3, 1, 2))          # NCHW (PyTorch API parity)


def init_params(key, in_channels, out_channels):
    Cin_p = _round_up(in_channels, LANE)
    Cout_p = _round_up(out_channels, LANE)
    k1, k2 = jax.random.split(key)
    w1 = jax.random.normal(k1, (3, 3, in_channels, out_channels), jnp.float32) * 0.1
    w2 = jax.random.normal(k2, (3, 3, out_channels, out_channels), jnp.float32) * 0.1

    # Zero-pad channels, flatten to tap-major layout (dh, dw, cin) x cout.
    w1p = jnp.zeros((3, 3, Cin_p, Cout_p), jnp.float32)
    w1p = w1p.at[:, :, :in_channels, :out_channels].set(w1)
    w2p = jnp.zeros((3, 3, Cout_p, Cout_p), jnp.float32)
    w2p = w2p.at[:, :, :out_channels, :out_channels].set(w2)

    # gamma padded with 0 so padded channel lanes stay exactly 0 through BN+ReLU.
    gamma1 = jnp.zeros((1, Cout_p), jnp.float32).at[0, :out_channels].set(1.0)
    gamma2 = jnp.zeros((1, Cout_p), jnp.float32).at[0, :out_channels].set(1.0)
    beta = jnp.zeros((1, Cout_p), jnp.float32)

    return {
        "w1": w1p.reshape(9 * Cin_p, Cout_p),
        "w2": w2p.reshape(9 * Cout_p, Cout_p),
        "gamma1": gamma1, "beta1": beta,
        "gamma2": gamma2, "beta2": beta,
        "out_channels": out_channels,
    }


# Pure-JAX reference (mirrors the PyTorch module in training mode).
def _reference_forward(x_nchw, params, do_batch_norm=True, eps=1e-5):
    Cin = x_nchw.shape[1]
    Cout = params["out_channels"]
    Cin_p = params["w1"].shape[0] // 9
    Cout_p = params["w1"].shape[1]
    w1 = params["w1"].reshape(3, 3, Cin_p, Cout_p)[:, :, :Cin, :Cout]
    w2 = params["w2"].reshape(3, 3, Cout_p, Cout_p)[:, :, :Cout, :Cout]

    def conv(x, w):
        return jax.lax.conv_general_dilated(
            x, w, window_strides=(1, 1), padding=((1, 1), (1, 1)),
            dimension_numbers=("NCHW", "HWIO", "NCHW"))

    def bn(x, gamma, beta):
        mean = x.mean(axis=(0, 2, 3), keepdims=True)
        var = x.var(axis=(0, 2, 3), keepdims=True)   # biased, training mode
        g = gamma.reshape(1, Cout, 1, 1)
        b = beta.reshape(1, Cout, 1, 1)
        return (x - mean) / jnp.sqrt(var + eps) * g + b

    y = conv(x_nchw.astype(jnp.float32), w1)
    if do_batch_norm:
        y = bn(y, params["gamma1"][0, :Cout], params["beta1"][0, :Cout])
    y = jnp.maximum(y, 0.0)
    y = conv(y, w2)
    if do_batch_norm:
        y = bn(y, params["gamma2"][0, :Cout], params["beta2"][0, :Cout])
    return jnp.maximum(y, 0.0)


if __name__ == "__main__":
    key = jax.random.PRNGKey(0)
    kx, kp = jax.random.split(key)

    N, Cin, Cout, H, W = 2, 4, 8, 16, 16
    x = jax.random.normal(kx, (N, Cin, H, W), jnp.float32)    # NCHW like PyTorch
    params = init_params(kp, Cin, Cout)

    # row_tile=8 exercises the multi-row-tile (halo) path at this small H.
    fwd = jax.jit(functools.partial(conv2d_block_forward, params=params,
                                    do_batch_norm=True, row_tile=8))
    out = jax.block_until_ready(fwd(x))

    assert out.shape == (N, Cout, H, W)
    assert bool(jnp.all(out >= 0.0))          # ReLU output is non-negative
    assert bool(jnp.all(jnp.isfinite(out)))

    ref = _reference_forward(x, params, do_batch_norm=True)
    err = float(jnp.max(jnp.abs(out - ref)))
    assert err < 1e-3, f"max abs err vs reference: {err}"

    print("KERNEL_OK")
</pallas_src>

<mosaic_0001>
module attributes {stable_mosaic.version = 11 : i64} {
  func.func @_conv3x3_kernel(%arg0: i32, %arg1: i32, %arg2: memref<1x8x16x128xf32, #tpu.memory_space<vmem>>, %arg3: memref<1x1x16x128xf32, #tpu.memory_space<vmem>>, %arg4: memref<1x1x16x128xf32, #tpu.memory_space<vmem>>, %arg5: memref<1152x128xf32, #tpu.memory_space<vmem>>, %arg6: memref<1x128xf32, #tpu.memory_space<vmem>>, %arg7: memref<1x128xf32, #tpu.memory_space<vmem>>, %arg8: memref<1x8x16x128xf32, #tpu.memory_space<vmem>>, %arg9: memref<1x1x1x128xf32, #tpu.memory_space<vmem>>, %arg10: memref<1x1x1x128xf32, #tpu.memory_space<vmem>>, %arg11: memref<10x18x128xf32, #tpu.memory_space<vmem>>) attributes {dimension_semantics = [#tpu.dimension_semantics<parallel>, #tpu.dimension_semantics<parallel>], iteration_bounds = array<i64: 2, 2>, scalar_prefetch = 0 : i64, scratch_operands = 1 : i64, tpu.core_type = #tpu.core_type<tc>, window_params = [{transform_indices = @transform_0, window_bounds = array<i64: 1, 8, 16, 128>}, {transform_indices = @transform_1, window_bounds = array<i64: 1, 1, 16, 128>}, {transform_indices = @transform_2, window_bounds = array<i64: 1, 1, 16, 128>}, {pipeline_mode = #tpu.pipeline_mode<synchronous>, transform_indices = @transform_3, window_bounds = array<i64: 1152, 128>}, {pipeline_mode = #tpu.pipeline_mode<synchronous>, transform_indices = @transform_4, window_bounds = array<i64: 1, 128>}, {pipeline_mode = #tpu.pipeline_mode<synchronous>, transform_indices = @transform_5, window_bounds = array<i64: 1, 128>}, {transform_indices = @transform_6, window_bounds = array<i64: 1, 8, 16, 128>}, {transform_indices = @transform_7, window_bounds = array<i64: 1, 1, 1, 128>}, {transform_indices = @transform_8, window_bounds = array<i64: 1, 1, 1, 128>}]} {
    %c0 = arith.constant 0 : index
    %c0_0 = arith.constant 0 : index
    %c0_1 = arith.constant 0 : index
    %c0_2 = arith.constant 0 : index
    %0 = vector.load %arg2[%c0, %c0_0, %c0_1, %c0_2] : memref<1x8x16x128xf32, #tpu.memory_space<vmem>>, vector<1x8x16x128xf32>
    %1 = vector.shape_cast %0 : vector<1x8x16x128xf32> to vector<8x16x128xf32>
    %c0_3 = arith.constant 0 : index
    %c0_4 = arith.constant 0 : index
    %c0_5 = arith.constant 0 : index
    %c0_6 = arith.constant 0 : index
    %2 = vector.load %arg3[%c0_3, %c0_4, %c0_5, %c0_6] : memref<1x1x16x128xf32, #tpu.memory_space<vmem>>, vector<1x1x16x128xf32>
    %3 = vector.shape_cast %2 : vector<1x1x16x128xf32> to vector<1x16x128xf32>
    %c0_7 = arith.constant 0 : index
    %c0_8 = arith.constant 0 : index
    %c0_9 = arith.constant 0 : index
    %c0_10 = arith.constant 0 : index
    %4 = vector.load %arg4[%c0_7, %c0_8, %c0_9, %c0_10] : memref<1x1x16x128xf32, #tpu.memory_space<vmem>>, vector<1x1x16x128xf32>
    %5 = vector.shape_cast %4 : vector<1x1x16x128xf32> to vector<1x16x128xf32>
    %c0_i32 = arith.constant 0 : i32
    %6 = arith.cmpi eq, %arg1, %c0_i32 : i32
    %cst = arith.constant 0.000000e+00 : f32
    %7 = vector.broadcast %cst : f32 to vector<1x16x128xf32>
    %8 = arith.select %6, %7, %3 : vector<1x16x128xf32>
    %c1_i32 = arith.constant 1 : i32
    %9 = arith.cmpi eq, %arg1, %c1_i32 : i32
    %cst_11 = arith.constant 0.000000e+00 : f32
    %10 = vector.broadcast %cst_11 : f32 to vector<1x16x128xf32>
    %11 = arith.select %9, %10, %5 : vector<1x16x128xf32>
    %cst_12 = arith.constant 0.000000e+00 : f32
    %12 = vector.broadcast %cst_12 : f32 to vector<10x1x128xf32>
    %c0_13 = arith.constant 0 : index
    %c0_14 = arith.constant 0 : index
    %c0_15 = arith.constant 0 : index
    %13 = vector.load %arg11[%c0_13, %c0_14, %c0_15] : memref<10x18x128xf32, #tpu.memory_space<vmem>>, vector<10x1x128xf32>
    tpu.vector_store %arg11[%c0_13, %c0_14, %c0_15], %12 {strides = array<i32>} : memref<10x18x128xf32, #tpu.memory_space<vmem>>, vector<10x1x128xf32>,
    %c0_16 = arith.constant 0 : index
    %c17 = arith.constant 17 : index
    %c0_17 = arith.constant 0 : index
    %14 = vector.load %arg11[%c0_16, %c17, %c0_17] : memref<10x18x128xf32, #tpu.memory_space<vmem>>, vector<10x1x128xf32>
    tpu.vector_store %arg11[%c0_16, %c17, %c0_17], %12 {strides = array<i32>} : memref<10x18x128xf32, #tpu.memory_space<vmem>>, vector<10x1x128xf32>,
    %c0_18 = arith.constant 0 : index
    %c1 = arith.constant 1 : index
    %c0_19 = arith.constant 0 : index
    %15 = vector.load %arg11[%c0_18, %c1, %c0_19] : memref<10x18x128xf32, #tpu.memory_space<vmem>>, vector<1x16x128xf32>
    tpu.vector_store %arg11[%c0_18, %c1, %c0_19], %8 {strides = array<i32>} : memref<10x18x128xf32, #tpu.memory_space<vmem>>, vector<1x16x128xf32>,
    %c9 = arith.constant 9 : index
    %c1_20 = arith.constant 1 : index
    %c0_21 = arith.constant 0 : index
    %16 = vector.load %arg11[%c9, %c1_20, %c0_21] : memref<10x18x128xf32, #tpu.memory_space<vmem>>, vector<1x16x128xf32>
    tpu.vector_store %arg11[%c9, %c1_20, %c0_21], %11 {strides = array<i32>} : memref<10x18x128xf32, #tpu.memory_space<vmem>>, vector<1x16x128xf32>,
    %c1_22 = arith.constant 1 : index
    %c1_23 = arith.constant 1 : index
    %c0_24 = arith.constant 0 : index
    %17 = vector.load %arg11[%c1_22, %c1_23, %c0_24] : memref<10x18x128xf32, #tpu.memory_space<vmem>>, vector<8x16x128xf32>
    tpu.vector_store %arg11[%c1_22, %c1_23, %c0_24], %1 {strides = array<i32>} : memref<10x18x128xf32, #tpu.memory_space<vmem>>, vector<8x16x128xf32>,
    %cst_25 = arith.constant 0.000000e+00 : f32
    %18 = vector.broadcast %cst_25 : f32 to vector<128x128xf32>
    %c0_26 = arith.constant 0 : index
    %c0_27 = arith.constant 0 : index
    %c0_28 = arith.constant 0 : index
    %19 = vector.load %arg11[%c0_26, %c0_27, %c0_28] : memref<10x18x128xf32, #tpu.memory_space<vmem>>, vector<8x16x128xf32>
    %20 = vector.shape_cast %19 : vector<8x16x128xf32> to vector<128x128xf32>
    %c0_29 = arith.constant 0 : index
    %c0_30 = arith.constant 0 : index
    %21 = vector.load %arg5[%c0_29, %c0_30] : memref<1152x128xf32, #tpu.memory_space<vmem>>, vector<128x128xf32>
    %cst_31 = arith.constant dense<0.000000e+00> : vector<128x128xf32>
    %22 = tpu.matmul %20, %21, %cst_31 {dimension_numbers = #tpu.dot_dimension_numbers<[1], [0], [0], [1], [0, 0, 1, 1], [], []>} : vector<128x128xf32>, vector<128x128xf32>, vector<128x128xf32> -> vector<128x128xf32>
    %23 = arith.addf %18, %22 : vector<128x128xf32>
    %c0_32 = arith.constant 0 : index
    %c1_33 = arith.constant 1 : index
    %c0_34 = arith.constant 0 : index
    %24 = vector.load %arg11[%c0_32, %c1_33, %c0_34] : memref<10x18x128xf32, #tpu.memory_space<vmem>>, vector<8x16x128xf32>
    %25 = vector.shape_cast %24 : vector<8x16x128xf32> to vector<128x128xf32>
    %c128 = arith.constant 128 : index
    %c0_35 = arith.constant 0 : index
    %26 = vector.load %arg5[%c128, %c0_35] : memref<1152x128xf32, #tpu.memory_space<vmem>>, vector<128x128xf32>
    %cst_36 = arith.constant dense<0.000000e+00> : vector<128x128xf32>
    %27 = tpu.matmul %25, %26, %cst_36 {dimension_numbers = #tpu.dot_dimension_numbers<[1], [0], [0], [1], [0, 0, 1, 1], [], []>} : vector<128x128xf32>, vector<128x128xf32>, vector<128x128xf32> -> vector<128x128xf32>
    %28 = arith.addf %23, %27 : vector<128x128xf32>
    %c0_37 = arith.constant 0 : index
    %c2 = arith.constant 2 : index
    %c0_38 = arith.constant 0 : index
    %29 = vector.load %arg11[%c0_37, %c2, %c0_38] : memref<10x18x128xf32, #tpu.memory_space<vmem>>, vector<8x16x128xf32>
    %30 = vector.shape_cast %29 : vector<8x16x128xf32> to vector<128x128xf32>
    %c256 = arith.constant 256 : index
    %c0_39 = arith.constant 0 : index
    %31 = vector.load %arg5[%c256, %c0_39] : memref<1152x128xf32, #tpu.memory_space<vmem>>, vector<128x128xf32>
    %cst_40 = arith.constant dense<0.000000e+00> : vector<128x128xf32>
    %32 = tpu.matmul %30, %31, %cst_40 {dimension_numbers = #tpu.dot_dimension_numbers<[1], [0], [0], [1], [0, 0, 1, 1], [], []>} : vector<128x128xf32>, vector<128x128xf32>, vector<128x128xf32> -> vector<128x128xf32>
    %33 = arith.addf %28, %32 : vector<128x128xf32>
    %c1_41 = arith.constant 1 : index
    %c0_42 = arith.constant 0 : index
    %c0_43 = arith.constant 0 : index
    %34 = vector.load %arg11[%c1_41, %c0_42, %c0_43] : memref<10x18x128xf32, #tpu.memory_space<vmem>>, vector<8x16x128xf32>
    %35 = vector.shape_cast %34 : vector<8x16x128xf32> to vector<128x128xf32>
    %c384 = arith.constant 384 : index
    %c0_44 = arith.constant 0 : index
    %36 = vector.load %arg5[%c384, %c0_44] : memref<1152x128xf32, #tpu.memory_space<vmem>>, vector<128x128xf32>
    %cst_45 = arith.constant dense<0.000000e+00> : vector<128x128xf32>
    %37 = tpu.matmul %35, %36, %cst_45 {dimension_numbers = #tpu.dot_dimension_numbers<[1], [0], [0], [1], [0, 0, 1, 1], [], []>} : vector<128x128xf32>, vector<128x128xf32>, vector<128x128xf32> -> vector<128x128xf32>
    %38 = arith.addf %33, %37 : vector<128x128xf32>
    %c1_46 = arith.constant 1 : index
    %c1_47 = arith.constant 1 : index
    %c0_48 = arith.constant 0 : index
    %39 = vector.load %arg11[%c1_46, %c1_47, %c0_48] : memref<10x18x128xf32, #tpu.memory_space<vmem>>, vector<8x16x128xf32>
    %40 = vector.shape_cast %39 : vector<8x16x128xf32> to vector<128x128xf32>
    %c512 = arith.constant 512 : index
    %c0_49 = arith.constant 0 : index
    %41 = vector.load %arg5[%c512, %c0_49] : memref<1152x128xf32, #tpu.memory_space<vmem>>, vector<128x128xf32>
    %cst_50 = arith.constant dense<0.000000e+00> : vector<128x128xf32>
    %42 = tpu.matmul %40, %41, %cst_50 {dimension_numbers = #tpu.dot_dimension_numbers<[1], [0], [0], [1], [0, 0, 1, 1], [], []>} : vector<128x128xf32>, vector<128x128xf32>, vector<128x128xf32> -> vector<128x128xf32>
    %43 = arith.addf %38, %42 : vector<128x128xf32>
    %c1_51 = arith.constant 1 : index
    %c2_52 = arith.constant 2 : index
    %c0_53 = arith.constant 0 : index
    %44 = vector.load %arg11[%c1_51, %c2_52, %c0_53] : memref<10x18x128xf32, #tpu.memory_space<vmem>>, vector<8x16x128xf32>
    %45 = vector.shape_cast %44 : vector<8x16x128xf32> to vector<128x128xf32>
    %c640 = arith.constant 640 : index
    %c0_54 = arith.constant 0 : index
    %46 = vector.load %arg5[%c640, %c0_54] : memref<1152x128xf32, #tpu.memory_space<vmem>>, vector<128x128xf32>
    %cst_55 = arith.constant dense<0.000000e+00> : vector<128x128xf32>
    %47 = tpu.matmul %45, %46, %cst_55 {dimension_numbers = #tpu.dot_dimension_numbers<[1], [0], [0], [1], [0, 0, 1, 1], [], []>} : vector<128x128xf32>, vector<128x128xf32>, vector<128x128xf32> -> vector<128x128xf32>
    %48 = arith.addf %43, %47 : vector<128x128xf32>
    %c2_56 = arith.constant 2 : index
    %c0_57 = arith.constant 0 : index
    %c0_58 = arith.constant 0 : index
    %49 = vector.load %arg11[%c2_56, %c0_57, %c0_58] : memref<10x18x128xf32, #tpu.memory_space<vmem>>, vector<8x16x128xf32>
    %50 = vector.shape_cast %49 : vector<8x16x128xf32> to vector<128x128xf32>
    %c768 = arith.constant 768 : index
    %c0_59 = arith.constant 0 : index
    %51 = vector.load %arg5[%c768, %c0_59] : memref<1152x128xf32, #tpu.memory_space<vmem>>, vector<128x128xf32>
    %cst_60 = arith.constant dense<0.000000e+00> : vector<128x128xf32>
    %52 = tpu.matmul %50, %51, %cst_60 {dimension_numbers = #tpu.dot_dimension_numbers<[1], [0], [0], [1], [0, 0, 1, 1], [], []>} : vector<128x128xf32>, vector<128x128xf32>, vector<128x128xf32> -> vector<128x128xf32>
    %53 = arith.addf %48, %52 : vector<128x128xf32>
    %c2_61 = arith.constant 2 : index
    %c1_62 = arith.constant 1 : index
    %c0_63 = arith.constant 0 : index
    %54 = vector.load %arg11[%c2_61, %c1_62, %c0_63] : memref<10x18x128xf32, #tpu.memory_space<vmem>>, vector<8x16x128xf32>
    %55 = vector.shape_cast %54 : vector<8x16x128xf32> to vector<128x128xf32>
    %c896 = arith.constant 896 : index
    %c0_64 = arith.constant 0 : index
    %56 = vector.load %arg5[%c896, %c0_64] : memref<1152x128xf32, #tpu.memory_space<vmem>>, vector<128x128xf32>
    %cst_65 = arith.constant dense<0.000000e+00> : vector<128x128xf32>
    %57 = tpu.matmul %55, %56, %cst_65 {dimension_numbers = #tpu.dot_dimension_numbers<[1], [0], [0], [1], [0, 0, 1, 1], [], []>} : vector<128x128xf32>, vector<128x128xf32>, vector<128x128xf32> -> vector<128x128xf32>
    %58 = arith.addf %53, %57 : vector<128x128xf32>
    %c2_66 = arith.constant 2 : index
    %c2_67 = arith.constant 2 : index
    %c0_68 = arith.constant 0 : index
    %59 = vector.load %arg11[%c2_66, %c2_67, %c0_68] : memref<10x18x128xf32, #tpu.memory_space<vmem>>, vector<8x16x128xf32>
    %60 = vector.shape_cast %59 : vector<8x16x128xf32> to vector<128x128xf32>
    %c1024 = arith.constant 1024 : index
    %c0_69 = arith.constant 0 : index
    %61 = vector.load %arg5[%c1024, %c0_69] : memref<1152x128xf32, #tpu.memory_space<vmem>>, vector<128x128xf32>
    %cst_70 = arith.constant dense<0.000000e+00> : vector<128x128xf32>
    %62 = tpu.matmul %60, %61, %cst_70 {dimension_numbers = #tpu.dot_dimension_numbers<[1], [0], [0], [1], [0, 0, 1, 1], [], []>} : vector<128x128xf32>, vector<128x128xf32>, vector<128x128xf32> -> vector<128x128xf32>
    %63 = arith.addf %58, %62 : vector<128x128xf32>
    %64 = vector.shape_cast %63 : vector<128x128xf32> to vector<1x8x16x128xf32>
    %c0_71 = arith.constant 0 : index
    %c0_72 = arith.constant 0 : index
    %c0_73 = arith.constant 0 : index
    %c0_74 = arith.constant 0 : index
    %65 = vector.load %arg8[%c0_71, %c0_72, %c0_73, %c0_74] : memref<1x8x16x128xf32, #tpu.memory_space<vmem>>, vector<1x8x16x128xf32>
    tpu.vector_store %arg8[%c0_71, %c0_72, %c0_73, %c0_74], %64 {strides = array<i32>} : memref<1x8x16x128xf32, #tpu.memory_space<vmem>>, vector<1x8x16x128xf32>,
    %cst_75 = arith.constant dense<0.000000e+00> : vector<128xf32>
    %66 = vector.multi_reduction <add>, %63, %cst_75 [0] : vector<128x128xf32> to vector<128xf32>
    %67 = vector.shape_cast %66 : vector<128xf32> to vector<1x1x1x128xf32>
    %c0_76 = arith.constant 0 : index
    %c0_77 = arith.constant 0 : index
    %c0_78 = arith.constant 0 : index
    %c0_79 = arith.constant 0 : index
    %68 = vector.load %arg9[%c0_76, %c0_77, %c0_78, %c0_79] : memref<1x1x1x128xf32, #tpu.memory_space<vmem>>, vector<1x1x1x128xf32>
    tpu.vector_store %arg9[%c0_76, %c0_77, %c0_78, %c0_79], %67 {strides = array<i32>} : memref<1x1x1x128xf32, #tpu.memory_space<vmem>>, vector<1x1x1x128xf32>,
    %69 = arith.mulf %63, %63 : vector<128x128xf32>
    %cst_80 = arith.constant dense<0.000000e+00> : vector<128xf32>
    %70 = vector.multi_reduction <add>, %69, %cst_80 [0] : vector<128x128xf32> to vector<128xf32>
    %71 = vector.shape_cast %70 : vector<128xf32> to vector<1x1x1x128xf32>
    %c0_81 = arith.constant 0 : index
    %c0_82 = arith.constant 0 : index
    %c0_83 = arith.constant 0 : index
    %c0_84 = arith.constant 0 : index
    %72 = vector.load %arg10[%c0_81, %c0_82, %c0_83, %c0_84] : memref<1x1x1x128xf32, #tpu.memory_space<vmem>>, vector<1x1x1x128xf32>
    tpu.vector_store %arg10[%c0_81, %c0_82, %c0_83, %c0_84], %71 {strides = array<i32>} : memref<1x1x1x128xf32, #tpu.memory_space<vmem>>, vector<1x1x1x128xf32>,
    return
  }
  func.func @transform_0(%arg0: i32, %arg1: i32) -> (i32, i32, i32, i32) {
    %c0_i32 = arith.constant 0 : i32
    %c0_i32_0 = arith.constant 0 : i32
    %c0_i32_1 = arith.constant 0 : i32
    return %arg0, %arg1, %c0_i32, %c0_i32_0 : i32, i32, i32, i32
  }
  func.func @transform_1(%arg0: i32, %arg1: i32) -> (i32, i32, i32, i32) {
    %c8_i32 = arith.constant 8 : i32
    %0 = arith.muli %arg1, %c8_i32 : i32
    %c1_i32 = arith.constant 1 : i32
    %1 = arith.subi %0, %c1_i32 : i32
    %c0_i32 = arith.constant 0 : i32
    %2 = arith.maxsi %1, %c0_i32 : i32
    %c0_i32_0 = arith.constant 0 : i32
    %c0_i32_1 = arith.constant 0 : i32
    %c0_i32_2 = arith.constant 0 : i32
    return %arg0, %2, %c0_i32_0, %c0_i32_1 : i32, i32, i32, i32
  }
  func.func @transform_2(%arg0: i32, %arg1: i32) -> (i32, i32, i32, i32) {
    %c1_i32 = arith.constant 1 : i32
    %0 = arith.addi %arg1, %c1_i32 : i32
    %c8_i32 = arith.constant 8 : i32
    %1 = arith.muli %0, %c8_i32 : i32
    %c15_i32 = arith.constant 15 : i32
    %2 = arith.minsi %1, %c15_i32 : i32
    %c0_i32 = arith.constant 0 : i32
    %c0_i32_0 = arith.constant 0 : i32
    %c0_i32_1 = arith.constant 0 : i32
    return %arg0, %2, %c0_i32, %c0_i32_0 : i32, i32, i32, i32
  }
  func.func @transform_3(%arg0: i32, %arg1: i32) -> (i32, i32) {
    %c0_i32 = arith.constant 0 : i32
    %c0_i32_0 = arith.constant 0 : i32
    %c0_i32_1 = arith.constant 0 : i32
    return %c0_i32, %c0_i32_0 : i32, i32
  }
  func.func @transform_4(%arg0: i32, %arg1: i32) -> (i32, i32) {
    %c0_i32 = arith.constant 0 : i32
    %c0_i32_0 = arith.constant 0 : i32
    %c0_i32_1 = arith.constant 0 : i32
    return %c0_i32, %c0_i32_0 : i32, i32
  }
  func.func @transform_5(%arg0: i32, %arg1: i32) -> (i32, i32) {
    %c0_i32 = arith.constant 0 : i32
    %c0_i32_0 = arith.constant 0 : i32
    %c0_i32_1 = arith.constant 0 : i32
    return %c0_i32, %c0_i32_0 : i32, i32
  }
  func.func @transform_6(%arg0: i32, %arg1: i32) -> (i32, i32, i32, i32) {
    %c0_i32 = arith.constant 0 : i32
    %c0_i32_0 = arith.constant 0 : i32
    %c0_i32_1 = arith.constant 0 : i32
    return %arg0, %arg1, %c0_i32, %c0_i32_0 : i32, i32, i32, i32
  }
  func.func @transform_7(%arg0: i32, %arg1: i32) -> (i32, i32, i32, i32) {
    %c0_i32 = arith.constant 0 : i32
    %c0_i32_0 = arith.constant 0 : i32
    %c0_i32_1 = arith.constant 0 : i32
    return %arg0, %arg1, %c0_i32, %c0_i32_0 : i32, i32, i32, i32
  }
  func.func @transform_8(%arg0: i32, %arg1: i32) -> (i32, i32, i32, i32) {
    %c0_i32 = arith.constant 0 : i32
    %c0_i32_0 = arith.constant 0 : i32
    %c0_i32_1 = arith.constant 0 : i32
    return %arg0, %arg1, %c0_i32, %c0_i32_0 : i32, i32, i32, i32
  }
}

module attributes {stable_mosaic.version = 11 : i64} {
  func.func @_bn_relu_kernel(%arg0: i32, %arg1: memref<512x128xf32, #tpu.memory_space<vmem>>, %arg2: memref<1x128xf32, #tpu.memory_space<vmem>>, %arg3: memref<1x128xf32, #tpu.memory_space<vmem>>, %arg4: memref<512x8xf32, #tpu.memory_space<vmem>>) attributes {dimension_semantics = [#tpu.dimension_semantics<parallel>], iteration_bounds = array<i64: 1>, scalar_prefetch = 0 : i64, scratch_operands = 0 : i64, tpu.core_type = #tpu.core_type<tc>, window_params = [{transform_indices = @transform_0, window_bounds = array<i64: 512, 128>}, {pipeline_mode = #tpu.pipeline_mode<synchronous>, transform_indices = @transform_1, window_bounds = array<i64: 1, 128>}, {pipeline_mode = #tpu.pipeline_mode<synchronous>, transform_indices = @transform_2, window_bounds = array<i64: 1, 128>}, {transform_indices = @transform_3, window_bounds = array<i64: 512, 8>}]} {
    %c0 = arith.constant 0 : index
    %c0_0 = arith.constant 0 : index
    %0 = vector.load %arg1[%c0, %c0_0] : memref<512x128xf32, #tpu.memory_space<vmem>>, vector<512x128xf32>
    %c0_1 = arith.constant 0 : index
    %c0_2 = arith.constant 0 : index
    %1 = vector.load %arg2[%c0_1, %c0_2] : memref<1x128xf32, #tpu.memory_space<vmem>>, vector<1x128xf32>
    %2 = vector.extract_strided_slice %1 {offsets = [0, 0], sizes = [1, 8], strides = [1, 1]} : vector<1x128xf32> to vector<1x8xf32>
    %c0_3 = arith.constant 0 : index
    %c0_4 = arith.constant 0 : index
    %3 = vector.load %arg3[%c0_3, %c0_4] : memref<1x128xf32, #tpu.memory_space<vmem>>, vector<1x128xf32>
    %4 = vector.extract_strided_slice %3 {offsets = [0, 0], sizes = [1, 8], strides = [1, 1]} : vector<1x128xf32> to vector<1x8xf32>
    %5 = vector.extract_strided_slice %0 {offsets = [0, 0], sizes = [512, 8], strides = [1, 1]} : vector<512x128xf32> to vector<512x8xf32>
    %6 = vector.broadcast %2 : vector<1x8xf32> to vector<512x8xf32>
    %7 = arith.mulf %5, %6 : vector<512x8xf32>
    %8 = vector.broadcast %4 : vector<1x8xf32> to vector<512x8xf32>
    %9 = arith.addf %7, %8 : vector<512x8xf32>
    %cst = arith.constant 0.000000e+00 : f32
    %10 = vector.broadcast %cst : f32 to vector<512x8xf32>
    %11 = arith.maximumf %9, %10 : vector<512x8xf32>
    %c0_5 = arith.constant 0 : index
    %c0_6 = arith.constant 0 : index
    %12 = vector.load %arg4[%c0_5, %c0_6] : memref<512x8xf32, #tpu.memory_space<vmem>>, vector<512x8xf32>
    tpu.vector_store %arg4[%c0_5, %c0_6], %11 {strides = array<i32>} : memref<512x8xf32, #tpu.memory_space<vmem>>, vector<512x8xf32>,
    return
  }
  func.func @transform_0(%arg0: i32) -> (i32, i32) {
    %c0_i32 = arith.constant 0 : i32
    %c0_i32_0 = arith.constant 0 : i32
    return %arg0, %c0_i32 : i32, i32
  }
  func.func @transform_1(%arg0: i32) -> (i32, i32) {
    %c0_i32 = arith.constant 0 : i32
    %c0_i32_0 = arith.constant 0 : i32
    %c0_i32_1 = arith.constant 0 : i32
    return %c0_i32, %c0_i32_0 : i32, i32
  }
  func.func @transform_2(%arg0: i32) -> (i32, i32) {
    %c0_i32 = arith.constant 0 : i32
    %c0_i32_0 = arith.constant 0 : i32
    %c0_i32_1 = arith.constant 0 : i32
    return %c0_i32, %c0_i32_0 : i32, i32
  }
  func.func @transform_3(%arg0: i32) -> (i32, i32) {
    %c0_i32 = arith.constant 0 : i32
    %c0_i32_0 = arith.constant 0 : i32
    return %arg0, %c0_i32 : i32, i32
  }
}

module attributes {stable_mosaic.version = 11 : i64} {
  func.func @_conv3x3_kernel(%arg0: i32, %arg1: i32, %arg2: memref<1x8x16x128xf32, #tpu.memory_space<vmem>>, %arg3: memref<1x1x16x128xf32, #tpu.memory_space<vmem>>, %arg4: memref<1x1x16x128xf32, #tpu.memory_space<vmem>>, %arg5: memref<1152x128xf32, #tpu.memory_space<vmem>>, %arg6: memref<1x128xf32, #tpu.memory_space<vmem>>, %arg7: memref<1x128xf32, #tpu.memory_space<vmem>>, %arg8: memref<1x8x16x128xf32, #tpu.memory_space<vmem>>, %arg9: memref<1x1x1x128xf32, #tpu.memory_space<vmem>>, %arg10: memref<1x1x1x128xf32, #tpu.memory_space<vmem>>, %arg11: memref<10x18x128xf32, #tpu.memory_space<vmem>>) attributes {dimension_semantics = [#tpu.dimension_semantics<parallel>, #tpu.dimension_semantics<parallel>], iteration_bounds = array<i64: 2, 2>, scalar_prefetch = 0 : i64, scratch_operands = 1 : i64, tpu.core_type = #tpu.core_type<tc>, window_params = [{transform_indices = @transform_0, window_bounds = array<i64: 1, 8, 16, 128>}, {transform_indices = @transform_1, window_bounds = array<i64: 1, 1, 16, 128>}, {transform_indices = @transform_2, window_bounds = array<i64: 1, 1, 16, 128>}, {pipeline_mode = #tpu.pipeline_mode<synchronous>, transform_indices = @transform_3, window_bounds = array<i64: 1152, 128>}, {pipeline_mode = #tpu.pipeline_mode<synchronous>, transform_indices = @transform_4, window_bounds = array<i64: 1, 128>}, {pipeline_mode = #tpu.pipeline_mode<synchronous>, transform_indices = @transform_5, window_bounds = array<i64: 1, 128>}, {transform_indices = @transform_6, window_bounds = array<i64: 1, 8, 16, 128>}, {transform_indices = @transform_7, window_bounds = array<i64: 1, 1, 1, 128>}, {transform_indices = @transform_8, window_bounds = array<i64: 1, 1, 1, 128>}]} {
    %c0 = arith.constant 0 : index
    %c0_0 = arith.constant 0 : index
    %0 = vector.load %arg6[%c0, %c0_0] : memref<1x128xf32, #tpu.memory_space<vmem>>, vector<1x128xf32>
    %1 = vector.shape_cast %0 : vector<1x128xf32> to vector<1x1x128xf32>
    %c0_1 = arith.constant 0 : index
    %c0_2 = arith.constant 0 : index
    %2 = vector.load %arg7[%c0_1, %c0_2] : memref<1x128xf32, #tpu.memory_space<vmem>>, vector<1x128xf32>
    %3 = vector.shape_cast %2 : vector<1x128xf32> to vector<1x1x128xf32>
    %c0_3 = arith.constant 0 : index
    %c0_4 = arith.constant 0 : index
    %c0_5 = arith.constant 0 : index
    %c0_6 = arith.constant 0 : index
    %4 = vector.load %arg2[%c0_3, %c0_4, %c0_5, %c0_6] : memref<1x8x16x128xf32, #tpu.memory_space<vmem>>, vector<1x8x16x128xf32>
    %5 = vector.shape_cast %4 : vector<1x8x16x128xf32> to vector<8x16x128xf32>
    %6 = vector.broadcast %1 : vector<1x1x128xf32> to vector<8x16x128xf32>
    %7 = arith.mulf %5, %6 : vector<8x16x128xf32>
    %8 = vector.broadcast %3 : vector<1x1x128xf32> to vector<8x16x128xf32>
    %9 = arith.addf %7, %8 : vector<8x16x128xf32>
    %cst = arith.constant 0.000000e+00 : f32
    %10 = vector.broadcast %cst : f32 to vector<8x16x128xf32>
    %11 = arith.maximumf %9, %10 : vector<8x16x128xf32>
    %c0_7 = arith.constant 0 : index
    %c0_8 = arith.constant 0 : index
    %c0_9 = arith.constant 0 : index
    %c0_10 = arith.constant 0 : index
    %12 = vector.load %arg3[%c0_7, %c0_8, %c0_9, %c0_10] : memref<1x1x16x128xf32, #tpu.memory_space<vmem>>, vector<1x1x16x128xf32>
    %13 = vector.shape_cast %12 : vector<1x1x16x128xf32> to vector<1x16x128xf32>
    %14 = vector.broadcast %1 : vector<1x1x128xf32> to vector<1x16x128xf32>
    %15 = arith.mulf %13, %14 : vector<1x16x128xf32>
    %16 = vector.broadcast %3 : vector<1x1x128xf32> to vector<1x16x128xf32>
    %17 = arith.addf %15, %16 : vector<1x16x128xf32>
    %cst_11 = arith.constant 0.000000e+00 : f32
    %18 = vector.broadcast %cst_11 : f32 to vector<1x16x128xf32>
    %19 = arith.maximumf %17, %18 : vector<1x16x128xf32>
    %c0_12 = arith.constant 0 : index
    %c0_13 = arith.constant 0 : index
    %c0_14 = arith.constant 0 : index
    %c0_15 = arith.constant 0 : index
    %20 = vector.load %arg4[%c0_12, %c0_13, %c0_14, %c0_15] : memref<1x1x16x128xf32, #tpu.memory_space<vmem>>, vector<1x1x16x128xf32>
    %21 = vector.shape_cast %20 : vector<1x1x16x128xf32> to vector<1x16x128xf32>
    %22 = vector.broadcast %1 : vector<1x1x128xf32> to vector<1x16x128xf32>
    %23 = arith.mulf %21, %22 : vector<1x16x128xf32>
    %24 = vector.broadcast %3 : vector<1x1x128xf32> to vector<1x16x128xf32>
    %25 = arith.addf %23, %24 : vector<1x16x128xf32>
    %cst_16 = arith.constant 0.000000e+00 : f32
    %26 = vector.broadcast %cst_16 : f32 to vector<1x16x128xf32>
    %27 = arith.maximumf %25, %26 : vector<1x16x128xf32>
    %c0_i32 = arith.constant 0 : i32
    %28 = arith.cmpi eq, %arg1, %c0_i32 : i32
    %cst_17 = arith.constant 0.000000e+00 : f32
    %29 = vector.broadcast %cst_17 : f32 to vector<1x16x128xf32>
    %30 = arith.select %28, %29, %19 : vector<1x16x128xf32>
    %c1_i32 = arith.constant 1 : i32
    %31 = arith.cmpi eq, %arg1, %c1_i32 : i32
    %cst_18 = arith.constant 0.000000e+00 : f32
    %32 = vector.broadcast %cst_18 : f32 to vector<1x16x128xf32>
    %33 = arith.select %31, %32, %27 : vector<1x16x128xf32>
    %cst_19 = arith.constant 0.000000e+00 : f32
    %34 = vector.broadcast %cst_19 : f32 to vector<10x1x128xf32>
    %c0_20 = arith.constant 0 : index
    %c0_21 = arith.constant 0 : index
    %c0_22 = arith.constant 0 : index
    %35 = vector.load %arg11[%c0_20, %c0_21, %c0_22] : memref<10x18x128xf32, #tpu.memory_space<vmem>>, vector<10x1x128xf32>
    tpu.vector_store %arg11[%c0_20, %c0_21, %c0_22], %34 {strides = array<i32>} : memref<10x18x128xf32, #tpu.memory_space<vmem>>, vector<10x1x128xf32>,
    %c0_23 = arith.constant 0 : index
    %c17 = arith.constant 17 : index
    %c0_24 = arith.constant 0 : index
    %36 = vector.load %arg11[%c0_23, %c17, %c0_24] : memref<10x18x128xf32, #tpu.memory_space<vmem>>, vector<10x1x128xf32>
    tpu.vector_store %arg11[%c0_23, %c17, %c0_24], %34 {strides = array<i32>} : memref<10x18x128xf32, #tpu.memory_space<vmem>>, vector<10x1x128xf32>,
    %c0_25 = arith.constant 0 : index
    %c1 = arith.constant 1 : index
    %c0_26 = arith.constant 0 : index
    %37 = vector.load %arg11[%c0_25, %c1, %c0_26] : memref<10x18x128xf32, #tpu.memory_space<vmem>>, vector<1x16x128xf32>
    tpu.vector_store %arg11[%c0_25, %c1, %c0_26], %30 {strides = array<i32>} : memref<10x18x128xf32, #tpu.memory_space<vmem>>, vector<1x16x128xf32>,
    %c9 = arith.constant 9 : index
    %c1_27 = arith.constant 1 : index
    %c0_28 = arith.constant 0 : index
    %38 = vector.load %arg11[%c9, %c1_27, %c0_28] : memref<10x18x128xf32, #tpu.memory_space<vmem>>, vector<1x16x128xf32>
    tpu.vector_store %arg11[%c9, %c1_27, %c0_28], %33 {strides = array<i32>} : memref<10x18x128xf32, #tpu.memory_space<vmem>>, vector<1x16x128xf32>,
    %c1_29 = arith.constant 1 : index
    %c1_30 = arith.constant 1 : index
    %c0_31 = arith.constant 0 : index
    %39 = vector.load %arg11[%c1_29, %c1_30, %c0_31] : memref<10x18x128xf32, #tpu.memory_space<vmem>>, vector<8x16x128xf32>
    tpu.vector_store %arg11[%c1_29, %c1_30, %c0_31], %11 {strides = array<i32>} : memref<10x18x128xf32, #tpu.memory_space<vmem>>, vector<8x16x128xf32>,
    %cst_32 = arith.constant 0.000000e+00 : f32
    %40 = vector.broadcast %cst_32 : f32 to vector<128x128xf32>
    %c0_33 = arith.constant 0 : index
    %c0_34 = arith.constant 0 : index
    %c0_35 = arith.constant 0 : index
    %41 = vector.load %arg11[%c0_33, %c0_34, %c0_35] : memref<10x18x128xf32, #tpu.memory_space<vmem>>, vector<8x16x128xf32>
    %42 = vector.shape_cast %41 : vector<8x16x128xf32> to vector<128x128xf32>
    %c0_36 = arith.constant 0 : index
    %c0_37 = arith.constant 0 : index
    %43 = vector.load %arg5[%c0_36, %c0_37] : memref<1152x128xf32, #tpu.memory_space<vmem>>, vector<128x128xf32>
    %cst_38 = arith.constant dense<0.000000e+00> : vector<128x128xf32>
    %44 = tpu.matmul %42, %43, %cst_38 {dimension_numbers = #tpu.dot_dimension_numbers<[1], [0], [0], [1], [0, 0, 1, 1], [], []>} : vector<128x128xf32>, vector<128x128xf32>, vector<128x128xf32> -> vector<128x128xf32>
    %45 = arith.addf %40, %44 : vector<128x128xf32>
    %c0_39 = arith.constant 0 : index
    %c1_40 = arith.constant 1 : index
    %c0_41 = arith.constant 0 : index
    %46 = vector.load %arg11[%c0_39, %c1_40, %c0_41] : memref<10x18x128xf32, #tpu.memory_space<vmem>>, vector<8x16x128xf32>
    %47 = vector.shape_cast %46 : vector<8x16x128xf32> to vector<128x128xf32>
    %c128 = arith.constant 128 : index
    %c0_42 = arith.constant 0 : index
    %48 = vector.load %arg5[%c128, %c0_42] : memref<1152x128xf32, #tpu.memory_space<vmem>>, vector<128x128xf32>
    %cst_43 = arith.constant dense<0.000000e+00> : vector<128x128xf32>
    %49 = tpu.matmul %47, %48, %cst_43 {dimension_numbers = #tpu.dot_dimension_numbers<[1], [0], [0], [1], [0, 0, 1, 1], [], []>} : vector<128x128xf32>, vector<128x128xf32>, vector<128x128xf32> -> vector<128x128xf32>
    %50 = arith.addf %45, %49 : vector<128x128xf32>
    %c0_44 = arith.constant 0 : index
    %c2 = arith.constant 2 : index
    %c0_45 = arith.constant 0 : index
    %51 = vector.load %arg11[%c0_44, %c2, %c0_45] : memref<10x18x128xf32, #tpu.memory_space<vmem>>, vector<8x16x128xf32>
    %52 = vector.shape_cast %51 : vector<8x16x128xf32> to vector<128x128xf32>
    %c256 = arith.constant 256 : index
    %c0_46 = arith.constant 0 : index
    %53 = vector.load %arg5[%c256, %c0_46] : memref<1152x128xf32, #tpu.memory_space<vmem>>, vector<128x128xf32>
    %cst_47 = arith.constant dense<0.000000e+00> : vector<128x128xf32>
    %54 = tpu.matmul %52, %53, %cst_47 {dimension_numbers = #tpu.dot_dimension_numbers<[1], [0], [0], [1], [0, 0, 1, 1], [], []>} : vector<128x128xf32>, vector<128x128xf32>, vector<128x128xf32> -> vector<128x128xf32>
    %55 = arith.addf %50, %54 : vector<128x128xf32>
    %c1_48 = arith.constant 1 : index
    %c0_49 = arith.constant 0 : index
    %c0_50 = arith.constant 0 : index
    %56 = vector.load %arg11[%c1_48, %c0_49, %c0_50] : memref<10x18x128xf32, #tpu.memory_space<vmem>>, vector<8x16x128xf32>
    %57 = vector.shape_cast %56 : vector<8x16x128xf32> to vector<128x128xf32>
    %c384 = arith.constant 384 : index
    %c0_51 = arith.constant 0 : index
    %58 = vector.load %arg5[%c384, %c0_51] : memref<1152x128xf32, #tpu.memory_space<vmem>>, vector<128x128xf32>
    %cst_52 = arith.constant dense<0.000000e+00> : vector<128x128xf32>
    %59 = tpu.matmul %57, %58, %cst_52 {dimension_numbers = #tpu.dot_dimension_numbers<[1], [0], [0], [1], [0, 0, 1, 1], [], []>} : vector<128x128xf32>, vector<128x128xf32>, vector<128x128xf32> -> vector<128x128xf32>
    %60 = arith.addf %55, %59 : vector<128x128xf32>
    %c1_53 = arith.constant 1 : index
    %c1_54 = arith.constant 1 : index
    %c0_55 = arith.constant 0 : index
    %61 = vector.load %arg11[%c1_53, %c1_54, %c0_55] : memref<10x18x128xf32, #tpu.memory_space<vmem>>, vector<8x16x128xf32>
    %62 = vector.shape_cast %61 : vector<8x16x128xf32> to vector<128x128xf32>
    %c512 = arith.constant 512 : index
    %c0_56 = arith.constant 0 : index
    %63 = vector.load %arg5[%c512, %c0_56] : memref<1152x128xf32, #tpu.memory_space<vmem>>, vector<128x128xf32>
    %cst_57 = arith.constant dense<0.000000e+00> : vector<128x128xf32>
    %64 = tpu.matmul %62, %63, %cst_57 {dimension_numbers = #tpu.dot_dimension_numbers<[1], [0], [0], [1], [0, 0, 1, 1], [], []>} : vector<128x128xf32>, vector<128x128xf32>, vector<128x128xf32> -> vector<128x128xf32>
    %65 = arith.addf %60, %64 : vector<128x128xf32>
    %c1_58 = arith.constant 1 : index
    %c2_59 = arith.constant 2 : index
    %c0_60 = arith.constant 0 : index
    %66 = vector.load %arg11[%c1_58, %c2_59, %c0_60] : memref<10x18x128xf32, #tpu.memory_space<vmem>>, vector<8x16x128xf32>
    %67 = vector.shape_cast %66 : vector<8x16x128xf32> to vector<128x128xf32>
    %c640 = arith.constant 640 : index
    %c0_61 = arith.constant 0 : index
    %68 = vector.load %arg5[%c640, %c0_61] : memref<1152x128xf32, #tpu.memory_space<vmem>>, vector<128x128xf32>
    %cst_62 = arith.constant dense<0.000000e+00> : vector<128x128xf32>
    %69 = tpu.matmul %67, %68, %cst_62 {dimension_numbers = #tpu.dot_dimension_numbers<[1], [0], [0], [1], [0, 0, 1, 1], [], []>} : vector<128x128xf32>, vector<128x128xf32>, vector<128x128xf32> -> vector<128x128xf32>
    %70 = arith.addf %65, %69 : vector<128x128xf32>
    %c2_63 = arith.constant 2 : index
    %c0_64 = arith.constant 0 : index
    %c0_65 = arith.constant 0 : index
    %71 = vector.load %arg11[%c2_63, %c0_64, %c0_65] : memref<10x18x128xf32, #tpu.memory_space<vmem>>, vector<8x16x128xf32>
    %72 = vector.shape_cast %71 : vector<8x16x128xf32> to vector<128x128xf32>
    %c768 = arith.constant 768 : index
    %c0_66 = arith.constant 0 : index
    %73 = vector.load %arg5[%c768, %c0_66] : memref<1152x128xf32, #tpu.memory_space<vmem>>, vector<128x128xf32>
    %cst_67 = arith.constant dense<0.000000e+00> : vector<128x128xf32>
    %74 = tpu.matmul %72, %73, %cst_67 {dimension_numbers = #tpu.dot_dimension_numbers<[1], [0], [0], [1], [0, 0, 1, 1], [], []>} : vector<128x128xf32>, vector<128x128xf32>, vector<128x128xf32> -> vector<128x128xf32>
    %75 = arith.addf %70, %74 : vector<128x128xf32>
    %c2_68 = arith.constant 2 : index
    %c1_69 = arith.constant 1 : index
    %c0_70 = arith.constant 0 : index
    %76 = vector.load %arg11[%c2_68, %c1_69, %c0_70] : memref<10x18x128xf32, #tpu.memory_space<vmem>>, vector<8x16x128xf32>
    %77 = vector.shape_cast %76 : vector<8x16x128xf32> to vector<128x128xf32>
    %c896 = arith.constant 896 : index
    %c0_71 = arith.constant 0 : index
    %78 = vector.load %arg5[%c896, %c0_71] : memref<1152x128xf32, #tpu.memory_space<vmem>>, vector<128x128xf32>
    %cst_72 = arith.constant dense<0.000000e+00> : vector<128x128xf32>
    %79 = tpu.matmul %77, %78, %cst_72 {dimension_numbers = #tpu.dot_dimension_numbers<[1], [0], [0], [1], [0, 0, 1, 1], [], []>} : vector<128x128xf32>, vector<128x128xf32>, vector<128x128xf32> -> vector<128x128xf32>
    %80 = arith.addf %75, %79 : vector<128x128xf32>
    %c2_73 = arith.constant 2 : index
    %c2_74 = arith.constant 2 : index
    %c0_75 = arith.constant 0 : index
    %81 = vector.load %arg11[%c2_73, %c2_74, %c0_75] : memref<10x18x128xf32, #tpu.memory_space<vmem>>, vector<8x16x128xf32>
    %82 = vector.shape_cast %81 : vector<8x16x128xf32> to vector<128x128xf32>
    %c1024 = arith.constant 1024 : index
    %c0_76 = arith.constant 0 : index
    %83 = vector.load %arg5[%c1024, %c0_76] : memref<1152x128xf32, #tpu.memory_space<vmem>>, vector<128x128xf32>
    %cst_77 = arith.constant dense<0.000000e+00> : vector<128x128xf32>
    %84 = tpu.matmul %82, %83, %cst_77 {dimension_numbers = #tpu.dot_dimension_numbers<[1], [0], [0], [1], [0, 0, 1, 1], [], []>} : vector<128x128xf32>, vector<128x128xf32>, vector<128x128xf32> -> vector<128x128xf32>
    %85 = arith.addf %80, %84 : vector<128x128xf32>
    %86 = vector.shape_cast %85 : vector<128x128xf32> to vector<1x8x16x128xf32>
    %c0_78 = arith.constant 0 : index
    %c0_79 = arith.constant 0 : index
    %c0_80 = arith.constant 0 : index
    %c0_81 = arith.constant 0 : index
    %87 = vector.load %arg8[%c0_78, %c0_79, %c0_80, %c0_81] : memref<1x8x16x128xf32, #tpu.memory_space<vmem>>, vector<1x8x16x128xf32>
    tpu.vector_store %arg8[%c0_78, %c0_79, %c0_80, %c0_81], %86 {strides = array<i32>} : memref<1x8x16x128xf32, #tpu.memory_space<vmem>>, vector<1x8x16x128xf32>,
    %cst_82 = arith.constant dense<0.000000e+00> : vector<128xf32>
    %88 = vector.multi_reduction <add>, %85, %cst_82 [0] : vector<128x128xf32> to vector<128xf32>
    %89 = vector.shape_cast %88 : vector<128xf32> to vector<1x1x1x128xf32>
    %c0_83 = arith.constant 0 : index
    %c0_84 = arith.constant 0 : index
    %c0_85 = arith.constant 0 : index
    %c0_86 = arith.constant 0 : index
    %90 = vector.load %arg9[%c0_83, %c0_84, %c0_85, %c0_86] : memref<1x1x1x128xf32, #tpu.memory_space<vmem>>, vector<1x1x1x128xf32>
    tpu.vector_store %arg9[%c0_83, %c0_84, %c0_85, %c0_86], %89 {strides = array<i32>} : memref<1x1x1x128xf32, #tpu.memory_space<vmem>>, vector<1x1x1x128xf32>,
    %91 = arith.mulf %85, %85 : vector<128x128xf32>
    %cst_87 = arith.constant dense<0.000000e+00> : vector<128xf32>
    %92 = vector.multi_reduction <add>, %91, %cst_87 [0] : vector<128x128xf32> to vector<128xf32>
    %93 = vector.shape_cast %92 : vector<128xf32> to vector<1x1x1x128xf32>
    %c0_88 = arith.constant 0 : index
    %c0_89 = arith.constant 0 : index
    %c0_90 = arith.constant 0 : index
    %c0_91 = arith.constant 0 : index
    %94 = vector.load %arg10[%c0_88, %c0_89, %c0_90, %c0_91] : memref<1x1x1x128xf32, #tpu.memory_space<vmem>>, vector<1x1x1x128xf32>
    tpu.vector_store %arg10[%c0_88, %c0_89, %c0_90, %c0_91], %93 {strides = array<i32>} : memref<1x1x1x128xf32, #tpu.memory_space<vmem>>, vector<1x1x1x128xf32>,
    return
  }
  func.func @transform_0(%arg0: i32, %arg1: i32) -> (i32, i32, i32, i32) {
    %c0_i32 = arith.constant 0 : i32
    %c0_i32_0 = arith.constant 0 : i32
    %c0_i32_1 = arith.constant 0 : i32
    return %arg0, %arg1, %c0_i32, %c0_i32_0 : i32, i32, i32, i32
  }
  func.func @transform_1(%arg0: i32, %arg1: i32) -> (i32, i32, i32, i32) {
    %c8_i32 = arith.constant 8 : i32
    %0 = arith.muli %arg1, %c8_i32 : i32
    %c1_i32 = arith.constant 1 : i32
    %1 = arith.subi %0, %c1_i32 : i32
    %c0_i32 = arith.constant 0 : i32
    %2 = arith.maxsi %1, %c0_i32 : i32
    %c0_i32_0 = arith.constant 0 : i32
    %c0_i32_1 = arith.constant 0 : i32
    %c0_i32_2 = arith.constant 0 : i32
    return %arg0, %2, %c0_i32_0, %c0_i32_1 : i32, i32, i32, i32
  }
  func.func @transform_2(%arg0: i32, %arg1: i32) -> (i32, i32, i32, i32) {
    %c1_i32 = arith.constant 1 : i32
    %0 = arith.addi %arg1, %c1_i32 : i32
    %c8_i32 = arith.constant 8 : i32
    %1 = arith.muli %0, %c8_i32 : i32
    %c15_i32 = arith.constant 15 : i32
    %2 = arith.minsi %1, %c15_i32 : i32
    %c0_i32 = arith.constant 0 : i32
    %c0_i32_0 = arith.constant 0 : i32
    %c0_i32_1 = arith.constant 0 : i32
    return %arg0, %2, %c0_i32, %c0_i32_0 : i32, i32, i32, i32
  }
  func.func @transform_3(%arg0: i32, %arg1: i32) -> (i32, i32) {
    %c0_i32 = arith.constant 0 : i32
    %c0_i32_0 = arith.constant 0 : i32
    %c0_i32_1 = arith.constant 0 : i32
    return %c0_i32, %c0_i32_0 : i32, i32
  }
  func.func @transform_4(%arg0: i32, %arg1: i32) -> (i32, i32) {
    %c0_i32 = arith.constant 0 : i32
    %c0_i32_0 = arith.constant 0 : i32
    %c0_i32_1 = arith.constant 0 : i32
    return %c0_i32, %c0_i32_0 : i32, i32
  }
  func.func @transform_5(%arg0: i32, %arg1: i32) -> (i32, i32) {
    %c0_i32 = arith.constant 0 : i32
    %c0_i32_0 = arith.constant 0 : i32
    %c0_i32_1 = arith.constant 0 : i32
    return %c0_i32, %c0_i32_0 : i32, i32
  }
  func.func @transform_6(%arg0: i32, %arg1: i32) -> (i32, i32, i32, i32) {
    %c0_i32 = arith.constant 0 : i32
    %c0_i32_0 = arith.constant 0 : i32
    %c0_i32_1 = arith.constant 0 : i32
    return %arg0, %arg1, %c0_i32, %c0_i32_0 : i32, i32, i32, i32
  }
  func.func @transform_7(%arg0: i32, %arg1: i32) -> (i32, i32, i32, i32) {
    %c0_i32 = arith.constant 0 : i32
    %c0_i32_0 = arith.constant 0 : i32
    %c0_i32_1 = arith.constant 0 : i32
    return %arg0, %arg1, %c0_i32, %c0_i32_0 : i32, i32, i32, i32
  }
  func.func @transform_8(%arg0: i32, %arg1: i32) -> (i32, i32, i32, i32) {
    %c0_i32 = arith.constant 0 : i32
    %c0_i32_0 = arith.constant 0 : i32
    %c0_i32_1 = arith.constant 0 : i32
    return %arg0, %arg1, %c0_i32, %c0_i32_0 : i32, i32, i32, i32
  }
}

</mosaic_0001>

<bundles_post_ra>
// kernel: conv2d_block_forward.5
= control target key start
LH: loop header
LB: loop body
LE: loop exit
PB: predicated region body
PF: predicated region fallthrough
CT: control target
= control target key end

     0   :  { %vm284_vm0 = vcmask 64512   ;;  %s961_s0 = inlined_call_operand.vmem [shape: f32[512,128], index: 0, kind: input, shape index: {}]   ;;  %s962_s1 = inlined_call_operand.vmem [shape: f32[1,128], index: 1, kind: input, shape index: {}]   ;;  %s963_s2 = inlined_call_operand.vmem [shape: f32[1,128], index: 2, kind: input, shape index: {}]   ;;  %s964_s3 = inlined_call_operand.vmem [shape: f32[512,8], index: 3, kind: output, shape index: {}]  }
   0x1   :  { %v14_v0 = vld [vmem:[%s961_s0] sm:$0xff]  ;;  %v15_v4 = vld [vmem:[%s961_s0 + $0x8] sm:$0xff]  ;;  %v16_v5 = vld [vmem:[%s961_s0 + $0x10] sm:$0xff] }
   0x2   :  { %v381_v1 = vld [vmem:[%s962_s1] ss:$0 sm:$0xff]  ;;  %v17_v6 = vld [vmem:[%s961_s0 + $0x18] sm:$0xff]  ;;  %v19_v11 = vld [vmem:[%s961_s0 + $0x28] sm:$0xff] }
   0x3   :  { %v386_v2 = vld [vmem:[%s963_s2] ss:$0 sm:$0xff]  ;;  %v86_v3 = vmul.f32 %v381_v1, %v14_v0  ;;  %v87_v7 = vmul.f32 %v381_v1, %v15_v4  ;;  %v88_v8 = vmul.f32 %v381_v1, %v16_v5  ;;  %v89_v9 = vmul.f32 %v381_v1, %v17_v6  ;;  %v20_v12 = vld [vmem:[%s961_s0 + $0x30] sm:$0xff]  ;;  %v21_v17 = vld [vmem:[%s961_s0 + $0x38] sm:$0xff] }
   0x4   :  { %v18_v10 = vld [vmem:[%s961_s0 + $0x20] sm:$0xff]  ;;  %v91_v15 = vmul.f32 %v381_v1, %v19_v11  ;;  %v92_v16 = vmul.f32 %v381_v1, %v20_v12  ;;  %v93_v21 = vmul.f32 %v381_v1, %v21_v17  ;;  %v23_v27 = vld [vmem:[%s961_s0 + $0x48] sm:$0xff]  ;;  %v24_v28 = vld [vmem:[%s961_s0 + $0x50] sm:$0xff] }
   0x5   :  { %v156_v13 = vadd.f32 %v386_v2, %v86_v3  ;;  %v90_v14 = vmul.f32 %v381_v1, %v18_v10  ;;  %v157_v18 = vadd.f32 %v386_v2, %v87_v7  ;;  %v158_v19 = vadd.f32 %v386_v2, %v88_v8  ;;  %v22_v22 = vld [vmem:[%s961_s0 + $0x40] sm:$0xff]  ;;  %v25_v29 = vld [vmem:[%s961_s0 + $0x58] sm:$0xff]  ;;  %v27_v35 = vld [vmem:[%s961_s0 + $0x68] sm:$0xff] }
   0x6   :  { %v159_v20 = vadd.f32 %v386_v2, %v89_v9  ;;  %v161_v25 = vadd.f32 %v386_v2, %v91_v15  ;;  %v162_v26 = vadd.f32 %v386_v2, %v92_v16  ;;  %v163_v33 = vadd.f32 %v386_v2, %v93_v21  ;;  %v26_v34 = vld [vmem:[%s961_s0 + $0x60] sm:$0xff]  ;;  %v28_v36 = vld [vmem:[%s961_s0 + $0x70] sm:$0xff]  ;;  %v29_v41 = vld [vmem:[%s961_s0 + $0x78] sm:$0xff] }
   0x7   :  { %v220_v23 = vmax.f32 %v156_v13, 0.0  ;;  %v160_v24 = vadd.f32 %v386_v2, %v90_v14  ;;  %v221_v30 = vmax.f32 %v157_v18, 0.0  ;;  %v222_v31 = vmax.f32 %v158_v19, 0.0  ;;  %v30_v54 = vld [vmem:[%s961_s0 + $0x80] sm:$0xff]  ;;  %v31_v59 = vld [vmem:[%s961_s0 + $0x88] sm:$0xff]  ;;  %v32_v60 = vld [vmem:[%s961_s0 + $0x90] sm:$0xff] }
   0x8   :  { %v223_v32 = vmax.f32 %v159_v20, 0.0  ;;  %v225_v38 = vmax.f32 %v161_v25, 0.0  ;;  %v226_v39 = vmax.f32 %v162_v26, 0.0  ;;  %v94_v40 = vmul.f32 %v381_v1, %v22_v22  ;;  %v33_v61 = vld [vmem:[%s961_s0 + $0x98] sm:$0xff]  ;;  %v34_v4 = vld [vmem:[%s961_s0 + $0xa0] sm:$0xff]  ;;  %v35_v5 = vld [vmem:[%s961_s0 + $0xa8] sm:$0xff] }
   0x9   :  { %285 = vst.msk [vmem:[%s964_s3] sm:$0xff] %vm284_vm0, %v220_v23  ;;  %v224_v37 = vmax.f32 %v160_v24, 0.0  ;;  %286 = vst.msk [vmem:[%s964_s3 + $0x8] sm:$0xff] %vm284_vm0, %v221_v30  ;;  %v227_v42 = vmax.f32 %v163_v33, 0.0  ;;  %v95_v43 = vmul.f32 %v381_v1, %v23_v27  ;;  %v96_v44 = vmul.f32 %v381_v1, %v24_v28  ;;  %v36_v6 = vld [vmem:[%s961_s0 + $0xb0] sm:$0xff]  ;;  %v37_v11 = vld [vmem:[%s961_s0 + $0xb8] sm:$0xff] }
   0xa   :  { %287 = vst.msk [vmem:[%s964_s3 + $0x10] sm:$0xff] %vm284_vm0, %v222_v31  ;;  %288 = vst.msk [vmem:[%s964_s3 + $0x18] sm:$0xff] %vm284_vm0, %v223_v32  ;;  %v97_v45 = vmul.f32 %v381_v1, %v25_v29  ;;  %v164_v46 = vadd.f32 %v386_v2, %v94_v40  ;;  %v98_v47 = vmul.f32 %v381_v1, %v26_v34  ;;  %v38_v24 = vld [vmem:[%s961_s0 + $0xc0] sm:$0xff]  ;;  %v39_v29 = vld [vmem:[%s961_s0 + $0xc8] sm:$0xff] }
   0xb   :  { %289 = vst.msk [vmem:[%s964_s3 + $0x20] sm:$0xff] %vm284_vm0, %v224_v37  ;;  %290 = vst.msk [vmem:[%s964_s3 + $0x28] sm:$0xff] %vm284_vm0, %v225_v38  ;;  %v99_v48 = vmul.f32 %v381_v1, %v27_v35  ;;  %v100_v49 = vmul.f32 %v381_v1, %v28_v36  ;;  %v165_v50 = vadd.f32 %v386_v2, %v95_v43  ;;  %v40_v30 = vld [vmem:[%s961_s0 + $0xd0] sm:$0xff]  ;;  %v41_v31 = vld [vmem:[%s961_s0 + $0xd8] sm:$0xff] }
   0xc   :  { %291 = vst.msk [vmem:[%s964_s3 + $0x30] sm:$0xff] %vm284_vm0, %v226_v39  ;;  %292 = vst.msk [vmem:[%s964_s3 + $0x38] sm:$0xff] %vm284_vm0, %v227_v42  ;;  %v166_v51 = vadd.f32 %v386_v2, %v96_v44  ;;  %v167_v52 = vadd.f32 %v386_v2, %v97_v45  ;;  %v101_v53 = vmul.f32 %v381_v1, %v29_v41  ;;  %v228_v55 = vmax.f32 %v164_v46, 0.0  ;;  %v42_v36 = vld [vmem:[%s961_s0 + $0xe0] sm:$0xff]  ;;  %v43_v37 = vld [vmem:[%s961_s0 + $0xe8] sm:$0xff] }
   0xd   :  { %v168_v56 = vadd.f32 %v386_v2, %v98_v47  ;;  %v169_v57 = vadd.f32 %v386_v2, %v99_v48  ;;  %v170_v58 = vadd.f32 %v386_v2, %v100_v49  ;;  %v229_v62 = vmax.f32 %v165_v50, 0.0  ;;  %v44_v38 = vld [vmem:[%s961_s0 + $0xf0] sm:$0xff]  ;;  %v45_v43 = vld [vmem:[%s961_s0 + $0xf8] sm:$0xff] }
   0xe   :  { %v230_v63 = vmax.f32 %v166_v51, 0.0  ;;  %v231_v0 = vmax.f32 %v167_v52, 0.0  ;;  %v171_v3 = vadd.f32 %v386_v2, %v101_v53  ;;  %293 = vst.msk [vmem:[%s964_s3 + $0x40] sm:$0xff] %vm284_vm0, %v228_v55  ;;  %v102_v10 = vmul.f32 %v381_v1, %v30_v54 }
   0xf   :  { %v232_v7 = vmax.f32 %v168_v56, 0.0  ;;  %v233_v8 = vmax.f32 %v169_v57, 0.0  ;;  %v234_v9 = vmax.f32 %v170_v58, 0.0  ;;  %294 = vst.msk [vmem:[%s964_s3 + $0x48] sm:$0xff] %vm284_vm0, %v229_v62  ;;  %v103_v13 = vmul.f32 %v381_v1, %v31_v59  ;;  %v46_v56 = vld [vmem:[%s961_s0 + $0x100] sm:$0xff]  ;;  %v48_v62 = vld [vmem:[%s961_s0 + $0x110] sm:$0xff] }
  0x10   :  { %295 = vst.msk [vmem:[%s964_s3 + $0x50] sm:$0xff] %vm284_vm0, %v230_v63  ;;  %296 = vst.msk [vmem:[%s964_s3 + $0x58] sm:$0xff] %vm284_vm0, %v231_v0  ;;  %v235_v12 = vmax.f32 %v171_v3, 0.0  ;;  %v104_v14 = vmul.f32 %v381_v1, %v32_v60  ;;  %v105_v15 = vmul.f32 %v381_v1, %v33_v61  ;;  %v172_v16 = vadd.f32 %v386_v2, %v102_v10  ;;  %v47_v61 = vld [vmem:[%s961_s0 + $0x108] sm:$0xff]  ;;  %v49_v63 = vld [vmem:[%s961_s0 + $0x118] sm:$0xff] }
  0x11   :  { %297 = vst.msk [vmem:[%s964_s3 + $0x60] sm:$0xff] %vm284_vm0, %v232_v7  ;;  %298 = vst.msk [vmem:[%s964_s3 + $0x68] sm:$0xff] %vm284_vm0, %v233_v8  ;;  %v106_v17 = vmul.f32 %v381_v1, %v34_v4  ;;  %v107_v18 = vmul.f32 %v381_v1, %v35_v5  ;;  %v108_v19 = vmul.f32 %v381_v1, %v36_v6  ;;  %v50_v6 = vld [vmem:[%s961_s0 + $0x120] sm:$0xff]  ;;  %v51_v7 = vld [vmem:[%s961_s0 + $0x128] sm:$0xff] }
  0x12   :  { %299 = vst.msk [vmem:[%s964_s3 + $0x70] sm:$0xff] %vm284_vm0, %v234_v9  ;;  %300 = vst.msk [vmem:[%s964_s3 + $0x78] sm:$0xff] %vm284_vm0, %v235_v12  ;;  %v173_v20 = vadd.f32 %v386_v2, %v103_v13  ;;  %v174_v21 = vadd.f32 %v386_v2, %v104_v14  ;;  %v175_v22 = vadd.f32 %v386_v2, %v105_v15  ;;  %v236_v25 = vmax.f32 %v172_v16, 0.0  ;;  %v52_v8 = vld [vmem:[%s961_s0 + $0x130] sm:$0xff]  ;;  %v53_v13 = vld [vmem:[%s961_s0 + $0x138] sm:$0xff] }
  0x13   :  { %v109_v23 = vmul.f32 %v381_v1, %v37_v11  ;;  %v176_v26 = vadd.f32 %v386_v2, %v106_v17  ;;  %v177_v27 = vadd.f32 %v386_v2, %v107_v18  ;;  %v178_v28 = vadd.f32 %v386_v2, %v108_v19 }
  0x14   :  { %v237_v32 = vmax.f32 %v173_v20, 0.0  ;;  %v238_v33 = vmax.f32 %v174_v21, 0.0  ;;  %v239_v34 = vmax.f32 %v175_v22, 0.0  ;;  %301 = vst.msk [vmem:[%s964_s3 + $0x80] sm:$0xff] %vm284_vm0, %v236_v25  ;;  %v110_v42 = vmul.f32 %v381_v1, %v38_v24 }
  0x15   :  { %v179_v35 = vadd.f32 %v386_v2, %v109_v23  ;;  %v240_v39 = vmax.f32 %v176_v26, 0.0  ;;  %v241_v40 = vmax.f32 %v177_v27, 0.0  ;;  %v242_v41 = vmax.f32 %v178_v28, 0.0  ;;  %v54_v26 = vld [vmem:[%s961_s0 + $0x140] sm:$0xff] }
  0x16   :  { %302 = vst.msk [vmem:[%s964_s3 + $0x88] sm:$0xff] %vm284_vm0, %v237_v32  ;;  %303 = vst.msk [vmem:[%s964_s3 + $0x90] sm:$0xff] %vm284_vm0, %v238_v33  ;;  %v111_v45 = vmul.f32 %v381_v1, %v39_v29  ;;  %v112_v46 = vmul.f32 %v381_v1, %v40_v30  ;;  %v113_v47 = vmul.f32 %v381_v1, %v41_v31  ;;  %v55_v31 = vld [vmem:[%s961_s0 + $0x148] sm:$0xff]  ;;  %v56_v32 = vld [vmem:[%s961_s0 + $0x150] sm:$0xff] }
  0x17   :  { %304 = vst.msk [vmem:[%s964_s3 + $0x98] sm:$0xff] %vm284_vm0, %v239_v34  ;;  %v243_v44 = vmax.f32 %v179_v35, 0.0  ;;  %305 = vst.msk [vmem:[%s964_s3 + $0xa0] sm:$0xff] %vm284_vm0, %v240_v39  ;;  %v180_v48 = vadd.f32 %v386_v2, %v110_v42  ;;  %v114_v49 = vmul.f32 %v381_v1, %v42_v36  ;;  %v115_v50 = vmul.f32 %v381_v1, %v43_v37  ;;  %v57_v33 = vld [vmem:[%s961_s0 + $0x158] sm:$0xff]  ;;  %v59_v39 = vld [vmem:[%s961_s0 + $0x168] sm:$0xff] }
  0x18   :  { %306 = vst.msk [vmem:[%s964_s3 + $0xa8] sm:$0xff] %vm284_vm0, %v241_v40  ;;  %307 = vst.msk [vmem:[%s964_s3 + $0xb0] sm:$0xff] %vm284_vm0, %v242_v41  ;;  %v116_v51 = vmul.f32 %v381_v1, %v44_v38  ;;  %v181_v52 = vadd.f32 %v386_v2, %v111_v45  ;;  %v182_v53 = vadd.f32 %v386_v2, %v112_v46  ;;  %v58_v38 = vld [vmem:[%s961_s0 + $0x160] sm:$0xff]  ;;  %v60_v40 = vld [vmem:[%s961_s0 + $0x170] sm:$0xff] }
  0x19   :  { %308 = vst.msk [vmem:[%s964_s3 + $0xb8] sm:$0xff] %vm284_vm0, %v243_v44  ;;  %v183_v54 = vadd.f32 %v386_v2, %v113_v47  ;;  %v117_v55 = vmul.f32 %v381_v1, %v45_v43  ;;  %v244_v57 = vmax.f32 %v180_v48, 0.0  ;;  %v184_v58 = vadd.f32 %v386_v2, %v114_v49  ;;  %v61_v45 = vld [vmem:[%s961_s0 + $0x178] sm:$0xff] }
  0x1a   :  { %v185_v59 = vadd.f32 %v386_v2, %v115_v50  ;;  %v186_v60 = vadd.f32 %v386_v2, %v116_v51  ;;  %v245_v0 = vmax.f32 %v181_v52, 0.0  ;;  %v246_v3 = vmax.f32 %v182_v53, 0.0 }
  0x1b   :  { %v247_v4 = vmax.f32 %v183_v54, 0.0  ;;  %v187_v5 = vadd.f32 %v386_v2, %v117_v55  ;;  %309 = vst.msk [vmem:[%s964_s3 + $0xc0] sm:$0xff] %vm284_vm0, %v244_v57  ;;  %v248_v9 = vmax.f32 %v184_v58, 0.0  ;;  %v118_v12 = vmul.f32 %v381_v1, %v46_v56  ;;  %v62_v58 = vld [vmem:[%s961_s0 + $0x180] sm:$0xff] }
  0x1c   :  { %v249_v10 = vmax.f32 %v185_v59, 0.0  ;;  %v250_v11 = vmax.f32 %v186_v60, 0.0  ;;  %310 = vst.msk [vmem:[%s964_s3 + $0xc8] sm:$0xff] %vm284_vm0, %v245_v0  ;;  %311 = vst.msk [vmem:[%s964_s3 + $0xd0] sm:$0xff] %vm284_vm0, %v246_v3  ;;  %v119_v15 = vmul.f32 %v381_v1, %v47_v61  ;;  %v120_v16 = vmul.f32 %v381_v1, %v48_v62  ;;  %v64_v0 = vld [vmem:[%s961_s0 + $0x190] sm:$0xff]  ;;  %v65_v3 = vld [vmem:[%s961_s0 + $0x198] sm:$0xff] }
  0x1d   :  { %312 = vst.msk [vmem:[%s964_s3 + $0xd8] sm:$0xff] %vm284_vm0, %v247_v4  ;;  %v251_v14 = vmax.f32 %v187_v5, 0.0  ;;  %v121_v17 = vmul.f32 %v381_v1, %v49_v63  ;;  %313 = vst.msk [vmem:[%s964_s3 + $0xe0] sm:$0xff] %vm284_vm0, %v248_v9  ;;  %v188_v18 = vadd.f32 %v386_v2, %v118_v12  ;;  %v122_v19 = vmul.f32 %v381_v1, %v50_v6  ;;  %v63_v63 = vld [vmem:[%s961_s0 + $0x188] sm:$0xff] }
  0x1e   :  { %314 = vst.msk [vmem:[%s964_s3 + $0xe8] sm:$0xff] %vm284_vm0, %v249_v10  ;;  %315 = vst.msk [vmem:[%s964_s3 + $0xf0] sm:$0xff] %vm284_vm0, %v250_v11  ;;  %v123_v20 = vmul.f32 %v381_v1, %v51_v7  ;;  %v124_v21 = vmul.f32 %v381_v1, %v52_v8  ;;  %v189_v22 = vadd.f32 %v386_v2, %v119_v15  ;;  %v66_v8 = vld [vmem:[%s961_s0 + $0x1a0] sm:$0xff]  ;;  %v67_v9 = vld [vmem:[%s961_s0 + $0x1a8] sm:$0xff] }
  0x1f   :  { %316 = vst.msk [vmem:[%s964_s3 + $0xf8] sm:$0xff] %vm284_vm0, %v251_v14  ;;  %v190_v23 = vadd.f32 %v386_v2, %v120_v16  ;;  %v191_v24 = vadd.f32 %v386_v2, %v121_v17  ;;  %v125_v25 = vmul.f32 %v381_v1, %v53_v13  ;;  %v252_v27 = vmax.f32 %v188_v18, 0.0  ;;  %v68_v10 = vld [vmem:[%s961_s0 + $0x1b0] sm:$0xff]  ;;  %v69_v15 = vld [vmem:[%s961_s0 + $0x1b8] sm:$0xff] }
  0x20   :  { %v192_v28 = vadd.f32 %v386_v2, %v122_v19  ;;  %v193_v29 = vadd.f32 %v386_v2, %v123_v20  ;;  %v194_v30 = vadd.f32 %v386_v2, %v124_v21  ;;  %v253_v34 = vmax.f32 %v189_v22, 0.0 }
  0x21   :  { %v254_v35 = vmax.f32 %v190_v23, 0.0  ;;  %v255_v36 = vmax.f32 %v191_v24, 0.0  ;;  %v195_v37 = vadd.f32 %v386_v2, %v125_v25  ;;  %317 = vst.msk [vmem:[%s964_s3 + $0x100] sm:$0xff] %vm284_vm0, %v252_v27  ;;  %v126_v44 = vmul.f32 %v381_v1, %v54_v26 }
  0x22   :  { %v256_v41 = vmax.f32 %v192_v28, 0.0  ;;  %v257_v42 = vmax.f32 %v193_v29, 0.0  ;;  %v258_v43 = vmax.f32 %v194_v30, 0.0  ;;  %318 = vst.msk [vmem:[%s964_s3 + $0x108] sm:$0xff] %vm284_vm0, %v253_v34  ;;  %v127_v47 = vmul.f32 %v381_v1, %v55_v31  ;;  %v70_v28 = vld [vmem:[%s961_s0 + $0x1c0] sm:$0xff]  ;;  %v72_v34 = vld [vmem:[%s961_s0 + $0x1d0] sm:$0xff] }
  0x23   :  { %319 = vst.msk [vmem:[%s964_s3 + $0x110] sm:$0xff] %vm284_vm0, %v254_v35  ;;  %320 = vst.msk [vmem:[%s964_s3 + $0x118] sm:$0xff] %vm284_vm0, %v255_v36  ;;  %v259_v46 = vmax.f32 %v195_v37, 0.0  ;;  %v128_v48 = vmul.f32 %v381_v1, %v56_v32  ;;  %v129_v49 = vmul.f32 %v381_v1, %v57_v33  ;;  %v196_v50 = vadd.f32 %v386_v2, %v126_v44  ;;  %v71_v33 = vld [vmem:[%s961_s0 + $0x1c8] sm:$0xff]  ;;  %v73_v35 = vld [vmem:[%s961_s0 + $0x1d8] sm:$0xff] }
  0x24   :  { %321 = vst.msk [vmem:[%s964_s3 + $0x120] sm:$0xff] %vm284_vm0, %v256_v41  ;;  %322 = vst.msk [vmem:[%s964_s3 + $0x128] sm:$0xff] %vm284_vm0, %v257_v42  ;;  %v130_v51 = vmul.f32 %v381_v1, %v58_v38  ;;  %v131_v52 = vmul.f32 %v381_v1, %v59_v39  ;;  %v132_v53 = vmul.f32 %v381_v1, %v60_v40  ;;  %v74_v40 = vld [vmem:[%s961_s0 + $0x1e0] sm:$0xff]  ;;  %v75_v41 = vld [vmem:[%s961_s0 + $0x1e8] sm:$0xff] }
  0x25   :  { %323 = vst.msk [vmem:[%s964_s3 + $0x130] sm:$0xff] %vm284_vm0, %v258_v43  ;;  %324 = vst.msk [vmem:[%s964_s3 + $0x138] sm:$0xff] %vm284_vm0, %v259_v46  ;;  %v197_v54 = vadd.f32 %v386_v2, %v127_v47  ;;  %v198_v55 = vadd.f32 %v386_v2, %v128_v48  ;;  %v199_v56 = vadd.f32 %v386_v2, %v129_v49  ;;  %v260_v59 = vmax.f32 %v196_v50, 0.0  ;;  %v76_v42 = vld [vmem:[%s961_s0 + $0x1f0] sm:$0xff]  ;;  %v77_v47 = vld [vmem:[%s961_s0 + $0x1f8] sm:$0xff] }
  0x26   :  { %v133_v57 = vmul.f32 %v381_v1, %v61_v45  ;;  %v200_v60 = vadd.f32 %v386_v2, %v130_v51  ;;  %v201_v61 = vadd.f32 %v386_v2, %v131_v52  ;;  %v202_v62 = vadd.f32 %v386_v2, %v132_v53 }
  0x27   :  { %v261_v4 = vmax.f32 %v197_v54, 0.0  ;;  %v262_v5 = vmax.f32 %v198_v55, 0.0  ;;  %v263_v6 = vmax.f32 %v199_v56, 0.0  ;;  %325 = vst.msk [vmem:[%s964_s3 + $0x140] sm:$0xff] %vm284_vm0, %v260_v59  ;;  %v134_v14 = vmul.f32 %v381_v1, %v62_v58 }
  0x28   :  { %v203_v7 = vadd.f32 %v386_v2, %v133_v57  ;;  %v264_v11 = vmax.f32 %v200_v60, 0.0  ;;  %v265_v12 = vmax.f32 %v201_v61, 0.0  ;;  %v266_v13 = vmax.f32 %v202_v62, 0.0 }
  0x29   :  { %326 = vst.msk [vmem:[%s964_s3 + $0x148] sm:$0xff] %vm284_vm0, %v261_v4  ;;  %327 = vst.msk [vmem:[%s964_s3 + $0x150] sm:$0xff] %vm284_vm0, %v262_v5  ;;  %v135_v17 = vmul.f32 %v381_v1, %v63_v63  ;;  %v136_v18 = vmul.f32 %v381_v1, %v64_v0  ;;  %v137_v19 = vmul.f32 %v381_v1, %v65_v3 }
  0x2a   :  { %328 = vst.msk [vmem:[%s964_s3 + $0x158] sm:$0xff] %vm284_vm0, %v263_v6  ;;  %v267_v16 = vmax.f32 %v203_v7, 0.0  ;;  %329 = vst.msk [vmem:[%s964_s3 + $0x160] sm:$0xff] %vm284_vm0, %v264_v11  ;;  %v204_v20 = vadd.f32 %v386_v2, %v134_v14  ;;  %v138_v21 = vmul.f32 %v381_v1, %v66_v8  ;;  %v139_v22 = vmul.f32 %v381_v1, %v67_v9 }
  0x2b   :  { %330 = vst.msk [vmem:[%s964_s3 + $0x168] sm:$0xff] %vm284_vm0, %v265_v12  ;;  %331 = vst.msk [vmem:[%s964_s3 + $0x170] sm:$0xff] %vm284_vm0, %v266_v13  ;;  %v140_v23 = vmul.f32 %v381_v1, %v68_v10  ;;  %v205_v24 = vadd.f32 %v386_v2, %v135_v17  ;;  %v206_v25 = vadd.f32 %v386_v2, %v136_v18 }
  0x2c   :  { %332 = vst.msk [vmem:[%s964_s3 + $0x178] sm:$0xff] %vm284_vm0, %v267_v16  ;;  %v207_v26 = vadd.f32 %v386_v2, %v137_v19  ;;  %v141_v27 = vmul.f32 %v381_v1, %v69_v15  ;;  %v268_v29 = vmax.f32 %v204_v20, 0.0  ;;  %v208_v30 = vadd.f32 %v386_v2, %v138_v21 }
  0x2d   :  { %v209_v31 = vadd.f32 %v386_v2, %v139_v22  ;;  %v210_v32 = vadd.f32 %v386_v2, %v140_v23  ;;  %v269_v36 = vmax.f32 %v205_v24, 0.0  ;;  %v270_v37 = vmax.f32 %v206_v25, 0.0 }
  0x2e   :  { %v271_v38 = vmax.f32 %v207_v26, 0.0  ;;  %v211_v39 = vadd.f32 %v386_v2, %v141_v27  ;;  %333 = vst.msk [vmem:[%s964_s3 + $0x180] sm:$0xff] %vm284_vm0, %v268_v29  ;;  %v272_v43 = vmax.f32 %v208_v30, 0.0  ;;  %v142_v46 = vmul.f32 %v381_v1, %v70_v28 }
  0x2f   :  { %v273_v44 = vmax.f32 %v209_v31, 0.0  ;;  %v274_v45 = vmax.f32 %v210_v32, 0.0  ;;  %334 = vst.msk [vmem:[%s964_s3 + $0x188] sm:$0xff] %vm284_vm0, %v269_v36  ;;  %335 = vst.msk [vmem:[%s964_s3 + $0x190] sm:$0xff] %vm284_vm0, %v270_v37  ;;  %v143_v49 = vmul.f32 %v381_v1, %v71_v33  ;;  %v144_v50 = vmul.f32 %v381_v1, %v72_v34 }
  0x30   :  { %336 = vst.msk [vmem:[%s964_s3 + $0x198] sm:$0xff] %vm284_vm0, %v271_v38  ;;  %v275_v48 = vmax.f32 %v211_v39, 0.0  ;;  %v145_v51 = vmul.f32 %v381_v1, %v73_v35  ;;  %337 = vst.msk [vmem:[%s964_s3 + $0x1a0] sm:$0xff] %vm284_vm0, %v272_v43  ;;  %v212_v52 = vadd.f32 %v386_v2, %v142_v46  ;;  %v146_v53 = vmul.f32 %v381_v1, %v74_v40 }
  0x31   :  { %338 = vst.msk [vmem:[%s964_s3 + $0x1a8] sm:$0xff] %vm284_vm0, %v273_v44  ;;  %339 = vst.msk [vmem:[%s964_s3 + $0x1b0] sm:$0xff] %vm284_vm0, %v274_v45  ;;  %v147_v54 = vmul.f32 %v381_v1, %v75_v41  ;;  %v148_v55 = vmul.f32 %v381_v1, %v76_v42  ;;  %v213_v56 = vadd.f32 %v386_v2, %v143_v49 }
  0x32   :  { %340 = vst.msk [vmem:[%s964_s3 + $0x1b8] sm:$0xff] %vm284_vm0, %v275_v48  ;;  %v214_v57 = vadd.f32 %v386_v2, %v144_v50  ;;  %v215_v58 = vadd.f32 %v386_v2, %v145_v51  ;;  %v149_v59 = vmul.f32 %v381_v1, %v77_v47  ;;  %v276_v60 = vmax.f32 %v212_v52, 0.0 }
  0x33   :  { %v216_v61 = vadd.f32 %v386_v2, %v146_v53  ;;  %v217_v62 = vadd.f32 %v386_v2, %v147_v54  ;;  %v218_v63 = vadd.f32 %v386_v2, %v148_v55  ;;  %v277_v0 = vmax.f32 %v213_v56, 0.0 }
  0x34   :  { %v278_v3 = vmax.f32 %v214_v57, 0.0  ;;  %v279_v4 = vmax.f32 %v215_v58, 0.0  ;;  %v219_v5 = vadd.f32 %v386_v2, %v149_v59  ;;  %341 = vst.msk [vmem:[%s964_s3 + $0x1c0] sm:$0xff] %vm284_vm0, %v276_v60 }
  0x35   :  { %v280_v6 = vmax.f32 %v216_v61, 0.0  ;;  %v281_v7 = vmax.f32 %v217_v62, 0.0  ;;  %v282_v1 = vmax.f32 %v218_v63, 0.0  ;;  %342 = vst.msk [vmem:[%s964_s3 + $0x1c8] sm:$0xff] %vm284_vm0, %v277_v0 }
  0x36   :  { %343 = vst.msk [vmem:[%s964_s3 + $0x1d0] sm:$0xff] %vm284_vm0, %v278_v3  ;;  %344 = vst.msk [vmem:[%s964_s3 + $0x1d8] sm:$0xff] %vm284_vm0, %v279_v4  ;;  %v283_v2 = vmax.f32 %v219_v5, 0.0 }
  0x37   :  { %345 = vst.msk [vmem:[%s964_s3 + $0x1e0] sm:$0xff] %vm284_vm0, %v280_v6  ;;  %346 = vst.msk [vmem:[%s964_s3 + $0x1e8] sm:$0xff] %vm284_vm0, %v281_v7 }
  0x38   :  { %347 = vst.msk [vmem:[%s964_s3 + $0x1f0] sm:$0xff] %vm284_vm0, %v282_v1  ;;  %348 = vst.msk [vmem:[%s964_s3 + $0x1f8] sm:$0xff] %vm284_vm0, %v283_v2 }

// kernel: conv2d_block_forward.4
= control target key start
LH: loop header
LB: loop body
LE: loop exit
PB: predicated region body
PF: predicated region fallthrough
CT: control target
= control target key end

     0   :  { %s4073_s27 = smov 0   ;;  %s4075_s28 = smov 0   ;;  %s5042_s0 = inlined_call_operand.vmem [shape: f32[2,16,16,128], index: 0, kind: input, shape index: {}, may-alias: {0,1,2}]   ;;  %s5043_s1 = inlined_call_operand.vmem [shape: f32[2,16,16,128], index: 1, kind: input, shape index: {}, may-alias: {0,1,2}]   ;;  %s5044_s2 = inlined_call_operand.vmem [shape: f32[2,16,16,128], index: 2, kind: input, shape index: {}, may-alias: {0,1,2}]   ;;  %s5045_s3 = inlined_call_operand.vmem [shape: f32[1152,128], index: 3, kind: input, shape index: {}]   ;;  %s5046_s4 = inlined_call_operand.vmem [shape: f32[1,128], index: 4, kind: input, shape index: {}]   ;;  %s5047_s5 = inlined_call_operand.vmem [shape: f32[1,128], index: 5, kind: input, shape index: {}]   ;;  %s5048_s6 = inlined_call_operand.vmem [shape: f32[2,16,16,128], index: 6, kind: output, shape index: {0}]   ;;  %s5049_s7 = inlined_call_operand.vmem [shape: f32[2,2,1,128], index: 7, kind: output, shape index: {1}]   ;;  %s5050_s8 = inlined_call_operand.vmem [shape: f32[2,2,1,128], index: 8, kind: output, shape index: {2}]  }
   0x1   :  { %5052 = sst [smem:[#allocation3_spill]] %s5042_s0  ;;  %s4077_s29 = smov 0  }
   0x2   :  { %s4079_s30 = smov 0   ;;  %s4081_s9 = smov 0  }
   0x3 LB: > { %s28_s10 = sadd.s32 1, %s4017_s29  ;;  %s31_s11 = sadd.s32 1, %s4021_s30  ;;  %s4025_s9 = sphi %s4081_s9, %s19_s9   ;;  %s4021_s30 = sphi %s4079_s30, %s5063_s30   ;;  %s4017_s29 = sphi %s4077_s29, %s5062_s29   ;;  %s4013_s28 = sphi %s4075_s28, %s5061_s28   ;;  %s4009_s27 = sphi %s4073_s27, %s5060_s27  }
   0x4   : > { %p29_p0 = scmp.ge.s32.totalorder %s28_s10, 2  ;;  %p2674_p1 = scmp.ge.s32.totalorder %s4025_s9, 1 }
   0x5   : > { %p357_p2 = scmp.lt.s32.totalorder %s4025_s9, 5 }
   0x6   : > { %s5065_s10 = smov (%p29_p0, %s28_s10), 0  ;;  %s5067_s11 = smov (!%p29_p0, %s31_s11), %s4021_s30 }
   0x7   : > { %p358_p3 = pnand %p2674_p1, %p357_p2  ;;  %p33_p4 = scmp.ge.s32.totalorder %s5067_s11, 2 }
   0x8   : > { %v707_v0 = vld [vmem:[%s5045_s3 + $0x80] sm:$0xff] (!%p358_p3)  ;;  %v708_v1 = vld [vmem:[%s5045_s3 + $0x88] sm:$0xff] (!%p358_p3)  ;;  %s4117_s18 = sshll.u32 (!%p358_p3), %s4009_s27, 3  ;;  %p442_p5 = scmp.lt.s32.totalorder (!%p358_p3), %s4013_s28, 1  ;;  %v709_v5 = vld [vmem:[%s5045_s3 + $0x90] sm:$0xff] (!%p358_p3)  ;;  %v4027_v7 = vmov (!%p358_p3), 0.0  }
   0x9   : > { %s5069_s11 = smov (%p33_p4, %s5067_s11), 0  ;;  %361 = sbr.rel (%p358_p3) target bundleno = 436 (0x1b4), region = 44 }
   0xa   : > { %v1415_v2 = vld [vmem:[%s5045_s3 + $0x200] sm:$0xff] (!%p358_p3)  ;;  %v3506_v3 = vpack.c.bf16 (!%p358_p3), %v708_v1, %v707_v0  ;;  %v1416_v4 = vld [vmem:[%s5045_s3 + $0x208] sm:$0xff] (!%p358_p3)  ;;  %v710_v6 = vld [vmem:[%s5045_s3 + $0x98] sm:$0xff] (!%p358_p3)  ;;  %p444_p6 = scmp.lt.s32.totalorder (!%p358_p3), %s4117_s18, 15  ;;  %s4131_s25 = sadd.s32 (!%p358_p3), 4294967295, %s4117_s18 }
   0xb   : > { %617 = vst [vmem:[#allocation2] sm:$0x1] (!%p358_p3), %v4027_v7  ;;  %618 = vst [vmem:[#allocation2 + $0x18] sm:$0x1] (!%p358_p3), %v4027_v7  ;;  %v3634_v8 = vpack.c.bf16 (!%p358_p3), %v1416_v4, %v1415_v2  ;;  %v3510_v9 = vpack.c.bf16 (!%p358_p3), %v710_v6, %v709_v5  ;;  %v1417_v10 = vld [vmem:[%s5045_s3 + $0x210] sm:$0xff] (!%p358_p3)  ;;  %v1418_v11 = vld [vmem:[%s5045_s3 + $0x218] sm:$0xff] (!%p358_p3) }
   0xc   : > { %619 = vst [vmem:[#allocation2 + $0x30] sm:$0x1] (!%p358_p3), %v4027_v7  ;;  %620 = vst [vmem:[#allocation2 + $0x48] sm:$0x1] (!%p358_p3), %v4027_v7  ;;  %v711_v12 = vld [vmem:[%s5045_s3 + $0xa0] sm:$0xff] (!%p358_p3)  ;;  %3507 = vmatprep.subr.bf16.mxu1 (!%p358_p3), %v3506_v3  ;;  %v3638_v13 = vpack.c.bf16 (!%p358_p3), %v1418_v11, %v1417_v10  ;;  %v712_v14 = vld [vmem:[%s5045_s3 + $0xa8] sm:$0xff] (!%p358_p3) }
   0xd   : > { %621 = vst [vmem:[#allocation2 + $0x60] sm:$0x1] (!%p358_p3), %v4027_v7  ;;  %622 = vst [vmem:[#allocation2 + $0x78] sm:$0x1] (!%p358_p3), %v4027_v7  ;;  %v1419_v15 = vld [vmem:[%s5045_s3 + $0x220] sm:$0xff] (!%p358_p3)  ;;  %v1420_v16 = vld [vmem:[%s5045_s3 + $0x228] sm:$0xff] (!%p358_p3)  ;;  %3635 = vmatprep.subr.bf16.mxu0 (!%p358_p3), %v3634_v8  ;;  %3509 = vmatpush3.bf16.msra.mxu1 (!%p358_p3), %v3506_v3  ;;  %v3514_v17 = vpack.c.bf16 (!%p358_p3), %v712_v14, %v711_v12 }
   0xe   : > { %623 = vst [vmem:[#allocation2 + $0x90] sm:$0x1] (!%p358_p3), %v4027_v7  ;;  %624 = vst [vmem:[#allocation2 + $0xa8] sm:$0x1] (!%p358_p3), %v4027_v7  ;;  %3637 = vmatpush3.bf16.msra.mxu0 (!%p358_p3), %v3634_v8  ;;  %3511 = vmatprep.subr.bf16.mxu1 (!%p358_p3), %v3510_v9  ;;  %p454_p7 = scmp.gt.s32.totalorder (!%p358_p3), %s4131_s25, 0  ;;  %v3642_v18 = vpack.c.bf16 (!%p358_p3), %v1420_v16, %v1419_v15  ;;  %v713_v19 = vld [vmem:[%s5045_s3 + $0xb0] sm:$0xff] (!%p358_p3) }
   0xf   : > { %625 = vst [vmem:[#allocation2 + $0xc0] sm:$0x1] (!%p358_p3), %v4027_v7  ;;  %626 = vst [vmem:[#allocation2 + $0xd8] sm:$0x1] (!%p358_p3), %v4027_v7  ;;  %3639 = vmatprep.subr.bf16.mxu0 (!%p358_p3), %v3638_v13  ;;  %v714_v20 = vld [vmem:[%s5045_s3 + $0xb8] sm:$0xff] (!%p358_p3)  ;;  %v1421_v21 = vld [vmem:[%s5045_s3 + $0x230] sm:$0xff] (!%p358_p3) }
  0x10   : > { %627 = vst [vmem:[#allocation2 + $0x11] sm:$0x1] %v4027_v7  ;;  %628 = vst [vmem:[#allocation2 + $0x29] sm:$0x1] %v4027_v7  ;;  %s5071_s28 = smov (!%p442_p5, %s4013_s28), 1  ;;  %v1422_v22 = vld [vmem:[%s5045_s3 + $0x238] sm:$0xff]  ;;  %v3518_v23 = vpack.c.bf16 %v714_v20, %v713_v19 }
  0x11   : > { %629 = vst [vmem:[#allocation2 + $0x41] sm:$0x1] %v4027_v7  ;;  %630 = vst [vmem:[#allocation2 + $0x59] sm:$0x1] %v4027_v7  ;;  %s445_s24 = scalar_select %p444_p6, %s4117_s18, 15  ;;  %3513 = vmatpush3.bf16.msra.mxu1 %v3510_v9  ;;  %v715_v24 = vld [vmem:[%s5045_s3 + $0xc0] sm:$0xff]  ;;  %v3646_v25 = vpack.c.bf16 %v1422_v22, %v1421_v21 }
  0x12   : > { %631 = vst [vmem:[#allocation2 + $0x71] sm:$0x1] %v4027_v7  ;;  %632 = vst [vmem:[#allocation2 + $0x89] sm:$0x1] %v4027_v7  ;;  %s4160_s26 = sshll.u32 %s5071_s28, 5  ;;  %p2681_p8 = scmp.lt.s32.totalorder %s4131_s25, 15  ;;  %3641 = vmatpush3.bf16.msra.mxu0 %v3638_v13  ;;  %3515 = vmatprep.subr.bf16.mxu1 %v3514_v17 }
  0x13   : > { %633 = vst [vmem:[#allocation2 + $0xa1] sm:$0x1] %v4027_v7  ;;  %634 = vst [vmem:[#allocation2 + $0xb9] sm:$0x1] %v4027_v7  ;;  %s2676_s12 = sshll.u32 %s445_s24, 1  ;;  %s5053_s0 = sld [smem:[#allocation3_spill]]  ;;  %3643 = vmatprep.subr.bf16.mxu0 %v3642_v18 }
  0x14   : > { %635 = vst [vmem:[#allocation2 + $0xd1] sm:$0x1] %v4027_v7  ;;  %636 = vst [vmem:[#allocation2 + $0xe9] sm:$0x1] %v4027_v7  ;;  %s4170_s17 = sadd.s32 %s4160_s26, %s2676_s12  ;;  %p605_p9 = scmp.eq.s32.totalorder %s4009_s27, 0  ;;  %v716_v26 = vld [vmem:[%s5045_s3 + $0xc8] sm:$0xff] }
  0x15   : > { %s5051_s23 = sshll.u32 %s4170_s17, 3  ;;  %v1423_v27 = vld [vmem:[%s5045_s3 + $0x240] sm:$0xff]  ;;  %v1424_v29 = vld [vmem:[%s5045_s3 + $0x248] sm:$0xff]  ;;  %3517 = vmatpush3.bf16.msra.mxu1 %v3514_v17  ;;  %v717_v32 = vld [vmem:[%s5045_s3 + $0xd0] sm:$0xff]  ;;  %v3522_v36 = vpack.c.bf16 %v716_v26, %v715_v24  ;;  %p611_p11 = scmp.eq.s32.totalorder %s4009_s27, 1 }
  0x16   : > { %s455_s16 = scalar_select %p454_p7, %s4131_s25, 0  ;;  %v4203_v28 = vld [vmem:[%s5046_s4] ss:$0 sm:$0xff]  ;;  %v718_v33 = vld [vmem:[%s5045_s3 + $0xd8] sm:$0xff]  ;;  %3645 = vmatpush3.bf16.msra.mxu0 %v3642_v18  ;;  %3519 = vmatprep.subr.bf16.mxu1 %v3518_v23  ;;  %v1425_v37 = vld [vmem:[%s5045_s3 + $0x250] sm:$0xff]  ;;  %v3650_v41 = vpack.c.bf16 %v1424_v29, %v1423_v27 }
  0x17   : > { %v4213_v30 = vld [vmem:[%s5047_s5] ss:$0 sm:$0xff]  ;;  %s4224_s25 = scalar_select %p605_p9, 1, 0  ;;  %v1426_v38 = vld [vmem:[%s5045_s3 + $0x258] sm:$0xff]  ;;  %3647 = vmatprep.subr.bf16.mxu0 %v3646_v25  ;;  %v4240_v45 = vpack.c.bf16 %v718_v33, %v717_v32  ;;  %v720_v55 = vld [vmem:[%s5045_s3 + $0xe8] sm:$0xff] }
  0x18   : > { %s5073_s16 = smov (!%p2681_p8, %s455_s16), 15  ;;  %v4245_v49 = vpack.c.bf16 %v1426_v38, %v1425_v37  ;;  %v719_v50 = vld [vmem:[%s5045_s3 + $0xe0] sm:$0xff]  ;;  %v1428_v4 = vld [vmem:[%s5045_s3 + $0x268] sm:$0xff]  ;;  %v721_v20 = vld [vmem:[%s5045_s3 + $0xf0] sm:$0xff]  ;;  %s5059_s13 = sshll.u32 %s4170_s17, 3 }
  0x19   : > { %s4185_s12 = scalar_lea.vmem %s5053_s0, %s5051_s23  ;;  %s2686_s14 = sshll.u32 %s5073_s16, 1  ;;  %3521 = vmatpush3.bf16.msra.mxu1 %v3518_v23  ;;  %v607_v57 = vstv %s4224_s25  ;;  %v1427_v3 = vld [vmem:[%s5045_s3 + $0x260] sm:$0xff]  ;;  %v3530_v9 = vpack.c.bf16 %v720_v55, %v719_v50  ;;  %v722_v21 = vld [vmem:[%s5045_s3 + $0xf8] sm:$0xff]  ;;  %v1429_v26 = vld [vmem:[%s5045_s3 + $0x270] sm:$0xff] }
  0x1a   : > { %v513_v31 = vld [vmem:[%s4185_s12] sm:$0xff]  ;;  %v514_v35 = vld [vmem:[%s4185_s12 + $0x8] sm:$0xff]  ;;  %v515_v40 = vld [vmem:[%s4185_s12 + $0x10] sm:$0xff]  ;;  %s462_s15 = sadd.s32 %s2686_s14, %s4160_s26  ;;  %3649 = vmatpush3.bf16.msra.mxu0 %v3646_v25  ;;  %3523 = vmatprep.subr.bf16.mxu1 %v3522_v36  ;;  %vm4295_vm0 = vcmp.eq.s32.totalorder %v607_v57, 1  ;;  %v3658_v19 = vpack.c.bf16 %v1428_v4, %v1427_v3  ;;  %p499_p12 = scmp.lt.s32.totalorder %s4009_s27, 1 }
  0x1b   : > { %v535_v34 = vmul.f32 %v4203_v28, %v513_v31  ;;  %v536_v39 = vmul.f32 %v4203_v28, %v514_v35  ;;  %v537_v43 = vmul.f32 %v4203_v28, %v515_v40  ;;  %v516_v44 = vld [vmem:[%s4185_s12 + $0x18] sm:$0xff]  ;;  %s2688_s19 = sshll.u32 %s462_s15, 3  ;;  %v517_v48 = vld [vmem:[%s4185_s12 + $0x20] sm:$0xff]  ;;  %v518_v54 = vld [vmem:[%s4185_s12 + $0x28] sm:$0xff]  ;;  %3651 = vmatprep.subr.bf16.mxu0 %v3650_v41  ;;  %s2713_s15 = sadd.s32 8, %s4117_s18 }
  0x1c   : > { %v538_v47 = vmul.f32 %v4203_v28, %v516_v44  ;;  %s464_s0 = scalar_lea.vmem %s5043_s1, %s2688_s19  ;;  %v539_v53 = vmul.f32 %v4203_v28, %v517_v48  ;;  %v540_v61 = vmul.f32 %v4203_v28, %v518_v54  ;;  %v519_v2 = vld [vmem:[%s4185_s12 + $0x30] sm:$0xff]  ;;  %v520_v8 = vld [vmem:[%s4185_s12 + $0x38] sm:$0xff]  ;;  %v521_v13 = vld [vmem:[%s4185_s12 + $0x40] sm:$0xff]  ;;  %p4430_p10 = scmp.lt.s32.totalorder %s2713_s15, 15 }
  0x1d   : > { %v557_v42 = vadd.f32 %v4213_v30, %v535_v34  ;;  %v558_v46 = vadd.f32 %v4213_v30, %v536_v39  ;;  %v559_v52 = vadd.f32 %v4213_v30, %v537_v43  ;;  %v589_v56 = vld [vmem:[%s464_s0] sm:$0xff]  ;;  %v590_v58 = vld [vmem:[%s464_s0 + $0x8] sm:$0xff]  ;;  %v541_v7 = vmul.f32 %v4203_v28, %v519_v2  ;;  %3525 = vmatpush3.bf16.msra.mxu1 %v3522_v36  ;;  %v523_v25 = vld [vmem:[%s4185_s12 + $0x50] sm:$0xff]  ;;  %s4525_s14 = scalar_select %p611_p11, 1, 0 }
  0x1e   : > { %v560_v60 = vadd.f32 %v4213_v30, %v538_v47  ;;  %v591_v62 = vmul.f32 %v4203_v28, %v589_v56  ;;  %v592_v63 = vmul.f32 %v4203_v28, %v590_v58  ;;  %v561_v1 = vadd.f32 %v4213_v30, %v539_v53  ;;  %3653 = vmatpush3.bf16.msra.mxu0 %v3650_v41  ;;  %v522_v18 = vld [vmem:[%s4185_s12 + $0x48] sm:$0xff]  ;;  %v1430_v27 = vld [vmem:[%s5045_s3 + $0x278] sm:$0xff]  ;;  %v525_v38 = vld [vmem:[%s4185_s12 + $0x60] sm:$0xff]  ;;  %s5075_s15 = smov (!%p4430_p10, %s2713_s15), 15  ;;  %s4984_s19 = scalar_lea.vmem %s5048_s6, %s5059_s13 }
  0x1f   : > { %v4253_v51 = vmax.f32 %v557_v42, 0.0  ;;  %v4262_v59 = vmax.f32 %v558_v46, 0.0  ;;  %v4270_v0 = vmax.f32 %v559_v52, 0.0  ;;  %v562_v6 = vadd.f32 %v4213_v30, %v540_v61  ;;  %3527 = vmatprep.subr.bf16.mxu1 %v4240_v45  ;;  %3655 = vmatprep.subr.bf16.mxu0 %v4245_v49  ;;  %v524_v33 = vld [vmem:[%s4185_s12 + $0x58] sm:$0xff]  ;;  %v526_v43 = vld [vmem:[%s4185_s12 + $0x68] sm:$0xff]  ;;  %vm3979_vm1 = vmneg %vm4295_vm0  ;;  %s5077_s15 = smov (!%p4430_p10, %s5075_s15), 15 }
  0x20   : > { %v4281_v5 = vmax.f32 %v560_v60, 0.0  ;;  %v593_v10 = vadd.f32 %v4213_v30, %v591_v62  ;;  %v4288_v11 = vadd.f32 %v4213_v30, %v592_v63  ;;  %v4291_v12 = vmax.f32 %v561_v1, 0.0  ;;  %v676_v46 = vld [vmem:[%s5045_s3 + $0x8] sm:$0xff]  ;;  %v527_v50 = vld [vmem:[%s4185_s12 + $0x70] sm:$0xff]  ;;  %v1608_v52 = vld [vmem:[%s5045_s3 + $0x280] sm:$0xff]  ;;  %s2693_s0 = sshll.u32 %s5077_s15, 1 }
  0x21   : > { %643 = vst [vmem:[#allocation2 + $0x19] sm:$0xff] %v4253_v51  ;;  %3258 = vmatprep.mubr.f32.mxu0 %v4253_v51  ;;  %644 = vst [vmem:[#allocation2 + $0x21] sm:$0xff] %v4262_v59  ;;  %v4300_v15 = vmax.f32 %v562_v6, 0.0  ;;  %v563_v16 = vadd.f32 %v4213_v30, %v541_v7  ;;  %v542_v17 = vmul.f32 %v4203_v28, %v520_v8  ;;  %3529 = vmatpush3.bf16.msra.mxu1 %v4240_v45  ;;  %v675_v45 = vld [vmem:[%s5045_s3] sm:$0xff]  ;;  %v1609_v53 = vld [vmem:[%s5045_s3 + $0x288] sm:$0xff]  ;;  %s479_s15 = sadd.s32 %s2693_s0, %s4160_s26  ;;  %s5079_s27 = smov (!%p499_p12, %s4009_s27), 1 }
  0x22   : > { %645 = vst [vmem:[#allocation2 + $0x31] sm:$0xff] %v4270_v0  ;;  %646 = vst [vmem:[#allocation2 + $0x39] sm:$0xff] %v4281_v5  ;;  %v595_v22 = vmax.f32 %v593_v10, 0.0  ;;  %v596_v23 = vmax.f32 %v4288_v11, 0.0  ;;  %v543_v24 = vmul.f32 %v4203_v28, %v521_v13  ;;  %v544_v32 = vmul.f32 %v4203_v28, %v522_v18  ;;  %3657 = vmatpush3.bf16.msra.mxu0 %v4245_v49  ;;  %v528_v57 = vld [vmem:[%s4185_s12 + $0x78] sm:$0xff]  ;;  %v677_v7 = vld [vmem:[%s5045_s3 + $0x10] sm:$0xff] }
  0x23   : > { %647 = vst [vmem:[#allocation2 + $0x49] sm:$0xff] %v4291_v12  ;;  %648 = vst [vmem:[#allocation2 + $0x51] sm:$0xff] %v4300_v15  ;;  %v4323_v29 = vmax.f32 %v563_v16, 0.0  ;;  %v564_v31 = vadd.f32 %v4213_v30, %v542_v17  ;;  %v545_v37 = vmul.f32 %v4203_v28, %v523_v25  ;;  %3531 = vmatprep.subr.bf16.mxu1 %v3530_v9  ;;  %3659 = vmatprep.subr.bf16.mxu0 %v3658_v19  ;;  %v678_v8 = vld [vmem:[%s5045_s3 + $0x18] sm:$0xff]  ;;  %v1610_v13 = vld [vmem:[%s5045_s3 + $0x290] sm:$0xff]  ;;  %s2695_s26 = sshll.u32 %s479_s15, 3 }
  0x24   : > { %v609_v34 = vsel %vm4295_vm0, 0.0, %v595_v22  ;;  %v610_v35 = vsel %vm4295_vm0, 0.0, %v596_v23  ;;  %v565_v36 = vadd.f32 %v4213_v30, %v543_v24  ;;  %v3534_v39 = vpack.c.bf16 %v722_v21, %v721_v20  ;;  %3980 = vmatprep.mubr.msk.f32.mxu1 %vm3979_vm1, %v595_v22  ;;  %v1611_v16 = vld [vmem:[%s5045_s3 + $0x298] sm:$0xff]  ;;  %v679_v21 = vld [vmem:[%s5045_s3 + $0x20] sm:$0xff]  ;;  %v680_v22 = vld [vmem:[%s5045_s3 + $0x28] sm:$0xff]  ;;  %s481_s16 = scalar_lea.vmem %s5044_s2, %s2695_s26  ;;  %s2700_s17 = sshll.u32 %s5071_s28, 1 }
  0x25   : > { %637 = vst [vmem:[#allocation2 + $0x1] sm:$0xff] %v609_v34  ;;  %638 = vst [vmem:[#allocation2 + $0x9] sm:$0xff] %v610_v35  ;;  %v4340_v40 = vmax.f32 %v564_v31, 0.0  ;;  %v566_v41 = vadd.f32 %v4213_v30, %v544_v32  ;;  %v546_v42 = vmul.f32 %v4203_v28, %v524_v33  ;;  %v3662_v44 = vpack.c.bf16 %v1430_v27, %v1429_v26  ;;  %v1612_v11 = vld [vmem:[%s5045_s3 + $0x2a0] sm:$0xff]  ;;  %v1613_v14 = vld [vmem:[%s5045_s3 + $0x2a8] sm:$0xff] }
  0x26   : > { %649 = vst [vmem:[#allocation2 + $0x61] sm:$0xff] %v4323_v29  ;;  %v4356_v47 = vmax.f32 %v565_v36, 0.0  ;;  %v567_v48 = vadd.f32 %v4213_v30, %v545_v37  ;;  %v547_v49 = vmul.f32 %v4203_v28, %v525_v38  ;;  %v548_v56 = vmul.f32 %v4203_v28, %v526_v43  ;;  %3533 = vmatpush3.bf16.msra.mxu1 %v3530_v9  ;;  %v681_v25 = vld [vmem:[%s5045_s3 + $0x30] sm:$0xff]  ;;  %v682_v26 = vld [vmem:[%s5045_s3 + $0x38] sm:$0xff]  ;;  %v683_v32 = vld [vmem:[%s5045_s3 + $0x40] sm:$0xff] }
  0x27   : > { %650 = vst [vmem:[#allocation2 + $0x69] sm:$0xff] %v4340_v40  ;;  %v4368_v54 = vmax.f32 %v566_v41, 0.0  ;;  %v568_v55 = vadd.f32 %v4213_v30, %v546_v42  ;;  %v549_v61 = vmul.f32 %v4203_v28, %v527_v50  ;;  %3661 = vmatpush3.bf16.msra.mxu0 %v3658_v19  ;;  %3535 = vmatprep.subr.bf16.mxu1 %v3534_v39  ;;  %v684_v33 = vld [vmem:[%s5045_s3 + $0x48] sm:$0xff]  ;;  %v685_v36 = vld [vmem:[%s5045_s3 + $0x50] sm:$0xff]  ;;  %v686_v37 = vld [vmem:[%s5045_s3 + $0x58] sm:$0xff] }
  0x28   : > { %651 = vst [vmem:[#allocation2 + $0x79] sm:$0xff] %v4356_v47  ;;  %v4374_v58 = vmax.f32 %v567_v48, 0.0  ;;  %v569_v60 = vadd.f32 %v4213_v30, %v547_v49  ;;  %v3538_v62 = vpack.c.bf16 %v676_v46, %v675_v45  ;;  %v570_v1 = vadd.f32 %v4213_v30, %v548_v56  ;;  %3663 = vmatprep.subr.bf16.mxu0 %v3662_v44  ;;  %v1618_v38 = vld [vmem:[%s5045_s3 + $0x2d0] sm:$0xff]  ;;  %v687_v43 = vld [vmem:[%s5045_s3 + $0x60] sm:$0xff]  ;;  %v1621_v46 = vld [vmem:[%s5045_s3 + $0x2e8] sm:$0xff] }
  0x29   : > { %652 = vst [vmem:[#allocation2 + $0x81] sm:$0xff] %v4368_v54  ;;  %v4379_v63 = vmax.f32 %v568_v55, 0.0  ;;  %v550_v2 = vmul.f32 %v4203_v28, %v528_v57  ;;  %v3666_v3 = vpack.c.bf16 %v1609_v53, %v1608_v52  ;;  %v571_v6 = vadd.f32 %v4213_v30, %v549_v61  ;;  %v1620_v45 = vld [vmem:[%s5045_s3 + $0x2e0] sm:$0xff]  ;;  %v689_v50 = vld [vmem:[%s5045_s3 + $0x70] sm:$0xff]  ;;  %v690_v52 = vld [vmem:[%s5045_s3 + $0x78] sm:$0xff] }
  0x2a   : > { %653 = vst [vmem:[#allocation2 + $0x91] sm:$0xff] %v4374_v58  ;;  %v4384_v4 = vmax.f32 %v569_v60, 0.0  ;;  %v4394_v9 = vmax.f32 %v570_v1, 0.0  ;;  %3537 = vmatpush3.bf16.msra.mxu1 %v3534_v39  ;;  %v3542_v19 = vpack.c.bf16 %v678_v8, %v677_v7  ;;  %v3670_v20 = vpack.c.bf16 %v1611_v16, %v1610_v13  ;;  %v1619_v39 = vld [vmem:[%s5045_s3 + $0x2d8] sm:$0xff]  ;;  %v1622_v53 = vld [vmem:[%s5045_s3 + $0x2f0] sm:$0xff]  ;;  %v1029_v60 = vld [vmem:[%s5045_s3 + $0x100] sm:$0xff] }
  0x2b   : > { %654 = vst [vmem:[#allocation2 + $0x99] sm:$0xff] %v4379_v63  ;;  %v572_v10 = vadd.f32 %v4213_v30, %v550_v2  ;;  %v4404_v17 = vmax.f32 %v571_v6, 0.0  ;;  %3665 = vmatpush3.bf16.msra.mxu0 %v3662_v44  ;;  %3539 = vmatprep.subr.bf16.mxu1 %v3538_v62  ;;  %v3674_v24 = vpack.c.bf16 %v1613_v14, %v1612_v11  ;;  %v688_v44 = vld [vmem:[%s5045_s3 + $0x68] sm:$0xff]  ;;  %v1623_v55 = vld [vmem:[%s5045_s3 + $0x2f8] sm:$0xff]  ;;  %v597_v2 = vld [vmem:[%s481_s16] sm:$0xff]  ;;  %v613_v6 = vstv %s4525_s14 }
  0x2c   : > { %655 = vst [vmem:[#allocation2 + $0xa9] sm:$0xff] %v4384_v4  ;;  %656 = vst [vmem:[#allocation2 + $0xb1] sm:$0xff] %v4394_v9  ;;  %3667 = vmatprep.subr.bf16.mxu0 %v3666_v3  ;;  %v3550_v27 = vpack.c.bf16 %v682_v26, %v681_v25  ;;  %v3554_v34 = vpack.c.bf16 %v684_v33, %v683_v32  ;;  %v3558_v41 = vpack.c.bf16 %v686_v37, %v685_v36  ;;  %v1030_v61 = vld [vmem:[%s5045_s3 + $0x108] sm:$0xff]  ;;  %v659_v8 = vld [vmem:[#allocation2] sm:$0xff] }
  0x2d   : > { %v4407_v18 = vmax.f32 %v572_v10, 0.0  ;;  %657 = vst [vmem:[#allocation2 + $0xc1] sm:$0xff] %v4404_v17  ;;  %3982 = vmatmul.mubr.msk.f32.vlgmr.msra.gmra.mrb[0].mxu1 %vm3979_vm1, %v596_v23  ;;  %v3546_v23 = vpack.c.bf16 %v680_v22, %v679_v21  ;;  %v3686_v42 = vpack.c.bf16 %v1619_v39, %v1618_v38  ;;  %v3562_v48 = vpack.c.bf16 %v688_v44, %v687_v43  ;;  %v1803_v1 = vld [vmem:[%s5045_s3 + $0x308] sm:$0xff]  ;;  %v4552_v16 = vld [vmem:[#allocation2 + $0x1a] sm:$0xff]  ;;  %v1804_v11 = vld [vmem:[%s5045_s3 + $0x310] sm:$0xff] }
  0x2e   : > { %3259 = vmatmul.mubr.f32.vlgmr.msra.gmra.mrb[0].mxu0 %v4262_v59  ;;  %3541 = vmatpush3.bf16.msra.mxu1 %v3538_v62  ;;  %v3690_v49 = vpack.c.bf16 %v1621_v46, %v1620_v45  ;;  %v3566_v56 = vpack.c.bf16 %v690_v52, %v689_v50  ;;  %v3694_v57 = vpack.c.bf16 %v1623_v55, %v1622_v53  ;;  %v1802_v62 = vld [vmem:[%s5045_s3 + $0x300] sm:$0xff]  ;;  %v598_v7 = vld [vmem:[%s481_s16 + $0x8] sm:$0xff]  ;;  %v1032_v21 = vld [vmem:[%s5045_s3 + $0x118] sm:$0xff]  ;;  %vm4570_vm2 = vcmp.eq.s32.totalorder %v613_v6, 1  ;;  %s502_s16 = sadd.s32 %s2700_s17, %s5079_s27 }
  0x2f   : > { %658 = vst [vmem:[#allocation2 + $0xc9] sm:$0xff] %v4407_v18  ;;  %3669 = vmatpush3.bf16.msra.mxu0 %v3666_v3  ;;  %3037 = vmatprep.mubr.f32.mxu1 %v4253_v51  ;;  %v1614_v51 = vld [vmem:[%s5045_s3 + $0x2b0] sm:$0xff]  ;;  %v599_v3 = vmul.f32 %v4203_v28, %v597_v2  ;;  %v3570_v10 = vpack.c.bf16 %v1030_v61, %v1029_v60  ;;  %v1805_v14 = vld [vmem:[%s5045_s3 + $0x318] sm:$0xff]  ;;  %v4577_v25 = vld [vmem:[#allocation2 + $0x22] sm:$0xff]  ;;  %s503_s23 = scalar_lea.vmem %s5049_s7, %s502_s16  ;;  %s510_s12 = scalar_lea.vmem %s5050_s8, %s502_s16 }
  0x30   : > { %3261 = vmatprep.mubr.f32.mxu0 %v4270_v0  ;;  %3543 = vmatprep.subr.bf16.mxu1 %v3542_v19  ;;  %v600_v13 = vmul.f32 %v4203_v28, %v598_v7  ;;  %v660_v28 = vld [vmem:[#allocation2 + $0x8] sm:$0xff]  ;;  %v1033_v32 = vld [vmem:[%s5045_s3 + $0x120] sm:$0xff]  ;;  %v4613_v38 = vld [vmem:[#allocation2 + $0x30] sm:$0xff] }
  0x31   : > { %3038 = vmatmul.mubr.f32.gmra.mrb[2].mxu1 %v4262_v59  ;;  %3671 = vmatprep.subr.bf16.mxu0 %v3670_v20  ;;  %v1615_v59 = vld [vmem:[%s5045_s3 + $0x2b8] sm:$0xff]  ;;  %v4561_v22 = vadd.f32 %v4213_v30, %v599_v3  ;;  %v1034_v33 = vld [vmem:[%s5045_s3 + $0x128] sm:$0xff]  ;;  %v1035_v43 = vld [vmem:[%s5045_s3 + $0x130] sm:$0xff] }
  0x32   : > { %3262 = vmatmul.mubr.f32.gmra.mrb[2].mxu0 %v4281_v5  ;;  %3545 = vmatpush3.bf16.msra.mxu1 %v3542_v19  ;;  %v3678_v31 = vpack.c.bf16 %v1615_v59, %v1614_v51  ;;  %v3698_v19 = vpack.c.bf16 %v1803_v1, %v1802_v62  ;;  %v4581_v51 = vld [vmem:[#allocation2 + $0x18] sm:$0xff]  ;;  %v3578_v39 = vpack.c.bf16 %v1034_v33, %v1033_v32  ;;  %v1808_v46 = vld [vmem:[%s5045_s3 + $0x330] sm:$0xff]  ;;  %v4637_v50 = vld [vmem:[#allocation2 + $0x48] sm:$0xff] }
  0x33   : > { %3673 = vmatpush3.bf16.msra.mxu0 %v3670_v20  ;;  %3040 = vmatprep.mubr.f32.mxu1 %v4270_v0  ;;  %v1616_v0 = vld [vmem:[%s5045_s3 + $0x2c0] sm:$0xff]  ;;  %v1031_v20 = vld [vmem:[%s5045_s3 + $0x110] sm:$0xff]  ;;  %v603_v26 = vmax.f32 %v4561_v22, 0.0  ;;  %v1036_v44 = vld [vmem:[%s5045_s3 + $0x138] sm:$0xff] }
  0x34   : > { %3264 = vmatprep.mubr.f32.mxu0 %v4291_v12  ;;  %3547 = vmatprep.subr.bf16.mxu1 %v3546_v23  ;;  %v3574_v59 = vpack.c.bf16 %v1032_v21, %v1031_v20  ;;  %v4610_v37 = vld [vmem:[#allocation2 + $0x3a] sm:$0xff]  ;;  %v3582_v52 = vpack.c.bf16 %v1036_v44, %v1035_v43  ;;  %v4640_v53 = vld [vmem:[#allocation2 + $0x62] sm:$0xff]  ;;  %v4649_v60 = vld [vmem:[#allocation2 + $0x50] sm:$0xff] }
  0x35   : > { %3041 = vmatmul.mubr.f32.gmra.mrb[4].mxu1 %v4281_v5  ;;  %3675 = vmatprep.subr.bf16.mxu0 %v3674_v24  ;;  %v1617_v5 = vld [vmem:[%s5045_s3 + $0x2c8] sm:$0xff]  ;;  %v4625_v45 = vld [vmem:[#allocation2 + $0x38] sm:$0xff]  ;;  %v1810_v61 = vld [vmem:[%s5045_s3 + $0x340] sm:$0xff] }
  0x36   : > { %3265 = vmatmul.mubr.f32.gmra.mrb[4].mxu0 %v4300_v15  ;;  %3549 = vmatpush3.bf16.msra.mxu1 %v3546_v23  ;;  %v3682_v35 = vpack.c.bf16 %v1617_v5, %v1616_v0  ;;  %v615_v0 = vsel %vm4570_vm2, 0.0, %v603_v26  ;;  %v4597_v5 = vld [vmem:[#allocation2 + $0x20] sm:$0xff]  ;;  %v1811_v62 = vld [vmem:[%s5045_s3 + $0x348] sm:$0xff]  ;;  %v1813_v20 = vld [vmem:[%s5045_s3 + $0x358] sm:$0xff] }
  0x37   : > { %3677 = vmatpush3.bf16.msra.mxu0 %v3674_v24  ;;  %3043 = vmatprep.mubr.f32.mxu1 %v4291_v12  ;;  %v4575_v24 = vadd.f32 %v4213_v30, %v600_v13  ;;  %v3702_v30 = vpack.c.bf16 %v1805_v14, %v1804_v11  ;;  %640 = vst [vmem:[#allocation2 + $0xd9] sm:$0xff] %v615_v0  ;;  %v4658_v1 = vld [vmem:[#allocation2 + $0x6a] sm:$0xff]  ;;  %v4661_v2 = vld [vmem:[#allocation2 + $0x60] sm:$0xff]  ;;  %v4688_v14 = vld [vmem:[#allocation2 + $0x92] sm:$0xff] }
  0x38   : > { %3267 = vmatprep.mubr.f32.mxu0 %v4323_v29  ;;  %3551 = vmatprep.subr.bf16.mxu1 %v3550_v27  ;;  %v4664_v6 = vld [vmem:[#allocation2 + $0x7a] sm:$0xff]  ;;  %v3714_v7 = vpack.c.bf16 %v1811_v62, %v1810_v61  ;;  %v4673_v13 = vld [vmem:[#allocation2 + $0x68] sm:$0xff]  ;;  %v1043_v44 = vld [vmem:[%s5045_s3 + $0x170] sm:$0xff] }
  0x39   : > { %3044 = vmatmul.mubr.f32.gmra.mrb[6].mxu1 %v4300_v15  ;;  %3679 = vmatprep.subr.bf16.mxu0 %v3678_v31  ;;  %v4682_v21 = vld [vmem:[#allocation2 + $0x82] sm:$0xff]  ;;  %vm3983_vm3 = vmneg %vm4570_vm2 }
  0x3a   : > { %3268 = vmatmul.mubr.f32.gmra.mrb[6].mxu0 %v4340_v40  ;;  %3553 = vmatpush3.bf16.msra.mxu1 %v3550_v27  ;;  %v604_v27 = vmax.f32 %v4575_v24, 0.0  ;;  %v1042_v32 = vld [vmem:[%s5045_s3 + $0x168] sm:$0xff]  ;;  %v4697_v33 = vld [vmem:[#allocation2 + $0x80] sm:$0xff] }
  0x3b   : > { %3681 = vmatpush3.bf16.msra.mxu0 %v3678_v31  ;;  %3046 = vmatprep.mubr.f32.mxu1 %v4323_v29  ;;  %v4584_v31 = vld [vmem:[#allocation2 + $0x32] sm:$0xff]  ;;  %v1814_v0 = vld [vmem:[%s5045_s3 + $0x360] sm:$0xff] }
  0x3c   : > { %3270 = vmatprep.mubr.f32.mxu0 %v4356_v47  ;;  %3555 = vmatprep.subr.bf16.mxu1 %v3554_v34  ;;  %v616_v36 = vsel %vm4570_vm2, 0.0, %v604_v27  ;;  %v4736_v62 = vld [vmem:[#allocation2 + $0xc2] sm:$0xff] }
  0x3d   : > { %3047 = vmatmul.mubr.f32.gmra.mrb[8].mxu1 %v4340_v40  ;;  %3683 = vmatprep.subr.bf16.mxu0 %v3682_v35  ;;  %641 = vst [vmem:[#allocation2 + $0xe1] sm:$0xff] %v616_v36  ;;  %v4709_v36 = vld [vmem:[#allocation2 + $0x90] sm:$0xff] }
  0x3e   : > { %3271 = vmatmul.mubr.f32.gmra.mrb[8].mxu0 %v4368_v54  ;;  %3557 = vmatpush3.bf16.msra.mxu1 %v3554_v34  ;;  %v1806_v34 = vld [vmem:[%s5045_s3 + $0x320] sm:$0xff] }
  0x3f   : > { %3685 = vmatpush3.bf16.msra.mxu0 %v3682_v35  ;;  %3049 = vmatprep.mubr.f32.mxu1 %v4356_v47  ;;  %v1807_v35 = vld [vmem:[%s5045_s3 + $0x328] sm:$0xff] }
  0x40   : > { %3273 = vmatprep.mubr.f32.mxu0 %v4374_v58  ;;  %3559 = vmatprep.subr.bf16.mxu1 %v3558_v41 }
  0x41   : > { %3050 = vmatmul.mubr.f32.gmra.mrb[10].mxu1 %v4368_v54  ;;  %3687 = vmatprep.subr.bf16.mxu0 %v3686_v42 }
  0x42   : > { %3274 = vmatmul.mubr.f32.gmra.mrb[10].mxu0 %v4379_v63  ;;  %3561 = vmatpush3.bf16.msra.mxu1 %v3558_v41  ;;  %v4616_v41 = vld [vmem:[#allocation2 + $0x4a] sm:$0xff] }
  0x43   : > { %3689 = vmatpush3.bf16.msra.mxu0 %v3686_v42  ;;  %3052 = vmatprep.mubr.f32.mxu1 %v4374_v58  ;;  %v3706_v42 = vpack.c.bf16 %v1807_v35, %v1806_v34  ;;  %v1815_v34 = vld [vmem:[%s5045_s3 + $0x368] sm:$0xff]  ;;  %v4706_v35 = vld [vmem:[#allocation2 + $0x9a] sm:$0xff] }
  0x44   : > { %3276 = vmatprep.mubr.f32.mxu0 %v4384_v4  ;;  %3563 = vmatprep.subr.bf16.mxu1 %v3562_v48  ;;  %v3722_v43 = vpack.c.bf16 %v1815_v34, %v1814_v0  ;;  %v1224_v0 = vld [vmem:[%s5045_s3 + $0x190] sm:$0xff]  ;;  %v1225_v34 = vld [vmem:[%s5045_s3 + $0x198] sm:$0xff] }
  0x45   : > { %3053 = vmatmul.mubr.f32.gmra.mrb[12].mxu1 %v4379_v63  ;;  %3691 = vmatprep.subr.bf16.mxu0 %v3690_v49 }
  0x46   : > { %3277 = vmatmul.mubr.f32.gmra.mrb[12].mxu0 %v4394_v9  ;;  %3565 = vmatpush3.bf16.msra.mxu1 %v3562_v48  ;;  %v1809_v48 = vld [vmem:[%s5045_s3 + $0x338] sm:$0xff] }
  0x47   : > { %3693 = vmatpush3.bf16.msra.mxu0 %v3690_v49  ;;  %3055 = vmatprep.mubr.f32.mxu1 %v4384_v4  ;;  %v4634_v49 = vld [vmem:[#allocation2 + $0x52] sm:$0xff]  ;;  %v3710_v55 = vpack.c.bf16 %v1809_v48, %v1808_v46 }
  0x48   : > { %3279 = vmatprep.mubr.f32.mxu0 %v4404_v17  ;;  %3567 = vmatprep.subr.bf16.mxu1 %v3566_v56  ;;  %v1044_v46 = vld [vmem:[%s5045_s3 + $0x178] sm:$0xff] }
  0x49   : > { %3056 = vmatmul.mubr.f32.gmra.mrb[14].mxu1 %v4394_v9  ;;  %3695 = vmatprep.subr.bf16.mxu0 %v3694_v57  ;;  %v4721_v48 = vld [vmem:[#allocation2 + $0x98] sm:$0xff]  ;;  %v3598_v61 = vpack.c.bf16 %v1044_v46, %v1043_v44  ;;  %v3606_v46 = vpack.c.bf16 %v1225_v34, %v1224_v0  ;;  %v1230_v0 = vld [vmem:[%s5045_s3 + $0x1c0] sm:$0xff]  ;;  %v1231_v34 = vld [vmem:[%s5045_s3 + $0x1c8] sm:$0xff] }
  0x4a   : > { %3280 = vmatmul.mubr.f32.gmra.mrb[14].mxu0 %v4407_v18  ;;  %3569 = vmatpush3.bf16.msra.mxu1 %v3566_v56  ;;  %v1037_v56 = vld [vmem:[%s5045_s3 + $0x140] sm:$0xff]  ;;  %v1998_v44 = vld [vmem:[%s5045_s3 + $0x398] sm:$0xff] }
  0x4b   : > { %3697 = vmatpush3.bf16.msra.mxu0 %v3694_v57  ;;  %3090 = vmatprep.mubr.f32.mxu1 %v659_v8  ;;  %v1038_v57 = vld [vmem:[%s5045_s3 + $0x148] sm:$0xff]  ;;  %v1039_v8 = vld [vmem:[%s5045_s3 + $0x150] sm:$0xff] }
  0x4c   : > { %3314 = vmatprep.mubr.f32.mxu0 %v4552_v16  ;;  %3571 = vmatprep.subr.bf16.mxu1 %v3570_v10  ;;  %v3586_v3 = vpack.c.bf16 %v1038_v57, %v1037_v56  ;;  %v4730_v56 = vld [vmem:[#allocation2 + $0xb2] sm:$0xff]  ;;  %v4733_v57 = vld [vmem:[#allocation2 + $0xa8] sm:$0xff] }
  0x4d   : > { %3091 = vmatmul.mubr.f32.vlgmr.msra.gmra.mrb[0].mxu1 %v660_v28  ;;  %3699 = vmatprep.subr.bf16.mxu0 %v3698_v19  ;;  %v4685_v28 = vld [vmem:[#allocation2 + $0x78] sm:$0xff] }
  0x4e   : > { %3315 = vmatmul.mubr.f32.vlgmr.msra.gmra.mrb[0].mxu0 %v4577_v25  ;;  %3573 = vmatpush3.bf16.msra.mxu1 %v3570_v10  ;;  %v1040_v10 = vld [vmem:[%s5045_s3 + $0x158] sm:$0xff] }
  0x4f   : > { %3701 = vmatpush3.bf16.msra.mxu0 %v3698_v19  ;;  %3093 = vmatprep.mubr.f32.mxu1 %v4581_v51  ;;  %v1812_v19 = vld [vmem:[%s5045_s3 + $0x350] sm:$0xff]  ;;  %v3590_v11 = vpack.c.bf16 %v1040_v10, %v1039_v8  ;;  %v1223_v8 = vld [vmem:[%s5045_s3 + $0x188] sm:$0xff] }
  0x50   : > { %3317 = vmatprep.mubr.f32.mxu0 %v4584_v31  ;;  %3575 = vmatprep.subr.bf16.mxu1 %v3574_v59  ;;  %v4745_v10 = vld [vmem:[#allocation2 + $0xb0] sm:$0xff] }
  0x51   : > { %3094 = vmatmul.mubr.f32.gmra.mrb[2].mxu1 %v4597_v5  ;;  %3703 = vmatprep.subr.bf16.mxu0 %v3702_v30 }
  0x52   : > { %3318 = vmatmul.mubr.f32.gmra.mrb[2].mxu0 %v4610_v37  ;;  %3577 = vmatpush3.bf16.msra.mxu1 %v3574_v59  ;;  %v3718_v59 = vpack.c.bf16 %v1813_v20, %v1812_v19  ;;  %v1995_v19 = vld [vmem:[%s5045_s3 + $0x380] sm:$0xff]  ;;  %v1996_v20 = vld [vmem:[%s5045_s3 + $0x388] sm:$0xff] }
  0x53   : > { %3705 = vmatpush3.bf16.msra.mxu0 %v3702_v30  ;;  %3096 = vmatprep.mubr.f32.mxu1 %v4613_v38  ;;  %v1041_v30 = vld [vmem:[%s5045_s3 + $0x160] sm:$0xff] }
  0x54   : > { %3320 = vmatprep.mubr.f32.mxu0 %v4616_v41  ;;  %3579 = vmatprep.subr.bf16.mxu1 %v3578_v39 }
  0x55   : > { %3097 = vmatmul.mubr.f32.gmra.mrb[4].mxu1 %v4625_v45  ;;  %3707 = vmatprep.subr.bf16.mxu0 %v3706_v42 }
  0x56   : > { %3321 = vmatmul.mubr.f32.gmra.mrb[4].mxu0 %v4634_v49  ;;  %3581 = vmatpush3.bf16.msra.mxu1 %v3578_v39  ;;  %v3594_v39 = vpack.c.bf16 %v1042_v32, %v1041_v30  ;;  %v3730_v32 = vpack.c.bf16 %v1996_v20, %v1995_v19  ;;  %v1228_v20 = vld [vmem:[%s5045_s3 + $0x1b0] sm:$0xff] }
  0x57   : > { %3709 = vmatpush3.bf16.msra.mxu0 %v3706_v42  ;;  %3099 = vmatprep.mubr.f32.mxu1 %v4637_v50  ;;  %v4712_v42 = vld [vmem:[#allocation2 + $0xaa] sm:$0xff] }
  0x58   : > { %3323 = vmatprep.mubr.f32.mxu0 %v4640_v53  ;;  %3583 = vmatprep.subr.bf16.mxu1 %v3582_v52 }
  0x59   : > { %3100 = vmatmul.mubr.f32.gmra.mrb[6].mxu1 %v4649_v60  ;;  %3711 = vmatprep.subr.bf16.mxu0 %v3710_v55 }
  0x5a   : > { %3324 = vmatmul.mubr.f32.gmra.mrb[6].mxu0 %v4658_v1  ;;  %3585 = vmatpush3.bf16.msra.mxu1 %v3582_v52  ;;  %v1816_v52 = vld [vmem:[%s5045_s3 + $0x370] sm:$0xff] }
  0x5b   : > { %3713 = vmatpush3.bf16.msra.mxu0 %v3710_v55  ;;  %3102 = vmatprep.mubr.f32.mxu1 %v4661_v2  ;;  %v1817_v55 = vld [vmem:[%s5045_s3 + $0x378] sm:$0xff] }
  0x5c   : > { %3326 = vmatprep.mubr.f32.mxu0 %v4664_v6  ;;  %3587 = vmatprep.subr.bf16.mxu1 %v3586_v3 }
  0x5d   : > { %3103 = vmatmul.mubr.f32.gmra.mrb[8].mxu1 %v4673_v13  ;;  %3715 = vmatprep.subr.bf16.mxu0 %v3714_v7 }
  0x5e   : > { %3327 = vmatmul.mubr.f32.gmra.mrb[8].mxu0 %v4682_v21  ;;  %3589 = vmatpush3.bf16.msra.mxu1 %v3586_v3  ;;  %v3726_v3 = vpack.c.bf16 %v1817_v55, %v1816_v52  ;;  %v1226_v55 = vld [vmem:[%s5045_s3 + $0x1a0] sm:$0xff] }
  0x5f   : > { %3717 = vmatpush3.bf16.msra.mxu0 %v3714_v7  ;;  %3105 = vmatprep.mubr.f32.mxu1 %v4685_v28  ;;  %v1222_v7 = vld [vmem:[%s5045_s3 + $0x180] sm:$0xff] }
  0x60   : > { %3329 = vmatprep.mubr.f32.mxu0 %v4688_v14  ;;  %3591 = vmatprep.subr.bf16.mxu1 %v3590_v11  ;;  %v3602_v30 = vpack.c.bf16 %v1223_v8, %v1222_v7  ;;  %v2000_v7 = vld [vmem:[%s5045_s3 + $0x3a8] sm:$0xff] }
  0x61   : > { %3106 = vmatmul.mubr.f32.gmra.mrb[10].mxu1 %v4697_v33  ;;  %3719 = vmatprep.subr.bf16.mxu0 %v3718_v59 }
  0x62   : > { %3330 = vmatmul.mubr.f32.gmra.mrb[10].mxu0 %v4706_v35  ;;  %3593 = vmatpush3.bf16.msra.mxu1 %v3590_v11  ;;  %v4754_v11 = vld [vmem:[#allocation2 + $0xca] sm:$0xff] }
  0x63   : > { %3721 = vmatpush3.bf16.msra.mxu0 %v3718_v59  ;;  %3108 = vmatprep.mubr.f32.mxu1 %v4709_v36  ;;  %v1013_v59 = vld [vmem:[#allocation2 + $0x2] sm:$0xff] }
  0x64   : > { %3332 = vmatprep.mubr.f32.mxu0 %v4712_v42  ;;  %3595 = vmatprep.subr.bf16.mxu1 %v3594_v39 }
  0x65   : > { %3109 = vmatmul.mubr.f32.gmra.mrb[12].mxu1 %v4721_v48  ;;  %3723 = vmatprep.subr.bf16.mxu0 %v3722_v43 }
  0x66   : > { %3333 = vmatmul.mubr.f32.gmra.mrb[12].mxu0 %v4730_v56  ;;  %3597 = vmatpush3.bf16.msra.mxu1 %v3594_v39  ;;  %v1014_v39 = vld [vmem:[#allocation2 + $0xa] sm:$0xff] }
  0x67   : > { %3725 = vmatpush3.bf16.msra.mxu0 %v3722_v43  ;;  %3111 = vmatprep.mubr.f32.mxu1 %v4733_v57  ;;  %v1997_v43 = vld [vmem:[%s5045_s3 + $0x390] sm:$0xff] }
  0x68   : > { %3335 = vmatprep.mubr.f32.mxu0 %v4736_v62  ;;  %3599 = vmatprep.subr.bf16.mxu1 %v3598_v61  ;;  %v3734_v52 = vpack.c.bf16 %v1998_v44, %v1997_v43  ;;  %v2004_v43 = vld [vmem:[%s5045_s3 + $0x3c8] sm:$0xff]  ;;  %v3618_v44 = vpack.c.bf16 %v1231_v34, %v1230_v0  ;;  %v1236_v0 = vld [vmem:[%s5045_s3 + $0x1f0] sm:$0xff]  ;;  %v1237_v34 = vld [vmem:[%s5045_s3 + $0x1f8] sm:$0xff] }
  0x69   : > { %3112 = vmatmul.mubr.f32.gmra.mrb[14].mxu1 %v4745_v10  ;;  %3727 = vmatprep.subr.bf16.mxu0 %v3726_v3 }
  0x6a   : > { %3336 = vmatmul.mubr.f32.gmra.mrb[14].mxu0 %v4754_v11  ;;  %3601 = vmatpush3.bf16.msra.mxu1 %v3598_v61  ;;  %v1227_v61 = vld [vmem:[%s5045_s3 + $0x1a8] sm:$0xff] }
  0x6b   : > { %3729 = vmatpush3.bf16.msra.mxu0 %v3726_v3  ;;  %3146 = vmatprep.mubr.f32.mxu1 %v1013_v59  ;;  %v1999_v3 = vld [vmem:[%s5045_s3 + $0x3a0] sm:$0xff]  ;;  %v3610_v8 = vpack.c.bf16 %v1227_v61, %v1226_v55  ;;  %v1229_v59 = vld [vmem:[%s5045_s3 + $0x1b8] sm:$0xff]  ;;  %v2005_v61 = vld [vmem:[%s5045_s3 + $0x3d0] sm:$0xff] }
  0x6c   : > { %3370 = vmatprep.mubr.f32.mxu0 %v4613_v38  ;;  %3603 = vmatprep.subr.bf16.mxu1 %v3602_v30  ;;  %v3738_v19 = vpack.c.bf16 %v2000_v7, %v1999_v3  ;;  %v1233_v55 = vld [vmem:[%s5045_s3 + $0x1d8] sm:$0xff] }
  0x6d   : > { %3147 = vmatmul.mubr.f32.vlgmr.msra.gmra.mrb[0].mxu1 %v1014_v39  ;;  %3731 = vmatprep.subr.bf16.mxu0 %v3730_v32  ;;  %v2003_v39 = vld [vmem:[%s5045_s3 + $0x3c0] sm:$0xff]  ;;  %v2006_v3 = vld [vmem:[%s5045_s3 + $0x3d8] sm:$0xff] }
  0x6e   : > { %3371 = vmatmul.mubr.f32.vlgmr.msra.gmra.mrb[0].mxu0 %v4625_v45  ;;  %3605 = vmatpush3.bf16.msra.mxu1 %v3602_v30  ;;  %v3614_v30 = vpack.c.bf16 %v1229_v59, %v1228_v20  ;;  %v1235_v20 = vld [vmem:[%s5045_s3 + $0x1e8] sm:$0xff]  ;;  %v2007_v59 = vld [vmem:[%s5045_s3 + $0x3e0] sm:$0xff] }
  0x6f   : > { %3733 = vmatpush3.bf16.msra.mxu0 %v3730_v32  ;;  %3149 = vmatprep.mubr.f32.mxu1 %v4552_v16  ;;  %v2001_v16 = vld [vmem:[%s5045_s3 + $0x3b0] sm:$0xff] }
  0x70   : > { %3373 = vmatprep.mubr.f32.mxu0 %v4637_v50  ;;  %3607 = vmatprep.subr.bf16.mxu1 %v3606_v46 }
  0x71   : > { %3150 = vmatmul.mubr.f32.gmra.mrb[2].mxu1 %v4577_v25  ;;  %3735 = vmatprep.subr.bf16.mxu0 %v3734_v52  ;;  %v2002_v25 = vld [vmem:[%s5045_s3 + $0x3b8] sm:$0xff] }
  0x72   : > { %3374 = vmatmul.mubr.f32.gmra.mrb[2].mxu0 %v4649_v60  ;;  %3609 = vmatpush3.bf16.msra.mxu1 %v3606_v46  ;;  %v3742_v32 = vpack.c.bf16 %v2002_v25, %v2001_v16  ;;  %v3746_v46 = vpack.c.bf16 %v2004_v43, %v2003_v39  ;;  %v2008_v16 = vld [vmem:[%s5045_s3 + $0x3e8] sm:$0xff]  ;;  %v2009_v39 = vld [vmem:[%s5045_s3 + $0x3f0] sm:$0xff]  ;;  %v2010_v43 = vld [vmem:[%s5045_s3 + $0x3f8] sm:$0xff] }
  0x73   : > { %3737 = vmatpush3.bf16.msra.mxu0 %v3734_v52  ;;  %3152 = vmatprep.mubr.f32.mxu1 %v4584_v31  ;;  %v1232_v52 = vld [vmem:[%s5045_s3 + $0x1d0] sm:$0xff] }
  0x74   : > { %3376 = vmatprep.mubr.f32.mxu0 %v4661_v2  ;;  %3611 = vmatprep.subr.bf16.mxu1 %v3610_v8  ;;  %v3622_v7 = vpack.c.bf16 %v1233_v55, %v1232_v52  ;;  %v1800_v52 = vld [vmem:[#allocation2 + $0xd8] sm:$0xff]  ;;  %v3758_v55 = vpack.c.bf16 %v2010_v43, %v2009_v39 }
  0x75   : > { %3153 = vmatmul.mubr.f32.gmra.mrb[4].mxu1 %v4610_v37  ;;  %3739 = vmatprep.subr.bf16.mxu0 %v3738_v19 }
  0x76   : > { %3377 = vmatmul.mubr.f32.gmra.mrb[4].mxu0 %v4673_v13  ;;  %3613 = vmatpush3.bf16.msra.mxu1 %v3610_v8  ;;  %v3750_v8 = vpack.c.bf16 %v2006_v3, %v2005_v61  ;;  %v2188_v61 = vld [vmem:[%s5045_s3 + $0x400] sm:$0xff]  ;;  %v2189_v3 = vld [vmem:[%s5045_s3 + $0x408] sm:$0xff] }
  0x77   : > { %3741 = vmatpush3.bf16.msra.mxu0 %v3738_v19  ;;  %3155 = vmatprep.mubr.f32.mxu1 %v4616_v41  ;;  %v1234_v19 = vld [vmem:[%s5045_s3 + $0x1e0] sm:$0xff] }
  0x78   : > { %3379 = vmatprep.mubr.f32.mxu0 %v4685_v28  ;;  %3615 = vmatprep.subr.bf16.mxu1 %v3614_v30  ;;  %v3626_v25 = vpack.c.bf16 %v1235_v20, %v1234_v19  ;;  %v1979_v19 = vld [vmem:[#allocation2 + $0x31] sm:$0xff] }
  0x79   : > { %3156 = vmatmul.mubr.f32.gmra.mrb[6].mxu1 %v4634_v49  ;;  %3743 = vmatprep.subr.bf16.mxu0 %v3742_v32  ;;  %v2190_v20 = vld [vmem:[%s5045_s3 + $0x410] sm:$0xff] }
  0x7a   : > { %3380 = vmatmul.mubr.f32.gmra.mrb[6].mxu0 %v4697_v33  ;;  %3617 = vmatpush3.bf16.msra.mxu1 %v3614_v30  ;;  %v4852_v30 = vld [vmem:[#allocation2 + $0xc0] sm:$0xff] }
  0x7b   : > { %3745 = vmatpush3.bf16.msra.mxu0 %v3742_v32  ;;  %3158 = vmatprep.mubr.f32.mxu1 %v4640_v53  ;;  %v3754_v32 = vpack.c.bf16 %v2008_v16, %v2007_v59  ;;  %v2191_v59 = vld [vmem:[%s5045_s3 + $0x418] sm:$0xff] }
  0x7c   : > { %3382 = vmatprep.mubr.f32.mxu0 %v4709_v36  ;;  %3619 = vmatprep.subr.bf16.mxu1 %v3618_v44  ;;  %v1980_v16 = vld [vmem:[#allocation2 + $0x39] sm:$0xff] }
  0x7d   : > { %3159 = vmatmul.mubr.f32.gmra.mrb[8].mxu1 %v4658_v1  ;;  %3747 = vmatprep.subr.bf16.mxu0 %v3746_v46 }
  0x7e   : > { %3383 = vmatmul.mubr.f32.gmra.mrb[8].mxu0 %v4721_v48  ;;  %3621 = vmatpush3.bf16.msra.mxu1 %v3618_v44  ;;  %v4868_v44 = vld [vmem:[#allocation2 + $0xc8] sm:$0xff] }
  0x7f   : > { %3749 = vmatpush3.bf16.msra.mxu0 %v3746_v46  ;;  %3161 = vmatprep.mubr.f32.mxu1 %v4664_v6  ;;  %v3630_v46 = vpack.c.bf16 %v1237_v34, %v1236_v0  ;;  %v2193_v0 = vld [vmem:[%s5045_s3 + $0x428] sm:$0xff]  ;;  %v2195_v34 = vld [vmem:[%s5045_s3 + $0x438] sm:$0xff] }
  0x80   : > { %3385 = vmatprep.mubr.f32.mxu0 %v4733_v57  ;;  %3623 = vmatprep.subr.bf16.mxu1 %v3622_v7 }
  0x81   : > { %3162 = vmatmul.mubr.f32.gmra.mrb[10].mxu1 %v4682_v21  ;;  %3751 = vmatprep.subr.bf16.mxu0 %v3750_v8 }
  0x82   : > { %3386 = vmatmul.mubr.f32.gmra.mrb[10].mxu0 %v4745_v10  ;;  %3625 = vmatpush3.bf16.msra.mxu1 %v3622_v7  ;;  %v1801_v7 = vld [vmem:[#allocation2 + $0xe0] sm:$0xff] }
  0x83   : > { %3753 = vmatpush3.bf16.msra.mxu0 %v3750_v8  ;;  %3164 = vmatprep.mubr.f32.mxu1 %v4688_v14  ;;  %v3762_v8 = vpack.c.bf16 %v2189_v3, %v2188_v61 }
  0x84   : > { %3388 = vmatprep.mubr.f32.mxu0 %v4852_v30  ;;  %3627 = vmatprep.subr.bf16.mxu1 %v3626_v25 }
  0x85   : > { %3165 = vmatmul.mubr.f32.gmra.mrb[12].mxu1 %v4706_v35  ;;  %3755 = vmatprep.subr.bf16.mxu0 %v3754_v32 }
  0x86   : > { %3389 = vmatmul.mubr.f32.gmra.mrb[12].mxu0 %v4868_v44  ;;  %3629 = vmatpush3.bf16.msra.mxu1 %v3626_v25  ;;  %v3766_v25 = vpack.c.bf16 %v2191_v59, %v2190_v20 }
  0x87   : > { %3757 = vmatpush3.bf16.msra.mxu0 %v3754_v32  ;;  %3167 = vmatprep.mubr.f32.mxu1 %v4712_v42  ;;  %v2192_v32 = vld [vmem:[%s5045_s3 + $0x420] sm:$0xff] }
  0x88   : > { %3391 = vmatprep.mubr.f32.mxu0 %v1800_v52  ;;  %3631 = vmatprep.subr.bf16.mxu1 %v3630_v46 }
  0x89   : > { %3168 = vmatmul.mubr.f32.gmra.mrb[14].mxu1 %v4730_v56  ;;  %3759 = vmatprep.subr.bf16.mxu0 %v3758_v55 }
  0x8a   : > { %3392 = vmatmul.mubr.f32.gmra.mrb[14].mxu0 %v1801_v7  ;;  %3633 = vmatpush3.bf16.msra.mxu1 %v3630_v46 }
  0x8b   : > { %3761 = vmatpush3.bf16.msra.mxu0 %v3758_v55  ;;  %3202 = vmatprep.mubr.f32.mxu1 %v4581_v51  ;;  %v3770_v51 = vpack.c.bf16 %v2193_v0, %v2192_v32 }
  0x8c   : > { %3426 = vmatprep.mubr.f32.mxu0 %v1979_v19  ;;  %3763 = vmatprep.subr.bf16.mxu0 %v3762_v8 }
  0x8d   : > { %3203 = vmatmul.mubr.f32.vlgmr.msra.gmra.mrb[0].mxu1 %v4597_v5  ;;  %3794 = vmatprep.subr.bf16.mxu1 %v3762_v8  ;;  %v2194_v5 = vld [vmem:[%s5045_s3 + $0x430] sm:$0xff] }
  0x8e   : > { %3427 = vmatmul.mubr.f32.vlgmr.msra.gmra.mrb[0].mxu0 %v1980_v16  ;;  %3802 = vmatpush3.bf16.msra.mxu1 %v3762_v8 }
  0x8f   : > { %3765 = vmatpush3.bf16.msra.mxu0 %v3762_v8  ;;  %3205 = vmatprep.mubr.f32.mxu1 %v4613_v38  ;;  %v2196_v38 = vld [vmem:[%s5045_s3 + $0x440] sm:$0xff] }
  0x90   : > { %3429 = vmatprep.mubr.f32.mxu0 %v4291_v12  ;;  %3767 = vmatprep.subr.bf16.mxu0 %v3766_v25  ;;  %v3774_v12 = vpack.c.bf16 %v2195_v34, %v2194_v5 }
  0x91   : > { %3206 = vmatmul.mubr.f32.gmra.mrb[2].mxu1 %v4625_v45  ;;  %3795 = vmatprep.subr.bf16.mxu1 %v3766_v25  ;;  %v2197_v45 = vld [vmem:[%s5045_s3 + $0x448] sm:$0xff] }
  0x92   : > { %3430 = vmatmul.mubr.f32.gmra.mrb[2].mxu0 %v4300_v15  ;;  %3803 = vmatpush3.bf16.msra.mxu1 %v3766_v25  ;;  %v3778_v15 = vpack.c.bf16 %v2197_v45, %v2196_v38 }
  0x93   : > { %3769 = vmatpush3.bf16.msra.mxu0 %v3766_v25  ;;  %3208 = vmatprep.mubr.f32.mxu1 %v4637_v50  ;;  %v2199_v50 = vld [vmem:[%s5045_s3 + $0x458] sm:$0xff] }
  0x94   : > { %3432 = vmatprep.mubr.f32.mxu0 %v4323_v29  ;;  %3771 = vmatprep.subr.bf16.mxu0 %v3770_v51  ;;  %v2198_v29 = vld [vmem:[%s5045_s3 + $0x450] sm:$0xff] }
  0x95   : > { %3209 = vmatmul.mubr.f32.gmra.mrb[4].mxu1 %v4649_v60  ;;  %3796 = vmatprep.subr.bf16.mxu1 %v3770_v51  ;;  %v2201_v60 = vld [vmem:[%s5045_s3 + $0x468] sm:$0xff] }
  0x96   : > { %3433 = vmatmul.mubr.f32.gmra.mrb[4].mxu0 %v4340_v40  ;;  %3804 = vmatpush3.bf16.msra.mxu1 %v3770_v51  ;;  %v3782_v40 = vpack.c.bf16 %v2199_v50, %v2198_v29 }
  0x97   : > { %3773 = vmatpush3.bf16.msra.mxu0 %v3770_v51  ;;  %3211 = vmatprep.mubr.f32.mxu1 %v4661_v2  ;;  %v2203_v2 = vld [vmem:[%s5045_s3 + $0x478] sm:$0xff] }
  0x98   : > { %3435 = vmatprep.mubr.f32.mxu0 %v4356_v47  ;;  %3775 = vmatprep.subr.bf16.mxu0 %v3774_v12  ;;  %v2200_v47 = vld [vmem:[%s5045_s3 + $0x460] sm:$0xff] }
  0x99   : > { %3212 = vmatmul.mubr.f32.gmra.mrb[6].mxu1 %v4673_v13  ;;  %3797 = vmatprep.subr.bf16.mxu1 %v3774_v12 }
  0x9a   : > { %3436 = vmatmul.mubr.f32.gmra.mrb[6].mxu0 %v4368_v54  ;;  %3805 = vmatpush3.bf16.msra.mxu1 %v3774_v12  ;;  %v3786_v54 = vpack.c.bf16 %v2201_v60, %v2200_v47 }
  0x9b   : > { %3777 = vmatpush3.bf16.msra.mxu0 %v3774_v12  ;;  %3214 = vmatprep.mubr.f32.mxu1 %v4685_v28 }
  0x9c   : > { %3438 = vmatprep.mubr.f32.mxu0 %v4374_v58  ;;  %3779 = vmatprep.subr.bf16.mxu0 %v3778_v15  ;;  %v2202_v58 = vld [vmem:[%s5045_s3 + $0x470] sm:$0xff] }
  0x9d   : > { %3215 = vmatmul.mubr.f32.gmra.mrb[8].mxu1 %v4697_v33  ;;  %3798 = vmatprep.subr.bf16.mxu1 %v3778_v15 }
  0x9e   : > { %3439 = vmatmul.mubr.f32.gmra.mrb[8].mxu0 %v4379_v63  ;;  %3806 = vmatpush3.bf16.msra.mxu1 %v3778_v15  ;;  %v3790_v63 = vpack.c.bf16 %v2203_v2, %v2202_v58 }
  0x9f   : > { %3781 = vmatpush3.bf16.msra.mxu0 %v3778_v15  ;;  %3217 = vmatprep.mubr.f32.mxu1 %v4709_v36 }
  0xa0   : > { %3441 = vmatprep.mubr.f32.mxu0 %v4384_v4  ;;  %3783 = vmatprep.subr.bf16.mxu0 %v3782_v40  ;;  %v2186_v4 = vld [vmem:[#allocation2 + $0xda] sm:$0xff] }
  0xa1   : > { %3218 = vmatmul.mubr.f32.gmra.mrb[10].mxu1 %v4721_v48  ;;  %3799 = vmatprep.subr.bf16.mxu1 %v3782_v40 }
  0xa2   : > { %3442 = vmatmul.mubr.f32.gmra.mrb[10].mxu0 %v4394_v9  ;;  %3807 = vmatpush3.bf16.msra.mxu1 %v3782_v40  ;;  %v2187_v9 = vld [vmem:[#allocation2 + $0xe2] sm:$0xff] }
  0xa3   : > { %3785 = vmatpush3.bf16.msra.mxu0 %v3782_v40  ;;  %3220 = vmatprep.mubr.f32.mxu1 %v4733_v57 }
  0xa4   : > { %3444 = vmatprep.mubr.f32.mxu0 %v4404_v17  ;;  %3787 = vmatprep.subr.bf16.mxu0 %v3786_v54 }
  0xa5   : > { %3221 = vmatmul.mubr.f32.gmra.mrb[12].mxu1 %v4745_v10  ;;  %3800 = vmatprep.subr.bf16.mxu1 %v3786_v54 }
  0xa6   : > { %3445 = vmatmul.mubr.f32.gmra.mrb[12].mxu0 %v4407_v18  ;;  %3808 = vmatpush3.bf16.msra.mxu1 %v3786_v54 }
  0xa7   : > { %3789 = vmatpush3.bf16.msra.mxu0 %v3786_v54  ;;  %3223 = vmatprep.mubr.f32.mxu1 %v4852_v30 }
  0xa8   : > { %3984 = vmatprep.mubr.msk.f32.mxu0 %vm3983_vm3, %v603_v26  ;;  %3791 = vmatprep.subr.bf16.mxu0 %v3790_v63 }
  0xa9   : > { %3224 = vmatmul.mubr.f32.gmra.mrb[14].mxu1 %v4868_v44  ;;  %3801 = vmatprep.subr.bf16.mxu1 %v3790_v63 }
  0xaa   : > { %3986 = vmatmul.mubr.msk.f32.gmra.mrb[14].mxu0 %vm3983_vm3, %v604_v27  ;;  %3809 = vmatpush3.bf16.msra.mxu1 %v3790_v63 }
  0xab   : > { %3793 = vmatpush3.bf16.msra.mxu0 %v3790_v63  ;;  %3482 = vmatprep.mubr.f32.mxu0 %v4584_v31 }
  0xac   : > { %3494 = vmatprep.mubr.f32.mxu1 %v4688_v14 }
  0xad   : > { %3495 = vmatmul.mubr.f32.vlgmr.msra.gmra.mrb[16].mxu1 %v4706_v35 }
  0xae   : > { %3483 = vmatmul.mubr.f32.vlgmr.msra.gmra.mrb[0].mxu0 %v4610_v37  ;;  %3497 = vmatprep.mubr.f32.mxu1 %v4712_v42 }
  0xaf   : > { %3485 = vmatprep.mubr.f32.mxu0 %v4616_v41 }
  0xb1   : > { %3498 = vmatmul.mubr.f32.gmra.mrb[18].mxu1 %v4730_v56 }
  0xb2   : > { %3486 = vmatmul.mubr.f32.gmra.mrb[2].mxu0 %v4634_v49  ;;  %3500 = vmatprep.mubr.f32.mxu1 %v4736_v62 }
  0xb3   : > { %3488 = vmatprep.mubr.f32.mxu0 %v4640_v53 }
  0xb5   : > { %3501 = vmatmul.mubr.f32.gmra.mrb[20].mxu1 %v4754_v11 }
  0xb6   : > { %3489 = vmatmul.mubr.f32.gmra.mrb[4].mxu0 %v4658_v1  ;;  %3503 = vmatprep.mubr.f32.mxu1 %v2186_v4 }
  0xb7   : > { %3491 = vmatprep.mubr.f32.mxu0 %v4664_v6 }
  0xb9   : > { %3504 = vmatmul.mubr.f32.gmra.mrb[22].mxu1 %v2187_v9 }
  0xba   : > { %3492 = vmatmul.mubr.f32.gmra.mrb[6].mxu0 %v4682_v21 }
 0x160   : > { %v3204_v17 = vpop.f32.mrb[0].mxu1 }
 0x161   : > { %v1304_v18 = vpop.f32.mrb[1].mxu1 }
 0x164   : > { %v3207_v22 = vpop.f32.mrb[2].mxu1 }
 0x165   : > { %v1314_v23 = vpop.f32.mrb[3].mxu1 }
 0x168   : > { %v4971_v24 = vpop.f32.mrb[4].mxu1 }
 0x169   : > { %v4973_v26 = vpop.f32.mrb[5].mxu1 }
 0x16c   : > { %v4975_v27 = vpop.f32.mrb[6].mxu1 }
 0x16d   : > { %v4977_v31 = vpop.f32.mrb[7].mxu1 }
 0x170   : > { %v3216_v37 = vpop.f32.mrb[8].mxu1 }
 0x171   : > { %v3440_v41 = vpop.f32.mrb[8].mxu0  ;;  %v1344_v49 = vpop.f32.mrb[9].mxu1 }
 0x172   : > { %v3818_v53 = vadd.f32 %v3440_v41, %v3216_v37  ;;  %v2117_v1 = vpop.f32.mrb[9].mxu0 }
 0x173   : > { %v3820_v6 = vadd.f32 %v2117_v1, %v1344_v49 }
 0x174   : > { %v3219_v13 = vpop.f32.mrb[10].mxu1 }
 0x175   : > { %v3443_v21 = vpop.f32.mrb[10].mxu0  ;;  %v1354_v28 = vpop.f32.mrb[11].mxu1 }
 0x176   : > { %v3822_v14 = vadd.f32 %v3443_v21, %v3219_v13  ;;  %v2127_v33 = vpop.f32.mrb[11].mxu0 }
 0x177   : > { %v3824_v35 = vadd.f32 %v2127_v33, %v1354_v28 }
 0x178   : > { %v3222_v36 = vpop.f32.mrb[12].mxu1 }
 0x179   : > { %v3446_v42 = vpop.f32.mrb[12].mxu0  ;;  %v1364_v48 = vpop.f32.mrb[13].mxu1 }
 0x17a   : > { %v3826_v56 = vadd.f32 %v3446_v42, %v3222_v36  ;;  %v2137_v57 = vpop.f32.mrb[13].mxu0 }
 0x17b   : > { %v3828_v62 = vadd.f32 %v2137_v57, %v1364_v48 }
 0x17c   : > { %v3225_v10 = vpop.f32.mrb[14].mxu1 }
 0x17d   : > { %v3449_v11 = vpop.f32.mrb[14].mxu0  ;;  %v1374_v30 = vpop.f32.mrb[15].mxu1 }
 0x17e   : > { %v3830_v39 = vadd.f32 %v3449_v11, %v3225_v10  ;;  %v2147_v43 = vpop.f32.mrb[15].mxu0 }
 0x17f   : > { %v3832_v44 = vadd.f32 %v2147_v43, %v1374_v30 }
 0x180   : > { %v3496_v46 = vpop.f32.mrb[16].mxu1 }
 0x181   : > { %v3484_v52 = vpop.f32.mrb[0].mxu0  ;;  %v4986_v55 = vadd.f32 %v3818_v53, %v3496_v46  ;;  %v2310_v61 = vpop.f32.mrb[17].mxu1 }
 0x182   : > { %v3810_v3 = vadd.f32 %v3484_v52, %v3204_v17  ;;  %v2270_v7 = vpop.f32.mrb[1].mxu0  ;;  %v4988_v8 = vadd.f32 %v3820_v6, %v2310_v61 }
 0x183   : > { %2374 = vst [vmem:[%s4984_s19 + $0x48] sm:$0xff] %v4986_v55  ;;  %v3811_v19 = vadd.f32 %v2270_v7, %v1304_v18 }
 0x184   : > { %2366 = vst [vmem:[%s4984_s19 + $0x8] sm:$0xff] %v3810_v3  ;;  %v2404_v20 = vmul.f32 %v3810_v3, %v3810_v3  ;;  %2373 = vst [vmem:[%s4984_s19 + $0x40] sm:$0xff] %v4988_v8  ;;  %v3499_v59 = vpop.f32.mrb[18].mxu1 }
 0x185   : > { %2365 = vst [vmem:[%s4984_s19] sm:$0xff] %v3811_v19  ;;  %v2381_v16 = vadd.f32 %v3811_v19, %v3810_v3  ;;  %v2403_v25 = vmul.f32 %v3811_v19, %v3811_v19  ;;  %v3487_v32 = vpop.f32.mrb[2].mxu0  ;;  %v3823_v0 = vadd.f32 %v3822_v14, %v3499_v59  ;;  %v2320_v51 = vpop.f32.mrb[19].mxu1 }
 0x186   : > { %v3812_v5 = vadd.f32 %v3487_v32, %v3207_v22  ;;  %v2280_v34 = vpop.f32.mrb[3].mxu0  ;;  %v3825_v12 = vadd.f32 %v3824_v35, %v2320_v51 }
 0x187   : > { %v2419_v38 = vadd.f32 %v2404_v20, %v2403_v25  ;;  %2376 = vst [vmem:[%s4984_s19 + $0x58] sm:$0xff] %v3823_v0  ;;  %v3813_v45 = vadd.f32 %v2280_v34, %v1314_v23  ;;  %v2414_v43 = vmul.f32 %v3823_v0, %v3823_v0 }
 0x188   : > { %2368 = vst [vmem:[%s4984_s19 + $0x18] sm:$0xff] %v3812_v5  ;;  %2375 = vst [vmem:[%s4984_s19 + $0x50] sm:$0xff] %v3825_v12  ;;  %v3502_v15 = vpop.f32.mrb[20].mxu1  ;;  %v2406_v63 = vmul.f32 %v3812_v5, %v3812_v5  ;;  %v2413_v11 = vmul.f32 %v3825_v12, %v3825_v12 }
 0x189   : > { %2367 = vst [vmem:[%s4984_s19 + $0x10] sm:$0xff] %v3813_v45  ;;  %v2382_v29 = vadd.f32 %v3813_v45, %v2381_v16  ;;  %v2405_v50 = vmul.f32 %v3813_v45, %v3813_v45  ;;  %v3490_v40 = vpop.f32.mrb[4].mxu0  ;;  %v3827_v47 = vadd.f32 %v3826_v56, %v3502_v15  ;;  %v2330_v60 = vpop.f32.mrb[21].mxu1 }
 0x18a   : > { %v3814_v54 = vadd.f32 %v3490_v40, %v4971_v24  ;;  %v2290_v58 = vpop.f32.mrb[5].mxu0  ;;  %v3829_v2 = vadd.f32 %v3828_v62, %v2330_v60  ;;  %v2412_v62 = vmul.f32 %v4986_v55, %v4986_v55 }
 0x18b   : > { %v2420_v4 = vadd.f32 %v2419_v38, %v2405_v50  ;;  %2378 = vst [vmem:[%s4984_s19 + $0x68] sm:$0xff] %v3827_v47  ;;  %v3815_v9 = vadd.f32 %v2290_v58, %v4973_v26  ;;  %v2383_v17 = vadd.f32 %v3812_v5, %v2382_v29  ;;  %v2416_v7 = vmul.f32 %v3827_v47, %v3827_v47 }
 0x18c   : > { %2370 = vst [vmem:[%s4984_s19 + $0x28] sm:$0xff] %v3814_v54  ;;  %2377 = vst [vmem:[%s4984_s19 + $0x60] sm:$0xff] %v3829_v2  ;;  %v3505_v18 = vpop.f32.mrb[22].mxu1  ;;  %v2408_v26 = vmul.f32 %v3814_v54, %v3814_v54  ;;  %v2415_v52 = vmul.f32 %v3829_v2, %v3829_v2 }
 0x18d   : > { %2369 = vst [vmem:[%s4984_s19 + $0x20] sm:$0xff] %v3815_v9  ;;  %v2384_v22 = vadd.f32 %v3815_v9, %v2383_v17  ;;  %v2407_v23 = vmul.f32 %v3815_v9, %v3815_v9  ;;  %v2421_v37 = vadd.f32 %v2420_v4, %v2406_v63  ;;  %v3493_v24 = vpop.f32.mrb[6].mxu0  ;;  %v3831_v41 = vadd.f32 %v3830_v39, %v3505_v18  ;;  %v2340_v49 = vpop.f32.mrb[23].mxu1 }
 0x18e   : > { %v3816_v53 = vadd.f32 %v3493_v24, %v4975_v27  ;;  %v2300_v1 = vpop.f32.mrb[7].mxu0  ;;  %v3833_v6 = vadd.f32 %v3832_v44, %v2340_v49  ;;  %v2411_v27 = vmul.f32 %v4988_v8, %v4988_v8 }
 0x18f   : > { %v2422_v13 = vadd.f32 %v2421_v37, %v2407_v23  ;;  %2380 = vst [vmem:[%s4984_s19 + $0x78] sm:$0xff] %v3831_v41  ;;  %v3817_v21 = vadd.f32 %v2300_v1, %v4977_v31  ;;  %v2385_v28 = vadd.f32 %v3814_v54, %v2384_v22 }
 0x190   : > { %2372 = vst [vmem:[%s4984_s19 + $0x38] sm:$0xff] %v3816_v53  ;;  %2379 = vst [vmem:[%s4984_s19 + $0x70] sm:$0xff] %v3833_v6  ;;  %v2410_v36 = vmul.f32 %v3816_v53, %v3816_v53  ;;  %v2417_v59 = vmul.f32 %v3833_v6, %v3833_v6 }
 0x191   : > { %2371 = vst [vmem:[%s4984_s19 + $0x30] sm:$0xff] %v3817_v21  ;;  %v2386_v14 = vadd.f32 %v3817_v21, %v2385_v28  ;;  %v2409_v33 = vmul.f32 %v3817_v21, %v3817_v21  ;;  %v2423_v35 = vadd.f32 %v2422_v13, %v2408_v26 }
 0x193   : > { %v2387_v42 = vadd.f32 %v3816_v53, %v2386_v14  ;;  %v2424_v48 = vadd.f32 %v2423_v35, %v2409_v33 }
 0x195   : > { %v2388_v56 = vadd.f32 %v4988_v8, %v2387_v42  ;;  %v2425_v57 = vadd.f32 %v2424_v48, %v2410_v36 }
 0x197   : > { %v2389_v31 = vadd.f32 %v4986_v55, %v2388_v56  ;;  %v2426_v10 = vadd.f32 %v2425_v57, %v2411_v27  ;;  %v2418_v55 = vmul.f32 %v3831_v41, %v3831_v41 }
 0x199   : > { %v2427_v30 = vadd.f32 %v2426_v10, %v2412_v62  ;;  %v2390_v39 = vadd.f32 %v3825_v12, %v2389_v31 }
 0x19b   : > { %v2391_v44 = vadd.f32 %v3823_v0, %v2390_v39  ;;  %v2428_v46 = vadd.f32 %v2427_v30, %v2413_v11 }
 0x19d   : > { %v2392_v61 = vadd.f32 %v3829_v2, %v2391_v44  ;;  %v2429_v3 = vadd.f32 %v2428_v46, %v2414_v43 }
 0x19f   : > { %v2393_v8 = vadd.f32 %v3827_v47, %v2392_v61  ;;  %v2430_v19 = vadd.f32 %v2429_v3, %v2415_v52 }
 0x1a1   : > { %v2394_v20 = vadd.f32 %v3833_v6, %v2393_v8  ;;  %v2431_v16 = vadd.f32 %v2430_v19, %v2416_v7 }
 0x1a3   : > { %v2395_v25 = vadd.f32 %v3831_v41, %v2394_v20  ;;  %v2432_v32 = vadd.f32 %v2431_v16, %v2417_v59 }
 0x1a5   : > { %v2396_v51 = vrot.slane %v2395_v25, 4  ;;  %v2433_v5 = vadd.f32 %v2432_v32, %v2418_v55 }
 0x1a7   : > { %v2397_v0 = vadd.f32 %v2396_v51, %v2395_v25  ;;  %v2434_v34 = vrot.slane %v2433_v5, 4 }
 0x1a9   : > { %v2398_v12 = vrot.slane %v2397_v0, 2  ;;  %v2435_v38 = vadd.f32 %v2434_v34, %v2433_v5 }
 0x1ab   : > { %v2399_v45 = vadd.f32 %v2398_v12, %v2397_v0  ;;  %v2436_v15 = vrot.slane %v2435_v38, 2 }
 0x1ad   : > { %v2400_v29 = vrot.slane %v2399_v45, 1  ;;  %v2437_v50 = vadd.f32 %v2436_v15, %v2435_v38 }
 0x1af   : > { %v2401_v40 = vadd.f32 %v2400_v29, %v2399_v45  ;;  %v2438_v47 = vrot.slane %v2437_v50, 1 }
 0x1b1   : > { %2402 = vst [vmem:[%s503_s23] sm:$0x1] %v2401_v40  ;;  %v2439_v60 = vadd.f32 %v2438_v47, %v2437_v50 }
 0x1b3   : > { %2440 = vst [vmem:[%s510_s12] sm:$0x1] %v2439_v60 }
 0x1b4 PF: > { %s19_s9 = sadd.s32 1, %s4025_s9   ;;  %s5060_s27 = smov %s4017_s29 }
 0x1b5   : > { %p16_p13 = scmp.ge.s32.totalorder %s19_s9, 6   ;;  %s5061_s28 = smov %s4021_s30 }
 0x1b6   : > { %s5062_s29 = smov %s5065_s10  ;;  %s5063_s30 = smov %s5069_s11 }
 0x1b7   :  { %18 = sbr.rel (!%p16_p13) target bundleno = 3 (0x3), region = 107 }

// kernel: conv2d_block_forward.3
= control target key start
LH: loop header
LB: loop body
LE: loop exit
PB: predicated region body
PF: predicated region fallthrough
CT: control target
= control target key end

     0   :  { %s4001_s27 = smov 0   ;;  %s4003_s28 = smov 0   ;;  %s4869_s0 = inlined_call_operand.vmem [shape: f32[2,16,16,128], index: 0, kind: input, shape index: {}, may-alias: {0,1,2}]   ;;  %s4870_s1 = inlined_call_operand.vmem [shape: f32[2,16,16,128], index: 1, kind: input, shape index: {}, may-alias: {0,1,2}]   ;;  %s4871_s2 = inlined_call_operand.vmem [shape: f32[2,16,16,128], index: 2, kind: input, shape index: {}, may-alias: {0,1,2}]   ;;  %s4872_s3 = inlined_call_operand.vmem [shape: f32[1152,128], index: 3, kind: input, shape index: {}]   ;;  %s4873_s4 = inlined_call_operand.vmem [shape: f32[1,128], index: 4, kind: input, shape index: {}]   ;;  %s4874_s5 = inlined_call_operand.vmem [shape: f32[1,128], index: 5, kind: input, shape index: {}]   ;;  %s4875_s6 = inlined_call_operand.vmem [shape: f32[2,16,16,128], index: 6, kind: output, shape index: {0}]   ;;  %s4876_s7 = inlined_call_operand.vmem [shape: f32[2,2,1,128], index: 7, kind: output, shape index: {1}]   ;;  %s4877_s8 = inlined_call_operand.vmem [shape: f32[2,2,1,128], index: 8, kind: output, shape index: {2}]  }
   0x1   :  { %s4005_s29 = smov 0   ;;  %s4007_s30 = smov 0  }
   0x2   :  { %s4009_s4 = smov 0  }
   0x3 LB: > { %s28_s5 = sadd.s32 1, %s3945_s29  ;;  %s31_s9 = sadd.s32 1, %s3949_s30  ;;  %s3953_s4 = sphi %s4009_s4, %s19_s4   ;;  %s3949_s30 = sphi %s4007_s30, %s4882_s30   ;;  %s3945_s29 = sphi %s4005_s29, %s4881_s29   ;;  %s3941_s28 = sphi %s4003_s28, %s4880_s28   ;;  %s3937_s27 = sphi %s4001_s27, %s4879_s27  }
   0x4   : > { %p29_p0 = scmp.ge.s32.totalorder %s28_s5, 2  ;;  %p2600_p1 = scmp.ge.s32.totalorder %s3953_s4, 1 }
   0x5   : > { %p357_p2 = scmp.lt.s32.totalorder %s3953_s4, 5 }
   0x6   : > { %s4884_s5 = smov (%p29_p0, %s28_s5), 0  ;;  %s4886_s9 = smov (!%p29_p0, %s31_s9), %s3949_s30 }
   0x7   : > { %p358_p3 = pnand %p2600_p1, %p357_p2  ;;  %p33_p4 = scmp.ge.s32.totalorder %s4886_s9, 2 }
   0x8   : > { %v633_v0 = vld [vmem:[%s4872_s3 + $0x80] sm:$0xff] (!%p358_p3)  ;;  %v634_v1 = vld [vmem:[%s4872_s3 + $0x88] sm:$0xff] (!%p358_p3)  ;;  %s4045_s16 = sshll.u32 (!%p358_p3), %s3937_s27, 3  ;;  %p442_p5 = scmp.lt.s32.totalorder (!%p358_p3), %s3941_s28, 1  ;;  %v635_v5 = vld [vmem:[%s4872_s3 + $0x90] sm:$0xff] (!%p358_p3)  ;;  %v3955_v7 = vmov (!%p358_p3), 0.0  }
   0x9   : > { %s4888_s9 = smov (%p33_p4, %s4886_s9), 0  ;;  %361 = sbr.rel (%p358_p3) target bundleno = 435 (0x1b3), region = 44 }
   0xa   : > { %v1341_v2 = vld [vmem:[%s4872_s3 + $0x200] sm:$0xff] (!%p358_p3)  ;;  %v3430_v3 = vpack.c.bf16 (!%p358_p3), %v634_v1, %v633_v0  ;;  %v1342_v4 = vld [vmem:[%s4872_s3 + $0x208] sm:$0xff] (!%p358_p3)  ;;  %v636_v6 = vld [vmem:[%s4872_s3 + $0x98] sm:$0xff] (!%p358_p3)  ;;  %p444_p6 = scmp.lt.s32.totalorder (!%p358_p3), %s4045_s16, 15  ;;  %s4059_s23 = sadd.s32 (!%p358_p3), 4294967295, %s4045_s16 }
   0xb   : > { %543 = vst [vmem:[#allocation2] sm:$0x1] (!%p358_p3), %v3955_v7  ;;  %544 = vst [vmem:[#allocation2 + $0x18] sm:$0x1] (!%p358_p3), %v3955_v7  ;;  %v3558_v8 = vpack.c.bf16 (!%p358_p3), %v1342_v4, %v1341_v2  ;;  %v3434_v9 = vpack.c.bf16 (!%p358_p3), %v636_v6, %v635_v5  ;;  %v1343_v10 = vld [vmem:[%s4872_s3 + $0x210] sm:$0xff] (!%p358_p3)  ;;  %v1344_v11 = vld [vmem:[%s4872_s3 + $0x218] sm:$0xff] (!%p358_p3) }
   0xc   : > { %545 = vst [vmem:[#allocation2 + $0x30] sm:$0x1] (!%p358_p3), %v3955_v7  ;;  %546 = vst [vmem:[#allocation2 + $0x48] sm:$0x1] (!%p358_p3), %v3955_v7  ;;  %v637_v12 = vld [vmem:[%s4872_s3 + $0xa0] sm:$0xff] (!%p358_p3)  ;;  %3431 = vmatprep.subr.bf16.mxu1 (!%p358_p3), %v3430_v3  ;;  %v3562_v13 = vpack.c.bf16 (!%p358_p3), %v1344_v11, %v1343_v10  ;;  %v638_v14 = vld [vmem:[%s4872_s3 + $0xa8] sm:$0xff] (!%p358_p3) }
   0xd   : > { %547 = vst [vmem:[#allocation2 + $0x60] sm:$0x1] (!%p358_p3), %v3955_v7  ;;  %548 = vst [vmem:[#allocation2 + $0x78] sm:$0x1] (!%p358_p3), %v3955_v7  ;;  %v1345_v15 = vld [vmem:[%s4872_s3 + $0x220] sm:$0xff] (!%p358_p3)  ;;  %v1346_v16 = vld [vmem:[%s4872_s3 + $0x228] sm:$0xff] (!%p358_p3)  ;;  %3559 = vmatprep.subr.bf16.mxu0 (!%p358_p3), %v3558_v8  ;;  %3433 = vmatpush3.bf16.msra.mxu1 (!%p358_p3), %v3430_v3  ;;  %v3438_v17 = vpack.c.bf16 (!%p358_p3), %v638_v14, %v637_v12 }
   0xe   : > { %549 = vst [vmem:[#allocation2 + $0x90] sm:$0x1] (!%p358_p3), %v3955_v7  ;;  %550 = vst [vmem:[#allocation2 + $0xa8] sm:$0x1] (!%p358_p3), %v3955_v7  ;;  %3561 = vmatpush3.bf16.msra.mxu0 (!%p358_p3), %v3558_v8  ;;  %3435 = vmatprep.subr.bf16.mxu1 (!%p358_p3), %v3434_v9  ;;  %p454_p7 = scmp.gt.s32.totalorder (!%p358_p3), %s4059_s23, 0  ;;  %v3566_v18 = vpack.c.bf16 (!%p358_p3), %v1346_v16, %v1345_v15  ;;  %v639_v19 = vld [vmem:[%s4872_s3 + $0xb0] sm:$0xff] (!%p358_p3) }
   0xf   : > { %551 = vst [vmem:[#allocation2 + $0xc0] sm:$0x1] (!%p358_p3), %v3955_v7  ;;  %552 = vst [vmem:[#allocation2 + $0xd8] sm:$0x1] (!%p358_p3), %v3955_v7  ;;  %3563 = vmatprep.subr.bf16.mxu0 (!%p358_p3), %v3562_v13  ;;  %v640_v20 = vld [vmem:[%s4872_s3 + $0xb8] sm:$0xff] (!%p358_p3)  ;;  %p531_p8 = scmp.eq.s32.totalorder (!%p358_p3), %s3937_s27, 0 }
  0x10   : > { %553 = vst [vmem:[#allocation2 + $0x11] sm:$0x1] %v3955_v7  ;;  %554 = vst [vmem:[#allocation2 + $0x29] sm:$0x1] %v3955_v7  ;;  %s4890_s28 = smov (!%p442_p5, %s3941_s28), 1  ;;  %v1347_v21 = vld [vmem:[%s4872_s3 + $0x230] sm:$0xff]  ;;  %v3442_v23 = vpack.c.bf16 %v640_v20, %v639_v19 }
  0x11   : > { %555 = vst [vmem:[#allocation2 + $0x41] sm:$0x1] %v3955_v7  ;;  %556 = vst [vmem:[#allocation2 + $0x59] sm:$0x1] %v3955_v7  ;;  %s445_s20 = scalar_select %p444_p6, %s4045_s16, 15  ;;  %v1348_v22 = vld [vmem:[%s4872_s3 + $0x238] sm:$0xff]  ;;  %3437 = vmatpush3.bf16.msra.mxu1 %v3434_v9 }
  0x12   : > { %557 = vst [vmem:[#allocation2 + $0x71] sm:$0x1] %v3955_v7  ;;  %558 = vst [vmem:[#allocation2 + $0x89] sm:$0x1] %v3955_v7  ;;  %s4088_s21 = sshll.u32 %s4890_s28, 5  ;;  %p2607_p9 = scmp.lt.s32.totalorder %s4059_s23, 15  ;;  %3565 = vmatpush3.bf16.msra.mxu0 %v3562_v13  ;;  %3439 = vmatprep.subr.bf16.mxu1 %v3438_v17  ;;  %v3570_v24 = vpack.c.bf16 %v1348_v22, %v1347_v21 }
  0x13   : > { %559 = vst [vmem:[#allocation2 + $0xa1] sm:$0x1] %v3955_v7  ;;  %560 = vst [vmem:[#allocation2 + $0xb9] sm:$0x1] %v3955_v7  ;;  %s2602_s22 = sshll.u32 %s445_s20, 1  ;;  %3567 = vmatprep.subr.bf16.mxu0 %v3566_v18  ;;  %v641_v25 = vld [vmem:[%s4872_s3 + $0xc0] sm:$0xff] }
  0x14   : > { %561 = vst [vmem:[#allocation2 + $0xd1] sm:$0x1] %v3955_v7  ;;  %562 = vst [vmem:[#allocation2 + $0xe9] sm:$0x1] %v3955_v7  ;;  %s4098_s11 = sadd.s32 %s4088_s21, %s2602_s22  ;;  %v642_v26 = vld [vmem:[%s4872_s3 + $0xc8] sm:$0xff]  ;;  %v1349_v28 = vld [vmem:[%s4872_s3 + $0x240] sm:$0xff] }
  0x15   : > { %s2604_s17 = sshll.u32 %s4098_s11, 3  ;;  %v1350_v29 = vld [vmem:[%s4872_s3 + $0x248] sm:$0xff]  ;;  %3441 = vmatpush3.bf16.msra.mxu1 %v3438_v17  ;;  %v3446_v32 = vpack.c.bf16 %v642_v26, %v641_v25  ;;  %v643_v35 = vld [vmem:[%s4872_s3 + $0xd0] sm:$0xff]  ;;  %v644_v36 = vld [vmem:[%s4872_s3 + $0xd8] sm:$0xff]  ;;  %p537_p10 = scmp.eq.s32.totalorder %s3937_s27, 1 }
  0x16   : > { %s4114_s20 = scalar_lea.vmem %s4869_s0, %s2604_s17  ;;  %3569 = vmatpush3.bf16.msra.mxu0 %v3566_v18  ;;  %3443 = vmatprep.subr.bf16.mxu1 %v3442_v23  ;;  %v3574_v34 = vpack.c.bf16 %v1350_v29, %v1349_v28  ;;  %v1351_v38 = vld [vmem:[%s4872_s3 + $0x250] sm:$0xff]  ;;  %v1352_v39 = vld [vmem:[%s4872_s3 + $0x258] sm:$0xff]  ;;  %v3450_v42 = vpack.c.bf16 %v644_v36, %v643_v35  ;;  %v645_v45 = vld [vmem:[%s4872_s3 + $0xe0] sm:$0xff]  ;;  %s2637_s24 = sadd.s32 8, %s4045_s16 }
  0x17   : > { %s455_s22 = scalar_select %p454_p7, %s4059_s23, 0  ;;  %v4126_v27 = vld [vmem:[%s4114_s20] sm:$0xff]  ;;  %v4139_v30 = vld [vmem:[%s4114_s20 + $0x8] sm:$0xff]  ;;  %v4143_v31 = vld [vmem:[%s4114_s20 + $0x10] sm:$0xff]  ;;  %3571 = vmatprep.subr.bf16.mxu0 %v3570_v24  ;;  %v3578_v44 = vpack.c.bf16 %v1352_v39, %v1351_v38 }
  0x18   : > { %569 = vst [vmem:[#allocation2 + $0x19] sm:$0xff] %v4126_v27  ;;  %3182 = vmatprep.mubr.f32.mxu0 %v4126_v27  ;;  %570 = vst [vmem:[#allocation2 + $0x21] sm:$0xff] %v4139_v30  ;;  %v4147_v33 = vld [vmem:[%s4114_s20 + $0x18] sm:$0xff]  ;;  %v4158_v37 = vld [vmem:[%s4114_s20 + $0x20] sm:$0xff]  ;;  %s3904_s19 = scalar_select %p531_p8, 0, 255 }
  0x19   : > { %s4892_s22 = smov (!%p2607_p9, %s455_s22), 15  ;;  %571 = vst [vmem:[#allocation2 + $0x31] sm:$0xff] %v4143_v31  ;;  %572 = vst [vmem:[#allocation2 + $0x39] sm:$0xff] %v4147_v33  ;;  %v4168_v40 = vld [vmem:[%s4114_s20 + $0x28] sm:$0xff]  ;;  %3445 = vmatpush3.bf16.msra.mxu1 %v3442_v23  ;;  %v4175_v41 = vld [vmem:[%s4114_s20 + $0x30] sm:$0xff]  ;;  %p4266_p11 = scmp.lt.s32.totalorder %s2637_s24, 15 }
  0x1a   : > { %s2612_s18 = sshll.u32 %s4892_s22, 1  ;;  %573 = vst [vmem:[#allocation2 + $0x49] sm:$0xff] %v4158_v37  ;;  %574 = vst [vmem:[#allocation2 + $0x51] sm:$0xff] %v4168_v40  ;;  %3573 = vmatpush3.bf16.msra.mxu0 %v3570_v24  ;;  %3447 = vmatprep.subr.bf16.mxu1 %v3446_v32  ;;  %v4182_v43 = vld [vmem:[%s4114_s20 + $0x38] sm:$0xff]  ;;  %v646_v46 = vld [vmem:[%s4872_s3 + $0xe8] sm:$0xff]  ;;  %s4811_s13 = scalar_lea.vmem %s4875_s6, %s2604_s17 }
  0x1b   : > { %s462_s26 = sadd.s32 %s2612_s18, %s4088_s21  ;;  %575 = vst [vmem:[#allocation2 + $0x61] sm:$0xff] %v4175_v41  ;;  %3575 = vmatprep.subr.bf16.mxu0 %v3574_v34  ;;  %576 = vst [vmem:[#allocation2 + $0x69] sm:$0xff] %v4182_v43  ;;  %v4192_v47 = vld [vmem:[%s4114_s20 + $0x40] sm:$0xff]  ;;  %v1354_v49 = vld [vmem:[%s4872_s3 + $0x268] sm:$0xff]  ;;  %v3454_v53 = vpack.c.bf16 %v646_v46, %v645_v45  ;;  %s4894_s24 = smov (!%p4266_p11, %s2637_s24), 15 }
  0x1c   : > { %s2614_s14 = sshll.u32 %s462_s26, 3  ;;  %v1353_v48 = vld [vmem:[%s4872_s3 + $0x260] sm:$0xff]  ;;  %577 = vst [vmem:[#allocation2 + $0x79] sm:$0xff] %v4192_v47  ;;  %v4202_v52 = vld [vmem:[%s4114_s20 + $0x48] sm:$0xff]  ;;  %v4206_v54 = vld [vmem:[%s4114_s20 + $0x50] sm:$0xff]  ;;  %s4896_s24 = smov (!%p4266_p11, %s4894_s24), 15 }
  0x1d   : > { %s464_s23 = scalar_lea.vmem %s4870_s1, %s2614_s14  ;;  %3449 = vmatpush3.bf16.msra.mxu1 %v3446_v32  ;;  %578 = vst [vmem:[#allocation2 + $0x81] sm:$0xff] %v4202_v52  ;;  %v3582_v55 = vpack.c.bf16 %v1354_v49, %v1353_v48  ;;  %v647_v56 = vld [vmem:[%s4872_s3 + $0xf0] sm:$0xff]  ;;  %v648_v57 = vld [vmem:[%s4872_s3 + $0xf8] sm:$0xff]  ;;  %579 = vst [vmem:[#allocation2 + $0x91] sm:$0xff] %v4206_v54  ;;  %s2619_s14 = sshll.u32 %s4896_s24, 1 }
  0x1e   : > { %v3905_v50 = vld [vmem:[%s464_s23] sm:%s3904_s19]  ;;  %v3908_v51 = vld [vmem:[%s464_s23 + $0x8] sm:%s3904_s19]  ;;  %3577 = vmatpush3.bf16.msra.mxu0 %v3574_v34  ;;  %3451 = vmatprep.subr.bf16.mxu1 %v3450_v42  ;;  %v3458_v63 = vpack.c.bf16 %v648_v57, %v647_v56  ;;  %s479_s22 = sadd.s32 %s2619_s14, %s4088_s21  ;;  %p499_p12 = scmp.lt.s32.totalorder %s3937_s27, 1 }
  0x1f   : > { %563 = vst [vmem:[#allocation2 + $0x1] sm:$0xff] %v3905_v50  ;;  %2958 = vmatprep.mubr.f32.mxu1 %v3905_v50  ;;  %564 = vst [vmem:[#allocation2 + $0x9] sm:$0xff] %v3908_v51  ;;  %3579 = vmatprep.subr.bf16.mxu0 %v3578_v44  ;;  %v4216_v58 = vld [vmem:[%s4114_s20 + $0x58] sm:$0xff]  ;;  %v1355_v59 = vld [vmem:[%s4872_s3 + $0x270] sm:$0xff]  ;;  %s2621_s21 = sshll.u32 %s479_s22, 3  ;;  %s2626_s11 = sshll.u32 %s4890_s28, 1 }
  0x20   : > { %v1356_v60 = vld [vmem:[%s4872_s3 + $0x278] sm:$0xff]  ;;  %580 = vst [vmem:[#allocation2 + $0x99] sm:$0xff] %v4216_v58  ;;  %v4226_v61 = vld [vmem:[%s4114_s20 + $0x60] sm:$0xff]  ;;  %v4230_v62 = vld [vmem:[%s4114_s20 + $0x68] sm:$0xff]  ;;  %s481_s25 = scalar_lea.vmem %s4871_s2, %s2621_s21  ;;  %s4898_s27 = smov (!%p499_p12, %s3937_s27), 1 }
  0x21   : > { %3453 = vmatpush3.bf16.msra.mxu1 %v3450_v42  ;;  %581 = vst [vmem:[#allocation2 + $0xa9] sm:$0xff] %v4226_v61  ;;  %582 = vst [vmem:[#allocation2 + $0xb1] sm:$0xff] %v4230_v62  ;;  %v4234_v0 = vld [vmem:[%s4114_s20 + $0x70] sm:$0xff]  ;;  %v3586_v1 = vpack.c.bf16 %v1356_v60, %v1355_v59  ;;  %v601_v2 = vld [vmem:[%s4872_s3] sm:$0xff]  ;;  %s3910_s10 = scalar_select %p537_p10, 0, 255 }
  0x22   : > { %3581 = vmatpush3.bf16.msra.mxu0 %v3578_v44  ;;  %3455 = vmatprep.subr.bf16.mxu1 %v3454_v53  ;;  %v602_v3 = vld [vmem:[%s4872_s3 + $0x8] sm:$0xff]  ;;  %583 = vst [vmem:[#allocation2 + $0xc1] sm:$0xff] %v4234_v0  ;;  %v4244_v4 = vld [vmem:[%s4114_s20 + $0x78] sm:$0xff]  ;;  %v1534_v5 = vld [vmem:[%s4872_s3 + $0x280] sm:$0xff]  ;;  %s502_s17 = sadd.s32 %s2626_s11, %s4898_s27 }
  0x23   : > { %3583 = vmatprep.subr.bf16.mxu0 %v3582_v55  ;;  %v1535_v6 = vld [vmem:[%s4872_s3 + $0x288] sm:$0xff]  ;;  %584 = vst [vmem:[#allocation2 + $0xc9] sm:$0xff] %v4244_v4  ;;  %v3462_v7 = vpack.c.bf16 %v602_v3, %v601_v2  ;;  %v603_v9 = vld [vmem:[%s4872_s3 + $0x10] sm:$0xff]  ;;  %v604_v10 = vld [vmem:[%s4872_s3 + $0x18] sm:$0xff]  ;;  %s503_s15 = scalar_lea.vmem %s4876_s7, %s502_s17  ;;  %s510_s19 = scalar_lea.vmem %s4877_s8, %s502_s17 }
  0x24   : > { %v3590_v8 = vpack.c.bf16 %v1535_v6, %v1534_v5  ;;  %v1536_v11 = vld [vmem:[%s4872_s3 + $0x290] sm:$0xff]  ;;  %v1537_v12 = vld [vmem:[%s4872_s3 + $0x298] sm:$0xff]  ;;  %v3466_v13 = vpack.c.bf16 %v604_v10, %v603_v9  ;;  %v605_v15 = vld [vmem:[%s4872_s3 + $0x20] sm:$0xff] }
  0x25   : > { %3457 = vmatpush3.bf16.msra.mxu1 %v3454_v53  ;;  %v3594_v14 = vpack.c.bf16 %v1537_v12, %v1536_v11  ;;  %v606_v16 = vld [vmem:[%s4872_s3 + $0x28] sm:$0xff]  ;;  %v1538_v17 = vld [vmem:[%s4872_s3 + $0x2a0] sm:$0xff]  ;;  %v607_v21 = vld [vmem:[%s4872_s3 + $0x30] sm:$0xff] }
  0x26   : > { %3585 = vmatpush3.bf16.msra.mxu0 %v3582_v55  ;;  %3459 = vmatprep.subr.bf16.mxu1 %v3458_v63  ;;  %v1539_v18 = vld [vmem:[%s4872_s3 + $0x2a8] sm:$0xff]  ;;  %v3470_v19 = vpack.c.bf16 %v606_v16, %v605_v15  ;;  %v608_v22 = vld [vmem:[%s4872_s3 + $0x38] sm:$0xff]  ;;  %v1540_v23 = vld [vmem:[%s4872_s3 + $0x2b0] sm:$0xff] }
  0x27   : > { %3587 = vmatprep.subr.bf16.mxu0 %v3586_v1  ;;  %v3598_v20 = vpack.c.bf16 %v1539_v18, %v1538_v17  ;;  %v1541_v24 = vld [vmem:[%s4872_s3 + $0x2b8] sm:$0xff]  ;;  %v3474_v25 = vpack.c.bf16 %v608_v22, %v607_v21  ;;  %v610_v28 = vld [vmem:[%s4872_s3 + $0x48] sm:$0xff]  ;;  %v1542_v29 = vld [vmem:[%s4872_s3 + $0x2c0] sm:$0xff] }
  0x28   : > { %v3602_v26 = vpack.c.bf16 %v1541_v24, %v1540_v23  ;;  %v611_v35 = vld [vmem:[%s4872_s3 + $0x50] sm:$0xff]  ;;  %v612_v36 = vld [vmem:[%s4872_s3 + $0x58] sm:$0xff]  ;;  %v613_v45 = vld [vmem:[%s4872_s3 + $0x60] sm:$0xff] }
  0x29   : > { %3461 = vmatpush3.bf16.msra.mxu1 %v3458_v63  ;;  %v1544_v38 = vld [vmem:[%s4872_s3 + $0x2d0] sm:$0xff]  ;;  %v1545_v39 = vld [vmem:[%s4872_s3 + $0x2d8] sm:$0xff]  ;;  %v3482_v42 = vpack.c.bf16 %v612_v36, %v611_v35  ;;  %v614_v46 = vld [vmem:[%s4872_s3 + $0x68] sm:$0xff] }
  0x2a   : > { %3589 = vmatpush3.bf16.msra.mxu0 %v3586_v1  ;;  %3463 = vmatprep.subr.bf16.mxu1 %v3462_v7  ;;  %v3610_v44 = vpack.c.bf16 %v1545_v39, %v1544_v38  ;;  %v1546_v48 = vld [vmem:[%s4872_s3 + $0x2e0] sm:$0xff]  ;;  %v1547_v49 = vld [vmem:[%s4872_s3 + $0x2e8] sm:$0xff]  ;;  %v3486_v50 = vpack.c.bf16 %v614_v46, %v613_v45  ;;  %v615_v53 = vld [vmem:[%s4872_s3 + $0x70] sm:$0xff] }
  0x2b   : > { %3591 = vmatprep.subr.bf16.mxu0 %v3590_v8  ;;  %v616_v55 = vld [vmem:[%s4872_s3 + $0x78] sm:$0xff]  ;;  %v1548_v56 = vld [vmem:[%s4872_s3 + $0x2f0] sm:$0xff]  ;;  %v955_v63 = vld [vmem:[%s4872_s3 + $0x100] sm:$0xff] }
  0x2c   : > { %2959 = vmatmul.mubr.f32.vlgmr.msra.gmra.mrb[0].mxu1 %v3908_v51  ;;  %v3614_v51 = vpack.c.bf16 %v1547_v49, %v1546_v48  ;;  %v1549_v57 = vld [vmem:[%s4872_s3 + $0x2f8] sm:$0xff]  ;;  %v3490_v59 = vpack.c.bf16 %v616_v55, %v615_v53  ;;  %v956_v1 = vld [vmem:[%s4872_s3 + $0x108] sm:$0xff]  ;;  %v4385_v2 = vld [vmem:[%s481_s25] sm:%s3910_s10] }
  0x2d   : > { %3183 = vmatmul.mubr.f32.vlgmr.msra.gmra.mrb[0].mxu0 %v4139_v30  ;;  %3465 = vmatpush3.bf16.msra.mxu1 %v3462_v7  ;;  %v3618_v60 = vpack.c.bf16 %v1549_v57, %v1548_v56  ;;  %v1728_v3 = vld [vmem:[%s4872_s3 + $0x300] sm:$0xff]  ;;  %v1729_v5 = vld [vmem:[%s4872_s3 + $0x308] sm:$0xff]  ;;  %566 = vst [vmem:[#allocation2 + $0xd9] sm:$0xff] %v4385_v2  ;;  %v957_v11 = vld [vmem:[%s4872_s3 + $0x110] sm:$0xff] }
  0x2e   : > { %3593 = vmatpush3.bf16.msra.mxu0 %v3590_v8  ;;  %2961 = vmatprep.mubr.f32.mxu1 %v4126_v27  ;;  %v609_v27 = vld [vmem:[%s4872_s3 + $0x40] sm:$0xff]  ;;  %v4395_v6 = vld [vmem:[%s481_s25 + $0x8] sm:%s3910_s10]  ;;  %v3494_v8 = vpack.c.bf16 %v956_v1, %v955_v63  ;;  %v3622_v10 = vpack.c.bf16 %v1729_v5, %v1728_v3  ;;  %v958_v12 = vld [vmem:[%s4872_s3 + $0x118] sm:$0xff] }
  0x2f   : > { %3185 = vmatprep.mubr.f32.mxu0 %v4143_v31  ;;  %3467 = vmatprep.subr.bf16.mxu1 %v3466_v13  ;;  %v3478_v32 = vpack.c.bf16 %v610_v28, %v609_v27  ;;  %567 = vst [vmem:[#allocation2 + $0xe1] sm:$0xff] %v4395_v6  ;;  %v585_v7 = vld [vmem:[#allocation2] sm:$0xff]  ;;  %v1731_v15 = vld [vmem:[%s4872_s3 + $0x318] sm:$0xff]  ;;  %v3498_v18 = vpack.c.bf16 %v958_v12, %v957_v11  ;;  %v960_v22 = vld [vmem:[%s4872_s3 + $0x128] sm:$0xff] }
  0x30   : > { %2962 = vmatmul.mubr.f32.gmra.mrb[2].mxu1 %v4139_v30  ;;  %3595 = vmatprep.subr.bf16.mxu0 %v3594_v14  ;;  %v1543_v30 = vld [vmem:[%s4872_s3 + $0x2c8] sm:$0xff]  ;;  %v4401_v9 = vld [vmem:[#allocation2 + $0x1a] sm:$0xff]  ;;  %v4442_v27 = vld [vmem:[#allocation2 + $0x30] sm:$0xff] }
  0x31   : > { %3186 = vmatmul.mubr.f32.gmra.mrb[2].mxu0 %v4147_v33  ;;  %3469 = vmatpush3.bf16.msra.mxu1 %v3466_v13  ;;  %v3606_v34 = vpack.c.bf16 %v1543_v30, %v1542_v29  ;;  %v586_v13 = vld [vmem:[#allocation2 + $0x8] sm:$0xff]  ;;  %v4419_v17 = vld [vmem:[#allocation2 + $0x18] sm:$0xff]  ;;  %v959_v21 = vld [vmem:[%s4872_s3 + $0x120] sm:$0xff] }
  0x32   : > { %3597 = vmatpush3.bf16.msra.mxu0 %v3594_v14  ;;  %2964 = vmatprep.mubr.f32.mxu1 %v4143_v31  ;;  %v1730_v14 = vld [vmem:[%s4872_s3 + $0x310] sm:$0xff]  ;;  %v4416_v16 = vld [vmem:[#allocation2 + $0x22] sm:$0xff]  ;;  %v3502_v28 = vpack.c.bf16 %v960_v22, %v959_v21  ;;  %v4454_v35 = vld [vmem:[#allocation2 + $0x38] sm:$0xff] }
  0x33   : > { %3188 = vmatprep.mubr.f32.mxu0 %v4158_v37  ;;  %3471 = vmatprep.subr.bf16.mxu1 %v3470_v19  ;;  %v4430_v23 = vld [vmem:[#allocation2 + $0x20] sm:$0xff]  ;;  %v4445_v29 = vld [vmem:[#allocation2 + $0x4a] sm:$0xff]  ;;  %v1735_v38 = vld [vmem:[%s4872_s3 + $0x338] sm:$0xff] }
  0x34   : > { %2965 = vmatmul.mubr.f32.gmra.mrb[4].mxu1 %v4147_v33  ;;  %3599 = vmatprep.subr.bf16.mxu0 %v3598_v20  ;;  %v1732_v24 = vld [vmem:[%s4872_s3 + $0x320] sm:$0xff]  ;;  %v1734_v36 = vld [vmem:[%s4872_s3 + $0x330] sm:$0xff]  ;;  %v964_v49 = vld [vmem:[%s4872_s3 + $0x148] sm:$0xff] }
  0x35   : > { %3189 = vmatmul.mubr.f32.gmra.mrb[4].mxu0 %v4168_v40  ;;  %3473 = vmatpush3.bf16.msra.mxu1 %v3470_v19  ;;  %v4421_v19 = vld [vmem:[#allocation2 + $0x32] sm:$0xff]  ;;  %v4469_v45 = vld [vmem:[#allocation2 + $0x62] sm:$0xff]  ;;  %v3634_v46 = vpack.c.bf16 %v1735_v38, %v1734_v36  ;;  %v4487_v55 = vld [vmem:[#allocation2 + $0x6a] sm:$0xff] }
  0x36   : > { %3601 = vmatpush3.bf16.msra.mxu0 %v3598_v20  ;;  %2967 = vmatprep.mubr.f32.mxu1 %v4158_v37  ;;  %v3626_v20 = vpack.c.bf16 %v1731_v15, %v1730_v14  ;;  %v4463_v39 = vld [vmem:[#allocation2 + $0x52] sm:$0xff]  ;;  %v963_v48 = vld [vmem:[%s4872_s3 + $0x140] sm:$0xff]  ;;  %v1737_v53 = vld [vmem:[%s4872_s3 + $0x348] sm:$0xff] }
  0x37   : > { %3191 = vmatprep.mubr.f32.mxu0 %v4175_v41  ;;  %3475 = vmatprep.subr.bf16.mxu1 %v3474_v25  ;;  %v4490_v56 = vld [vmem:[#allocation2 + $0x60] sm:$0xff]  ;;  %v3510_v57 = vpack.c.bf16 %v964_v49, %v963_v48  ;;  %v965_v63 = vld [vmem:[%s4872_s3 + $0x150] sm:$0xff]  ;;  %v966_v1 = vld [vmem:[%s4872_s3 + $0x158] sm:$0xff] }
  0x38   : > { %2968 = vmatmul.mubr.f32.gmra.mrb[6].mxu1 %v4168_v40  ;;  %3603 = vmatprep.subr.bf16.mxu0 %v3602_v26  ;;  %v4502_v3 = vld [vmem:[#allocation2 + $0x68] sm:$0xff]  ;;  %v1738_v5 = vld [vmem:[%s4872_s3 + $0x350] sm:$0xff]  ;;  %v3514_v11 = vpack.c.bf16 %v966_v1, %v965_v63  ;;  %v967_v14 = vld [vmem:[%s4872_s3 + $0x160] sm:$0xff] }
  0x39   : > { %3192 = vmatmul.mubr.f32.gmra.mrb[6].mxu0 %v4182_v43  ;;  %3477 = vmatpush3.bf16.msra.mxu1 %v3474_v25  ;;  %v1733_v25 = vld [vmem:[%s4872_s3 + $0x328] sm:$0xff]  ;;  %v4517_v12 = vld [vmem:[#allocation2 + $0x92] sm:$0xff]  ;;  %v4535_v22 = vld [vmem:[#allocation2 + $0x9a] sm:$0xff] }
  0x3a   : > { %3605 = vmatpush3.bf16.msra.mxu0 %v3602_v26  ;;  %2970 = vmatprep.mubr.f32.mxu1 %v4175_v41  ;;  %v4439_v26 = vld [vmem:[#allocation2 + $0x3a] sm:$0xff]  ;;  %v3630_v30 = vpack.c.bf16 %v1733_v25, %v1732_v24  ;;  %v968_v15 = vld [vmem:[%s4872_s3 + $0x168] sm:$0xff]  ;;  %v4538_v24 = vld [vmem:[#allocation2 + $0x90] sm:$0xff] }
  0x3b   : > { %3194 = vmatprep.mubr.f32.mxu0 %v4192_v47  ;;  %3479 = vmatprep.subr.bf16.mxu1 %v3478_v32  ;;  %v1741_v21 = vld [vmem:[%s4872_s3 + $0x368] sm:$0xff]  ;;  %v3518_v25 = vpack.c.bf16 %v968_v15, %v967_v14  ;;  %v4550_v36 = vld [vmem:[#allocation2 + $0x98] sm:$0xff]  ;;  %v1742_v38 = vld [vmem:[%s4872_s3 + $0x370] sm:$0xff] }
  0x3c   : > { %2971 = vmatmul.mubr.f32.gmra.mrb[8].mxu1 %v4182_v43  ;;  %3607 = vmatprep.subr.bf16.mxu0 %v3606_v34  ;;  %v4562_v48 = vld [vmem:[#allocation2 + $0xa8] sm:$0xff]  ;;  %v4574_v63 = vld [vmem:[#allocation2 + $0xb0] sm:$0xff]  ;;  %v1921_v1 = vld [vmem:[%s4872_s3 + $0x380] sm:$0xff] }
  0x3d   : > { %3195 = vmatmul.mubr.f32.gmra.mrb[8].mxu0 %v4202_v52  ;;  %3481 = vmatpush3.bf16.msra.mxu1 %v3478_v32  ;;  %v961_v32 = vld [vmem:[%s4872_s3 + $0x130] sm:$0xff] }
  0x3e   : > { %3609 = vmatpush3.bf16.msra.mxu0 %v3606_v34  ;;  %2973 = vmatprep.mubr.f32.mxu1 %v4192_v47  ;;  %v962_v34 = vld [vmem:[%s4872_s3 + $0x138] sm:$0xff]  ;;  %v1150_v15 = vld [vmem:[%s4872_s3 + $0x190] sm:$0xff] }
  0x3f   : > { %3197 = vmatprep.mubr.f32.mxu0 %v4206_v54  ;;  %3483 = vmatprep.subr.bf16.mxu1 %v3482_v42 }
  0x40   : > { %2974 = vmatmul.mubr.f32.gmra.mrb[10].mxu1 %v4202_v52  ;;  %3611 = vmatprep.subr.bf16.mxu0 %v3610_v44 }
  0x41   : > { %3198 = vmatmul.mubr.f32.gmra.mrb[10].mxu0 %v4216_v58  ;;  %3485 = vmatpush3.bf16.msra.mxu1 %v3482_v42  ;;  %v4466_v42 = vld [vmem:[#allocation2 + $0x48] sm:$0xff] }
  0x42   : > { %3613 = vmatpush3.bf16.msra.mxu0 %v3610_v44  ;;  %2976 = vmatprep.mubr.f32.mxu1 %v4206_v54  ;;  %v3506_v44 = vpack.c.bf16 %v962_v34, %v961_v32  ;;  %v969_v32 = vld [vmem:[%s4872_s3 + $0x170] sm:$0xff]  ;;  %v970_v34 = vld [vmem:[%s4872_s3 + $0x178] sm:$0xff] }
  0x43   : > { %3200 = vmatprep.mubr.f32.mxu0 %v4226_v61  ;;  %3487 = vmatprep.subr.bf16.mxu1 %v3486_v50  ;;  %v3522_v49 = vpack.c.bf16 %v970_v34, %v969_v32 }
  0x44   : > { %2977 = vmatmul.mubr.f32.gmra.mrb[12].mxu1 %v4216_v58  ;;  %3615 = vmatprep.subr.bf16.mxu0 %v3614_v51 }
  0x45   : > { %3201 = vmatmul.mubr.f32.gmra.mrb[12].mxu0 %v4230_v62  ;;  %3489 = vmatpush3.bf16.msra.mxu1 %v3486_v50  ;;  %v4478_v50 = vld [vmem:[#allocation2 + $0x50] sm:$0xff] }
  0x46   : > { %3617 = vmatpush3.bf16.msra.mxu0 %v3614_v51  ;;  %2979 = vmatprep.mubr.f32.mxu1 %v4226_v61  ;;  %v1736_v51 = vld [vmem:[%s4872_s3 + $0x340] sm:$0xff] }
  0x47   : > { %3203 = vmatprep.mubr.f32.mxu0 %v4234_v0  ;;  %3491 = vmatprep.subr.bf16.mxu1 %v3490_v59 }
  0x48   : > { %2980 = vmatmul.mubr.f32.gmra.mrb[14].mxu1 %v4230_v62  ;;  %3619 = vmatprep.subr.bf16.mxu0 %v3618_v60 }
  0x49   : > { %3204 = vmatmul.mubr.f32.gmra.mrb[14].mxu0 %v4244_v4  ;;  %3493 = vmatpush3.bf16.msra.mxu1 %v3490_v59  ;;  %v4493_v59 = vld [vmem:[#allocation2 + $0x7a] sm:$0xff] }
  0x4a   : > { %3621 = vmatpush3.bf16.msra.mxu0 %v3618_v60  ;;  %3014 = vmatprep.mubr.f32.mxu1 %v585_v7  ;;  %v3638_v60 = vpack.c.bf16 %v1737_v53, %v1736_v51  ;;  %v1739_v7 = vld [vmem:[%s4872_s3 + $0x358] sm:$0xff]  ;;  %v4565_v51 = vld [vmem:[#allocation2 + $0xc2] sm:$0xff] }
  0x4b   : > { %3238 = vmatprep.mubr.f32.mxu0 %v4401_v9  ;;  %3495 = vmatprep.subr.bf16.mxu1 %v3494_v8 }
  0x4c   : > { %3015 = vmatmul.mubr.f32.vlgmr.msra.gmra.mrb[0].mxu1 %v586_v13  ;;  %3623 = vmatprep.subr.bf16.mxu0 %v3622_v10  ;;  %v3642_v13 = vpack.c.bf16 %v1739_v7, %v1738_v5  ;;  %v1922_v5 = vld [vmem:[%s4872_s3 + $0x388] sm:$0xff] }
  0x4d   : > { %3239 = vmatmul.mubr.f32.vlgmr.msra.gmra.mrb[0].mxu0 %v4416_v16  ;;  %3497 = vmatpush3.bf16.msra.mxu1 %v3494_v8  ;;  %v4511_v8 = vld [vmem:[#allocation2 + $0x82] sm:$0xff]  ;;  %v4583_v7 = vld [vmem:[#allocation2 + $0xca] sm:$0xff]  ;;  %v3654_v14 = vpack.c.bf16 %v1922_v5, %v1921_v1  ;;  %v1155_v5 = vld [vmem:[%s4872_s3 + $0x1b8] sm:$0xff] }
  0x4e   : > { %3625 = vmatpush3.bf16.msra.mxu0 %v3622_v10  ;;  %3017 = vmatprep.mubr.f32.mxu1 %v4419_v17  ;;  %v4514_v10 = vld [vmem:[#allocation2 + $0x78] sm:$0xff]  ;;  %v1154_v1 = vld [vmem:[%s4872_s3 + $0x1b0] sm:$0xff] }
  0x4f   : > { %3241 = vmatprep.mubr.f32.mxu0 %v4421_v19  ;;  %3499 = vmatprep.subr.bf16.mxu1 %v3498_v18 }
  0x50   : > { %3018 = vmatmul.mubr.f32.gmra.mrb[2].mxu1 %v4430_v23  ;;  %3627 = vmatprep.subr.bf16.mxu0 %v3626_v20 }
  0x51   : > { %3242 = vmatmul.mubr.f32.gmra.mrb[2].mxu0 %v4439_v26  ;;  %3501 = vmatpush3.bf16.msra.mxu1 %v3498_v18  ;;  %v4526_v18 = vld [vmem:[#allocation2 + $0x80] sm:$0xff] }
  0x52   : > { %3629 = vmatpush3.bf16.msra.mxu0 %v3626_v20  ;;  %3020 = vmatprep.mubr.f32.mxu1 %v4442_v27  ;;  %v1740_v20 = vld [vmem:[%s4872_s3 + $0x360] sm:$0xff] }
  0x53   : > { %3244 = vmatprep.mubr.f32.mxu0 %v4445_v29  ;;  %3503 = vmatprep.subr.bf16.mxu1 %v3502_v28 }
  0x54   : > { %3021 = vmatmul.mubr.f32.gmra.mrb[4].mxu1 %v4454_v35  ;;  %3631 = vmatprep.subr.bf16.mxu0 %v3630_v30 }
  0x55   : > { %3245 = vmatmul.mubr.f32.gmra.mrb[4].mxu0 %v4463_v39  ;;  %3505 = vmatpush3.bf16.msra.mxu1 %v3502_v28  ;;  %v4541_v28 = vld [vmem:[#allocation2 + $0xaa] sm:$0xff] }
  0x56   : > { %3633 = vmatpush3.bf16.msra.mxu0 %v3630_v30  ;;  %3023 = vmatprep.mubr.f32.mxu1 %v4466_v42  ;;  %v3646_v30 = vpack.c.bf16 %v1741_v21, %v1740_v20  ;;  %v1151_v20 = vld [vmem:[%s4872_s3 + $0x198] sm:$0xff]  ;;  %v940_v21 = vld [vmem:[#allocation2 + $0xa] sm:$0xff] }
  0x57   : > { %3247 = vmatprep.mubr.f32.mxu0 %v4469_v45  ;;  %3507 = vmatprep.subr.bf16.mxu1 %v3506_v44  ;;  %v3530_v32 = vpack.c.bf16 %v1151_v20, %v1150_v15  ;;  %v1157_v15 = vld [vmem:[%s4872_s3 + $0x1c8] sm:$0xff]  ;;  %v1929_v20 = vld [vmem:[%s4872_s3 + $0x3c0] sm:$0xff] }
  0x58   : > { %3024 = vmatmul.mubr.f32.gmra.mrb[6].mxu1 %v4478_v50  ;;  %3635 = vmatprep.subr.bf16.mxu0 %v3634_v46 }
  0x59   : > { %3248 = vmatmul.mubr.f32.gmra.mrb[6].mxu0 %v4487_v55  ;;  %3509 = vmatpush3.bf16.msra.mxu1 %v3506_v44  ;;  %v1743_v44 = vld [vmem:[%s4872_s3 + $0x378] sm:$0xff] }
  0x5a   : > { %3637 = vmatpush3.bf16.msra.mxu0 %v3634_v46  ;;  %3026 = vmatprep.mubr.f32.mxu1 %v4490_v56  ;;  %v4559_v46 = vld [vmem:[#allocation2 + $0xb2] sm:$0xff]  ;;  %v3650_v53 = vpack.c.bf16 %v1743_v44, %v1742_v38  ;;  %v1152_v38 = vld [vmem:[%s4872_s3 + $0x1a0] sm:$0xff]  ;;  %v1153_v44 = vld [vmem:[%s4872_s3 + $0x1a8] sm:$0xff] }
  0x5b   : > { %3250 = vmatprep.mubr.f32.mxu0 %v4493_v59  ;;  %3511 = vmatprep.subr.bf16.mxu1 %v3510_v57 }
  0x5c   : > { %3027 = vmatmul.mubr.f32.gmra.mrb[8].mxu1 %v4502_v3  ;;  %3639 = vmatprep.subr.bf16.mxu0 %v3638_v60 }
  0x5d   : > { %3251 = vmatmul.mubr.f32.gmra.mrb[8].mxu0 %v4511_v8  ;;  %3513 = vmatpush3.bf16.msra.mxu1 %v3510_v57  ;;  %v1148_v57 = vld [vmem:[%s4872_s3 + $0x180] sm:$0xff] }
  0x5e   : > { %3641 = vmatpush3.bf16.msra.mxu0 %v3638_v60  ;;  %3029 = vmatprep.mubr.f32.mxu1 %v4514_v10  ;;  %v1149_v60 = vld [vmem:[%s4872_s3 + $0x188] sm:$0xff] }
  0x5f   : > { %3253 = vmatprep.mubr.f32.mxu0 %v4517_v12  ;;  %3515 = vmatprep.subr.bf16.mxu1 %v3514_v11 }
  0x60   : > { %3030 = vmatmul.mubr.f32.gmra.mrb[10].mxu1 %v4526_v18  ;;  %3643 = vmatprep.subr.bf16.mxu0 %v3642_v13 }
  0x61   : > { %3254 = vmatmul.mubr.f32.gmra.mrb[10].mxu0 %v4535_v22  ;;  %3517 = vmatpush3.bf16.msra.mxu1 %v3514_v11  ;;  %v939_v11 = vld [vmem:[#allocation2 + $0x2] sm:$0xff] }
  0x62   : > { %3645 = vmatpush3.bf16.msra.mxu0 %v3642_v13  ;;  %3032 = vmatprep.mubr.f32.mxu1 %v4538_v24  ;;  %v3526_v13 = vpack.c.bf16 %v1149_v60, %v1148_v57  ;;  %v3534_v57 = vpack.c.bf16 %v1153_v44, %v1152_v38  ;;  %v1931_v38 = vld [vmem:[%s4872_s3 + $0x3d0] sm:$0xff]  ;;  %v1932_v44 = vld [vmem:[%s4872_s3 + $0x3d8] sm:$0xff] }
  0x63   : > { %3256 = vmatprep.mubr.f32.mxu0 %v4541_v28  ;;  %3519 = vmatprep.subr.bf16.mxu1 %v3518_v25 }
  0x64   : > { %3033 = vmatmul.mubr.f32.gmra.mrb[12].mxu1 %v4550_v36  ;;  %3647 = vmatprep.subr.bf16.mxu0 %v3646_v30 }
  0x65   : > { %3257 = vmatmul.mubr.f32.gmra.mrb[12].mxu0 %v4559_v46  ;;  %3521 = vmatpush3.bf16.msra.mxu1 %v3518_v25  ;;  %v1923_v25 = vld [vmem:[%s4872_s3 + $0x390] sm:$0xff] }
  0x66   : > { %3649 = vmatpush3.bf16.msra.mxu0 %v3646_v30  ;;  %3035 = vmatprep.mubr.f32.mxu1 %v4562_v48  ;;  %v1924_v30 = vld [vmem:[%s4872_s3 + $0x398] sm:$0xff] }
  0x67   : > { %3259 = vmatprep.mubr.f32.mxu0 %v4565_v51  ;;  %3523 = vmatprep.subr.bf16.mxu1 %v3522_v49  ;;  %v3658_v34 = vpack.c.bf16 %v1924_v30, %v1923_v25 }
  0x68   : > { %3036 = vmatmul.mubr.f32.gmra.mrb[14].mxu1 %v4574_v63  ;;  %3651 = vmatprep.subr.bf16.mxu0 %v3650_v53 }
  0x69   : > { %3260 = vmatmul.mubr.f32.gmra.mrb[14].mxu0 %v4583_v7  ;;  %3525 = vmatpush3.bf16.msra.mxu1 %v3522_v49  ;;  %v1925_v49 = vld [vmem:[%s4872_s3 + $0x3a0] sm:$0xff] }
  0x6a   : > { %3653 = vmatpush3.bf16.msra.mxu0 %v3650_v53  ;;  %3070 = vmatprep.mubr.f32.mxu1 %v939_v11  ;;  %v1926_v53 = vld [vmem:[%s4872_s3 + $0x3a8] sm:$0xff]  ;;  %v3538_v11 = vpack.c.bf16 %v1155_v5, %v1154_v1  ;;  %v1933_v1 = vld [vmem:[%s4872_s3 + $0x3e0] sm:$0xff] }
  0x6b   : > { %3294 = vmatprep.mubr.f32.mxu0 %v4442_v27  ;;  %3527 = vmatprep.subr.bf16.mxu1 %v3526_v13  ;;  %v3662_v60 = vpack.c.bf16 %v1926_v53, %v1925_v49  ;;  %v3674_v53 = vpack.c.bf16 %v1932_v44, %v1931_v38  ;;  %v1934_v5 = vld [vmem:[%s4872_s3 + $0x3e8] sm:$0xff]  ;;  %v1727_v44 = vld [vmem:[#allocation2 + $0xe0] sm:$0xff] }
  0x6c   : > { %3071 = vmatmul.mubr.f32.vlgmr.msra.gmra.mrb[0].mxu1 %v940_v21  ;;  %3655 = vmatprep.subr.bf16.mxu0 %v3654_v14  ;;  %v1930_v21 = vld [vmem:[%s4872_s3 + $0x3c8] sm:$0xff] }
  0x6d   : > { %3295 = vmatmul.mubr.f32.vlgmr.msra.gmra.mrb[0].mxu0 %v4454_v35  ;;  %3529 = vmatpush3.bf16.msra.mxu1 %v3526_v13  ;;  %v3670_v30 = vpack.c.bf16 %v1930_v21, %v1929_v20  ;;  %v1936_v20 = vld [vmem:[%s4872_s3 + $0x3f8] sm:$0xff]  ;;  %v4697_v21 = vld [vmem:[#allocation2 + $0xc8] sm:$0xff] }
  0x6e   : > { %3657 = vmatpush3.bf16.msra.mxu0 %v3654_v14  ;;  %3073 = vmatprep.mubr.f32.mxu1 %v4401_v9  ;;  %v1927_v9 = vld [vmem:[%s4872_s3 + $0x3b0] sm:$0xff]  ;;  %v1156_v14 = vld [vmem:[%s4872_s3 + $0x1c0] sm:$0xff]  ;;  %v2115_v38 = vld [vmem:[%s4872_s3 + $0x408] sm:$0xff] }
  0x6f   : > { %3297 = vmatprep.mubr.f32.mxu0 %v4466_v42  ;;  %3531 = vmatprep.subr.bf16.mxu1 %v3530_v32  ;;  %v3542_v25 = vpack.c.bf16 %v1157_v15, %v1156_v14  ;;  %v1163_v14 = vld [vmem:[%s4872_s3 + $0x1f8] sm:$0xff]  ;;  %v1935_v15 = vld [vmem:[%s4872_s3 + $0x3f0] sm:$0xff] }
  0x70   : > { %3074 = vmatmul.mubr.f32.gmra.mrb[2].mxu1 %v4416_v16  ;;  %3659 = vmatprep.subr.bf16.mxu0 %v3658_v34  ;;  %v1928_v16 = vld [vmem:[%s4872_s3 + $0x3b8] sm:$0xff] }
  0x71   : > { %3298 = vmatmul.mubr.f32.gmra.mrb[2].mxu0 %v4478_v50  ;;  %3533 = vmatpush3.bf16.msra.mxu1 %v3530_v32  ;;  %v3666_v13 = vpack.c.bf16 %v1928_v16, %v1927_v9  ;;  %v1158_v32 = vld [vmem:[%s4872_s3 + $0x1d0] sm:$0xff]  ;;  %v4681_v16 = vld [vmem:[#allocation2 + $0xc0] sm:$0xff] }
  0x72   : > { %3661 = vmatpush3.bf16.msra.mxu0 %v3658_v34  ;;  %3076 = vmatprep.mubr.f32.mxu1 %v4421_v19  ;;  %v1159_v34 = vld [vmem:[%s4872_s3 + $0x1d8] sm:$0xff] }
  0x73   : > { %3300 = vmatprep.mubr.f32.mxu0 %v4490_v56  ;;  %3535 = vmatprep.subr.bf16.mxu1 %v3534_v57  ;;  %v3546_v49 = vpack.c.bf16 %v1159_v34, %v1158_v32  ;;  %v3682_v32 = vpack.c.bf16 %v1936_v20, %v1935_v15  ;;  %v2114_v34 = vld [vmem:[%s4872_s3 + $0x400] sm:$0xff] }
  0x74   : > { %3077 = vmatmul.mubr.f32.gmra.mrb[4].mxu1 %v4439_v26  ;;  %3663 = vmatprep.subr.bf16.mxu0 %v3662_v60 }
  0x75   : > { %3301 = vmatmul.mubr.f32.gmra.mrb[4].mxu0 %v4502_v3  ;;  %3537 = vmatpush3.bf16.msra.mxu1 %v3534_v57  ;;  %v1160_v57 = vld [vmem:[%s4872_s3 + $0x1e0] sm:$0xff] }
  0x76   : > { %3665 = vmatpush3.bf16.msra.mxu0 %v3662_v60  ;;  %3079 = vmatprep.mubr.f32.mxu1 %v4445_v29  ;;  %v1161_v60 = vld [vmem:[%s4872_s3 + $0x1e8] sm:$0xff] }
  0x77   : > { %3303 = vmatprep.mubr.f32.mxu0 %v4514_v10  ;;  %3539 = vmatprep.subr.bf16.mxu1 %v3538_v11  ;;  %v3550_v9 = vpack.c.bf16 %v1161_v60, %v1160_v57  ;;  %v2117_v57 = vld [vmem:[%s4872_s3 + $0x418] sm:$0xff] }
  0x78   : > { %3080 = vmatmul.mubr.f32.gmra.mrb[6].mxu1 %v4463_v39  ;;  %3667 = vmatprep.subr.bf16.mxu0 %v3666_v13 }
  0x79   : > { %3304 = vmatmul.mubr.f32.gmra.mrb[6].mxu0 %v4526_v18  ;;  %3541 = vmatpush3.bf16.msra.mxu1 %v3538_v11  ;;  %v3678_v11 = vpack.c.bf16 %v1934_v5, %v1933_v1  ;;  %v2118_v1 = vld [vmem:[%s4872_s3 + $0x420] sm:$0xff]  ;;  %v2119_v5 = vld [vmem:[%s4872_s3 + $0x428] sm:$0xff] }
  0x7a   : > { %3669 = vmatpush3.bf16.msra.mxu0 %v3666_v13  ;;  %3082 = vmatprep.mubr.f32.mxu1 %v4469_v45  ;;  %v1162_v13 = vld [vmem:[%s4872_s3 + $0x1f0] sm:$0xff] }
  0x7b   : > { %3306 = vmatprep.mubr.f32.mxu0 %v4538_v24  ;;  %3543 = vmatprep.subr.bf16.mxu1 %v3542_v25 }
  0x7c   : > { %3083 = vmatmul.mubr.f32.gmra.mrb[8].mxu1 %v4487_v55  ;;  %3671 = vmatprep.subr.bf16.mxu0 %v3670_v30 }
  0x7d   : > { %3307 = vmatmul.mubr.f32.gmra.mrb[8].mxu0 %v4550_v36  ;;  %3545 = vmatpush3.bf16.msra.mxu1 %v3542_v25  ;;  %v3554_v25 = vpack.c.bf16 %v1163_v14, %v1162_v13 }
  0x7e   : > { %3673 = vmatpush3.bf16.msra.mxu0 %v3670_v30  ;;  %3085 = vmatprep.mubr.f32.mxu1 %v4493_v59  ;;  %v1726_v30 = vld [vmem:[#allocation2 + $0xd8] sm:$0xff] }
  0x7f   : > { %3309 = vmatprep.mubr.f32.mxu0 %v4562_v48  ;;  %3547 = vmatprep.subr.bf16.mxu1 %v3546_v49 }
  0x80   : > { %3086 = vmatmul.mubr.f32.gmra.mrb[10].mxu1 %v4511_v8  ;;  %3675 = vmatprep.subr.bf16.mxu0 %v3674_v53 }
  0x81   : > { %3310 = vmatmul.mubr.f32.gmra.mrb[10].mxu0 %v4574_v63  ;;  %3549 = vmatpush3.bf16.msra.mxu1 %v3546_v49  ;;  %v3686_v49 = vpack.c.bf16 %v2115_v38, %v2114_v34 }
  0x82   : > { %3677 = vmatpush3.bf16.msra.mxu0 %v3674_v53  ;;  %3088 = vmatprep.mubr.f32.mxu1 %v4517_v12  ;;  %v2116_v53 = vld [vmem:[%s4872_s3 + $0x410] sm:$0xff] }
  0x83   : > { %3312 = vmatprep.mubr.f32.mxu0 %v4681_v16  ;;  %3551 = vmatprep.subr.bf16.mxu1 %v3550_v9  ;;  %v3690_v60 = vpack.c.bf16 %v2117_v57, %v2116_v53 }
  0x84   : > { %3089 = vmatmul.mubr.f32.gmra.mrb[12].mxu1 %v4535_v22  ;;  %3679 = vmatprep.subr.bf16.mxu0 %v3678_v11 }
  0x85   : > { %3313 = vmatmul.mubr.f32.gmra.mrb[12].mxu0 %v4697_v21  ;;  %3553 = vmatpush3.bf16.msra.mxu1 %v3550_v9 }
  0x86   : > { %3681 = vmatpush3.bf16.msra.mxu0 %v3678_v11  ;;  %3091 = vmatprep.mubr.f32.mxu1 %v4541_v28 }
  0x87   : > { %3315 = vmatprep.mubr.f32.mxu0 %v1726_v30  ;;  %3555 = vmatprep.subr.bf16.mxu1 %v3554_v25 }
  0x88   : > { %3092 = vmatmul.mubr.f32.gmra.mrb[14].mxu1 %v4559_v46  ;;  %3683 = vmatprep.subr.bf16.mxu0 %v3682_v32 }
  0x89   : > { %3316 = vmatmul.mubr.f32.gmra.mrb[14].mxu0 %v1727_v44  ;;  %3557 = vmatpush3.bf16.msra.mxu1 %v3554_v25 }
  0x8a   : > { %3685 = vmatpush3.bf16.msra.mxu0 %v3682_v32  ;;  %3126 = vmatprep.mubr.f32.mxu1 %v4419_v17  ;;  %v2120_v17 = vld [vmem:[%s4872_s3 + $0x430] sm:$0xff] }
  0x8b   : > { %3350 = vmatprep.mubr.f32.mxu0 %v4143_v31  ;;  %3687 = vmatprep.subr.bf16.mxu0 %v3686_v49  ;;  %v3694_v31 = vpack.c.bf16 %v2119_v5, %v2118_v1 }
  0x8c   : > { %3127 = vmatmul.mubr.f32.vlgmr.msra.gmra.mrb[0].mxu1 %v4430_v23  ;;  %3718 = vmatprep.subr.bf16.mxu1 %v3686_v49  ;;  %v2121_v23 = vld [vmem:[%s4872_s3 + $0x438] sm:$0xff] }
  0x8d   : > { %3351 = vmatmul.mubr.f32.vlgmr.msra.gmra.mrb[0].mxu0 %v4147_v33  ;;  %3726 = vmatpush3.bf16.msra.mxu1 %v3686_v49  ;;  %v3698_v33 = vpack.c.bf16 %v2121_v23, %v2120_v17 }
  0x8e   : > { %3689 = vmatpush3.bf16.msra.mxu0 %v3686_v49  ;;  %3129 = vmatprep.mubr.f32.mxu1 %v4442_v27  ;;  %v2123_v27 = vld [vmem:[%s4872_s3 + $0x448] sm:$0xff] }
  0x8f   : > { %3353 = vmatprep.mubr.f32.mxu0 %v4158_v37  ;;  %3691 = vmatprep.subr.bf16.mxu0 %v3690_v60  ;;  %v2122_v37 = vld [vmem:[%s4872_s3 + $0x440] sm:$0xff] }
  0x90   : > { %3130 = vmatmul.mubr.f32.gmra.mrb[2].mxu1 %v4454_v35  ;;  %3719 = vmatprep.subr.bf16.mxu1 %v3690_v60  ;;  %v2125_v35 = vld [vmem:[%s4872_s3 + $0x458] sm:$0xff] }
  0x91   : > { %3354 = vmatmul.mubr.f32.gmra.mrb[2].mxu0 %v4168_v40  ;;  %3727 = vmatpush3.bf16.msra.mxu1 %v3690_v60  ;;  %v3702_v40 = vpack.c.bf16 %v2123_v27, %v2122_v37 }
  0x92   : > { %3693 = vmatpush3.bf16.msra.mxu0 %v3690_v60  ;;  %3132 = vmatprep.mubr.f32.mxu1 %v4466_v42  ;;  %v2127_v42 = vld [vmem:[%s4872_s3 + $0x468] sm:$0xff] }
  0x93   : > { %3356 = vmatprep.mubr.f32.mxu0 %v4175_v41  ;;  %3695 = vmatprep.subr.bf16.mxu0 %v3694_v31  ;;  %v2124_v41 = vld [vmem:[%s4872_s3 + $0x450] sm:$0xff] }
  0x94   : > { %3133 = vmatmul.mubr.f32.gmra.mrb[4].mxu1 %v4478_v50  ;;  %3720 = vmatprep.subr.bf16.mxu1 %v3694_v31  ;;  %v2129_v50 = vld [vmem:[%s4872_s3 + $0x478] sm:$0xff] }
  0x95   : > { %3357 = vmatmul.mubr.f32.gmra.mrb[4].mxu0 %v4182_v43  ;;  %3728 = vmatpush3.bf16.msra.mxu1 %v3694_v31  ;;  %v3706_v43 = vpack.c.bf16 %v2125_v35, %v2124_v41 }
  0x96   : > { %3697 = vmatpush3.bf16.msra.mxu0 %v3694_v31  ;;  %3135 = vmatprep.mubr.f32.mxu1 %v4490_v56 }
  0x97   : > { %3359 = vmatprep.mubr.f32.mxu0 %v4192_v47  ;;  %3699 = vmatprep.subr.bf16.mxu0 %v3698_v33  ;;  %v2126_v47 = vld [vmem:[%s4872_s3 + $0x460] sm:$0xff] }
  0x98   : > { %3136 = vmatmul.mubr.f32.gmra.mrb[6].mxu1 %v4502_v3  ;;  %3721 = vmatprep.subr.bf16.mxu1 %v3698_v33 }
  0x99   : > { %3360 = vmatmul.mubr.f32.gmra.mrb[6].mxu0 %v4202_v52  ;;  %3729 = vmatpush3.bf16.msra.mxu1 %v3698_v33  ;;  %v3710_v52 = vpack.c.bf16 %v2127_v42, %v2126_v47 }
  0x9a   : > { %3701 = vmatpush3.bf16.msra.mxu0 %v3698_v33  ;;  %3138 = vmatprep.mubr.f32.mxu1 %v4514_v10 }
  0x9b   : > { %3362 = vmatprep.mubr.f32.mxu0 %v4206_v54  ;;  %3703 = vmatprep.subr.bf16.mxu0 %v3702_v40  ;;  %v2128_v54 = vld [vmem:[%s4872_s3 + $0x470] sm:$0xff] }
  0x9c   : > { %3139 = vmatmul.mubr.f32.gmra.mrb[8].mxu1 %v4526_v18  ;;  %3722 = vmatprep.subr.bf16.mxu1 %v3702_v40 }
  0x9d   : > { %3363 = vmatmul.mubr.f32.gmra.mrb[8].mxu0 %v4216_v58  ;;  %3730 = vmatpush3.bf16.msra.mxu1 %v3702_v40  ;;  %v3714_v58 = vpack.c.bf16 %v2129_v50, %v2128_v54 }
  0x9e   : > { %3705 = vmatpush3.bf16.msra.mxu0 %v3702_v40  ;;  %3141 = vmatprep.mubr.f32.mxu1 %v4538_v24 }
  0x9f   : > { %3365 = vmatprep.mubr.f32.mxu0 %v4226_v61  ;;  %3707 = vmatprep.subr.bf16.mxu0 %v3706_v43  ;;  %v2112_v61 = vld [vmem:[#allocation2 + $0xda] sm:$0xff] }
  0xa0   : > { %3142 = vmatmul.mubr.f32.gmra.mrb[10].mxu1 %v4550_v36  ;;  %3723 = vmatprep.subr.bf16.mxu1 %v3706_v43 }
  0xa1   : > { %3366 = vmatmul.mubr.f32.gmra.mrb[10].mxu0 %v4230_v62  ;;  %3731 = vmatpush3.bf16.msra.mxu1 %v3706_v43  ;;  %v2113_v62 = vld [vmem:[#allocation2 + $0xe2] sm:$0xff] }
  0xa2   : > { %3709 = vmatpush3.bf16.msra.mxu0 %v3706_v43  ;;  %3144 = vmatprep.mubr.f32.mxu1 %v4562_v48 }
  0xa3   : > { %3368 = vmatprep.mubr.f32.mxu0 %v4234_v0  ;;  %3711 = vmatprep.subr.bf16.mxu0 %v3710_v52 }
  0xa4   : > { %3145 = vmatmul.mubr.f32.gmra.mrb[12].mxu1 %v4574_v63  ;;  %3724 = vmatprep.subr.bf16.mxu1 %v3710_v52 }
  0xa5   : > { %3369 = vmatmul.mubr.f32.gmra.mrb[12].mxu0 %v4244_v4  ;;  %3732 = vmatpush3.bf16.msra.mxu1 %v3710_v52 }
  0xa6   : > { %3713 = vmatpush3.bf16.msra.mxu0 %v3710_v52  ;;  %3147 = vmatprep.mubr.f32.mxu1 %v4681_v16 }
  0xa7   : > { %3371 = vmatprep.mubr.f32.mxu0 %v4385_v2  ;;  %3715 = vmatprep.subr.bf16.mxu0 %v3714_v58 }
  0xa8   : > { %3148 = vmatmul.mubr.f32.gmra.mrb[14].mxu1 %v4697_v21  ;;  %3725 = vmatprep.subr.bf16.mxu1 %v3714_v58 }
  0xa9   : > { %3372 = vmatmul.mubr.f32.gmra.mrb[14].mxu0 %v4395_v6  ;;  %3733 = vmatpush3.bf16.msra.mxu1 %v3714_v58 }
  0xaa   : > { %3717 = vmatpush3.bf16.msra.mxu0 %v3714_v58  ;;  %3406 = vmatprep.mubr.f32.mxu0 %v4421_v19 }
  0xab   : > { %3418 = vmatprep.mubr.f32.mxu1 %v4517_v12 }
  0xac   : > { %3419 = vmatmul.mubr.f32.vlgmr.msra.gmra.mrb[16].mxu1 %v4535_v22 }
  0xad   : > { %3407 = vmatmul.mubr.f32.vlgmr.msra.gmra.mrb[0].mxu0 %v4439_v26  ;;  %3421 = vmatprep.mubr.f32.mxu1 %v4541_v28 }
  0xae   : > { %3409 = vmatprep.mubr.f32.mxu0 %v4445_v29 }
  0xb0   : > { %3422 = vmatmul.mubr.f32.gmra.mrb[18].mxu1 %v4559_v46 }
  0xb1   : > { %3410 = vmatmul.mubr.f32.gmra.mrb[2].mxu0 %v4463_v39  ;;  %3424 = vmatprep.mubr.f32.mxu1 %v4565_v51 }
  0xb2   : > { %3412 = vmatprep.mubr.f32.mxu0 %v4469_v45 }
  0xb4   : > { %3425 = vmatmul.mubr.f32.gmra.mrb[20].mxu1 %v4583_v7 }
  0xb5   : > { %3413 = vmatmul.mubr.f32.gmra.mrb[4].mxu0 %v4487_v55  ;;  %3427 = vmatprep.mubr.f32.mxu1 %v2112_v61 }
  0xb6   : > { %3415 = vmatprep.mubr.f32.mxu0 %v4493_v59 }
  0xb8   : > { %3428 = vmatmul.mubr.f32.gmra.mrb[22].mxu1 %v2113_v62 }
  0xb9   : > { %3416 = vmatmul.mubr.f32.gmra.mrb[6].mxu0 %v4511_v8 }
 0x15f   : > { %v3128_v0 = vpop.f32.mrb[0].mxu1 }
 0x160   : > { %v1230_v4 = vpop.f32.mrb[1].mxu1 }
 0x163   : > { %v3131_v2 = vpop.f32.mrb[2].mxu1 }
 0x164   : > { %v1240_v6 = vpop.f32.mrb[3].mxu1 }
 0x167   : > { %v4798_v19 = vpop.f32.mrb[4].mxu1 }
 0x168   : > { %v4800_v26 = vpop.f32.mrb[5].mxu1 }
 0x16b   : > { %v4802_v29 = vpop.f32.mrb[6].mxu1 }
 0x16c   : > { %v4804_v39 = vpop.f32.mrb[7].mxu1 }
 0x16f   : > { %v3140_v45 = vpop.f32.mrb[8].mxu1 }
 0x170   : > { %v3364_v55 = vpop.f32.mrb[8].mxu0  ;;  %v1270_v56 = vpop.f32.mrb[9].mxu1 }
 0x171   : > { %v3742_v3 = vadd.f32 %v3364_v55, %v3140_v45  ;;  %v2043_v59 = vpop.f32.mrb[9].mxu0 }
 0x172   : > { %v3744_v10 = vadd.f32 %v2043_v59, %v1270_v56 }
 0x173   : > { %v3143_v12 = vpop.f32.mrb[10].mxu1 }
 0x174   : > { %v3367_v8 = vpop.f32.mrb[10].mxu0  ;;  %v1280_v18 = vpop.f32.mrb[11].mxu1 }
 0x175   : > { %v3746_v22 = vadd.f32 %v3367_v8, %v3143_v12  ;;  %v2053_v24 = vpop.f32.mrb[11].mxu0 }
 0x176   : > { %v3748_v28 = vadd.f32 %v2053_v24, %v1280_v18 }
 0x177   : > { %v3146_v36 = vpop.f32.mrb[12].mxu1 }
 0x178   : > { %v3370_v46 = vpop.f32.mrb[12].mxu0  ;;  %v1290_v48 = vpop.f32.mrb[13].mxu1 }
 0x179   : > { %v3750_v51 = vadd.f32 %v3370_v46, %v3146_v36  ;;  %v2063_v63 = vpop.f32.mrb[13].mxu0 }
 0x17a   : > { %v3752_v7 = vadd.f32 %v2063_v63, %v1290_v48 }
 0x17b   : > { %v3149_v9 = vpop.f32.mrb[14].mxu1 }
 0x17c   : > { %v3373_v16 = vpop.f32.mrb[14].mxu0  ;;  %v1300_v11 = vpop.f32.mrb[15].mxu1 }
 0x17d   : > { %v3754_v13 = vadd.f32 %v3373_v16, %v3149_v9  ;;  %v2073_v14 = vpop.f32.mrb[15].mxu0 }
 0x17e   : > { %v3756_v15 = vadd.f32 %v2073_v14, %v1300_v11 }
 0x17f   : > { %v3420_v20 = vpop.f32.mrb[16].mxu1 }
 0x180   : > { %v3408_v21 = vpop.f32.mrb[0].mxu0  ;;  %v4813_v25 = vadd.f32 %v3742_v3, %v3420_v20  ;;  %v2236_v30 = vpop.f32.mrb[17].mxu1 }
 0x181   : > { %v3734_v32 = vadd.f32 %v3408_v21, %v3128_v0  ;;  %v2196_v34 = vpop.f32.mrb[1].mxu0  ;;  %v4815_v38 = vadd.f32 %v3744_v10, %v2236_v30 }
 0x182   : > { %2300 = vst [vmem:[%s4811_s13 + $0x48] sm:$0xff] %v4813_v25  ;;  %v3735_v44 = vadd.f32 %v2196_v34, %v1230_v4 }
 0x183   : > { %2292 = vst [vmem:[%s4811_s13 + $0x8] sm:$0xff] %v3734_v32  ;;  %v2330_v49 = vmul.f32 %v3734_v32, %v3734_v32  ;;  %2299 = vst [vmem:[%s4811_s13 + $0x40] sm:$0xff] %v4815_v38  ;;  %v3423_v53 = vpop.f32.mrb[18].mxu1 }
 0x184   : > { %2291 = vst [vmem:[%s4811_s13] sm:$0xff] %v3735_v44  ;;  %v2307_v57 = vadd.f32 %v3735_v44, %v3734_v32  ;;  %v2329_v60 = vmul.f32 %v3735_v44, %v3735_v44  ;;  %v3411_v1 = vpop.f32.mrb[2].mxu0  ;;  %v3747_v5 = vadd.f32 %v3746_v22, %v3423_v53  ;;  %v2246_v31 = vpop.f32.mrb[19].mxu1 }
 0x185   : > { %v3736_v17 = vadd.f32 %v3411_v1, %v3131_v2  ;;  %v2206_v23 = vpop.f32.mrb[3].mxu0  ;;  %v3749_v33 = vadd.f32 %v3748_v28, %v2246_v31 }
 0x186   : > { %v2345_v37 = vadd.f32 %v2330_v49, %v2329_v60  ;;  %2302 = vst [vmem:[%s4811_s13 + $0x58] sm:$0xff] %v3747_v5  ;;  %v3737_v27 = vadd.f32 %v2206_v23, %v1240_v6  ;;  %v2340_v14 = vmul.f32 %v3747_v5, %v3747_v5 }
 0x187   : > { %2294 = vst [vmem:[%s4811_s13 + $0x18] sm:$0xff] %v3736_v17  ;;  %2301 = vst [vmem:[%s4811_s13 + $0x50] sm:$0xff] %v3749_v33  ;;  %v3426_v40 = vpop.f32.mrb[20].mxu1  ;;  %v2332_v58 = vmul.f32 %v3736_v17, %v3736_v17  ;;  %v2339_v16 = vmul.f32 %v3749_v33, %v3749_v33 }
 0x188   : > { %2293 = vst [vmem:[%s4811_s13 + $0x10] sm:$0xff] %v3737_v27  ;;  %v2308_v41 = vadd.f32 %v3737_v27, %v2307_v57  ;;  %v2331_v35 = vmul.f32 %v3737_v27, %v3737_v27  ;;  %v3414_v43 = vpop.f32.mrb[4].mxu0  ;;  %v3751_v47 = vadd.f32 %v3750_v51, %v3426_v40  ;;  %v2256_v42 = vpop.f32.mrb[21].mxu1 }
 0x189   : > { %v3738_v52 = vadd.f32 %v3414_v43, %v4798_v19  ;;  %v2216_v54 = vpop.f32.mrb[5].mxu0  ;;  %v3753_v50 = vadd.f32 %v3752_v7, %v2256_v42  ;;  %v2338_v7 = vmul.f32 %v4813_v25, %v4813_v25 }
 0x18a   : > { %v2346_v61 = vadd.f32 %v2345_v37, %v2331_v35  ;;  %2304 = vst [vmem:[%s4811_s13 + $0x68] sm:$0xff] %v3751_v47  ;;  %v3739_v62 = vadd.f32 %v2216_v54, %v4800_v26  ;;  %v2309_v0 = vadd.f32 %v3736_v17, %v2308_v41  ;;  %v2342_v34 = vmul.f32 %v3751_v47, %v3751_v47 }
 0x18b   : > { %2296 = vst [vmem:[%s4811_s13 + $0x28] sm:$0xff] %v3738_v52  ;;  %2303 = vst [vmem:[%s4811_s13 + $0x60] sm:$0xff] %v3753_v50  ;;  %v3429_v4 = vpop.f32.mrb[22].mxu1  ;;  %v2334_v26 = vmul.f32 %v3738_v52, %v3738_v52  ;;  %v2341_v21 = vmul.f32 %v3753_v50, %v3753_v50 }
 0x18c   : > { %2295 = vst [vmem:[%s4811_s13 + $0x20] sm:$0xff] %v3739_v62  ;;  %v2310_v2 = vadd.f32 %v3739_v62, %v2309_v0  ;;  %v2333_v6 = vmul.f32 %v3739_v62, %v3739_v62  ;;  %v2347_v45 = vadd.f32 %v2346_v61, %v2332_v58  ;;  %v3417_v19 = vpop.f32.mrb[6].mxu0  ;;  %v3755_v55 = vadd.f32 %v3754_v13, %v3429_v4  ;;  %v2266_v56 = vpop.f32.mrb[23].mxu1 }
 0x18d   : > { %v3740_v3 = vadd.f32 %v3417_v19, %v4802_v29  ;;  %v2226_v59 = vpop.f32.mrb[7].mxu0  ;;  %v3757_v10 = vadd.f32 %v3756_v15, %v2266_v56  ;;  %v2337_v29 = vmul.f32 %v4815_v38, %v4815_v38 }
 0x18e   : > { %v2348_v12 = vadd.f32 %v2347_v45, %v2333_v6  ;;  %2306 = vst [vmem:[%s4811_s13 + $0x78] sm:$0xff] %v3755_v55  ;;  %v3741_v8 = vadd.f32 %v2226_v59, %v4804_v39  ;;  %v2311_v18 = vadd.f32 %v3738_v52, %v2310_v2 }
 0x18f   : > { %2298 = vst [vmem:[%s4811_s13 + $0x38] sm:$0xff] %v3740_v3  ;;  %2305 = vst [vmem:[%s4811_s13 + $0x70] sm:$0xff] %v3757_v10  ;;  %v2336_v36 = vmul.f32 %v3740_v3, %v3740_v3  ;;  %v2343_v53 = vmul.f32 %v3757_v10, %v3757_v10 }
 0x190   : > { %2297 = vst [vmem:[%s4811_s13 + $0x30] sm:$0xff] %v3741_v8  ;;  %v2312_v22 = vadd.f32 %v3741_v8, %v2311_v18  ;;  %v2335_v24 = vmul.f32 %v3741_v8, %v3741_v8  ;;  %v2349_v28 = vadd.f32 %v2348_v12, %v2334_v26 }
 0x192   : > { %v2313_v46 = vadd.f32 %v3740_v3, %v2312_v22  ;;  %v2350_v48 = vadd.f32 %v2349_v28, %v2335_v24 }
 0x194   : > { %v2314_v51 = vadd.f32 %v4815_v38, %v2313_v46  ;;  %v2351_v63 = vadd.f32 %v2350_v48, %v2336_v36 }
 0x196   : > { %v2315_v39 = vadd.f32 %v4813_v25, %v2314_v51  ;;  %v2352_v9 = vadd.f32 %v2351_v63, %v2337_v29  ;;  %v2344_v25 = vmul.f32 %v3755_v55, %v3755_v55 }
 0x198   : > { %v2353_v11 = vadd.f32 %v2352_v9, %v2338_v7  ;;  %v2316_v13 = vadd.f32 %v3749_v33, %v2315_v39 }
 0x19a   : > { %v2317_v15 = vadd.f32 %v3747_v5, %v2316_v13  ;;  %v2354_v20 = vadd.f32 %v2353_v11, %v2339_v16 }
 0x19c   : > { %v2318_v30 = vadd.f32 %v3753_v50, %v2317_v15  ;;  %v2355_v32 = vadd.f32 %v2354_v20, %v2340_v14 }
 0x19e   : > { %v2319_v38 = vadd.f32 %v3751_v47, %v2318_v30  ;;  %v2356_v44 = vadd.f32 %v2355_v32, %v2341_v21 }
 0x1a0   : > { %v2320_v49 = vadd.f32 %v3757_v10, %v2319_v38  ;;  %v2357_v57 = vadd.f32 %v2356_v44, %v2342_v34 }
 0x1a2   : > { %v2321_v60 = vadd.f32 %v3755_v55, %v2320_v49  ;;  %v2358_v1 = vadd.f32 %v2357_v57, %v2343_v53 }
 0x1a4   : > { %v2322_v31 = vrot.slane %v2321_v60, 4  ;;  %v2359_v17 = vadd.f32 %v2358_v1, %v2344_v25 }
 0x1a6   : > { %v2323_v5 = vadd.f32 %v2322_v31, %v2321_v60  ;;  %v2360_v23 = vrot.slane %v2359_v17, 4 }
 0x1a8   : > { %v2324_v33 = vrot.slane %v2323_v5, 2  ;;  %v2361_v37 = vadd.f32 %v2360_v23, %v2359_v17 }
 0x1aa   : > { %v2325_v27 = vadd.f32 %v2324_v33, %v2323_v5  ;;  %v2362_v40 = vrot.slane %v2361_v37, 2 }
 0x1ac   : > { %v2326_v41 = vrot.slane %v2325_v27, 1  ;;  %v2363_v35 = vadd.f32 %v2362_v40, %v2361_v37 }
 0x1ae   : > { %v2327_v43 = vadd.f32 %v2326_v41, %v2325_v27  ;;  %v2364_v47 = vrot.slane %v2363_v35, 1 }
 0x1b0   : > { %2328 = vst [vmem:[%s503_s15] sm:$0x1] %v2327_v43  ;;  %v2365_v42 = vadd.f32 %v2364_v47, %v2363_v35 }
 0x1b2   : > { %2366 = vst [vmem:[%s510_s19] sm:$0x1] %v2365_v42 }
 0x1b3 PF: > { %s19_s4 = sadd.s32 1, %s3953_s4   ;;  %s4879_s27 = smov %s3945_s29 }
 0x1b4   : > { %p16_p13 = scmp.ge.s32.totalorder %s19_s4, 6   ;;  %s4880_s28 = smov %s3949_s30 }
 0x1b5   : > { %s4881_s29 = smov %s4884_s5  ;;  %s4882_s30 = smov %s4888_s9 }
 0x1b6   :  { %18 = sbr.rel (!%p16_p13) target bundleno = 3 (0x3), region = 107 }

</bundles_post_ra>
